<compile_context>
chip_gen: v7x
topology: tpu7x:2x2x1
jax: 0.10.0
libtpu: 0.0.40
codegen_flags: <defaults>
</compile_context>

<pallas_src>
import jax
import jax.numpy as jnp
from jax.experimental import pallas as pl
from jax.experimental.pallas import tpu as pltpu

NUM_CLASSES = 10   # TODO(synk): `len(species)` is not defined in the source; using 10.
BN_EPS = 1e-5
# TODO(synk): BatchNorm is implemented in inference mode (running stats folded into
# scale/shift); training-mode batch statistics are not computed in-kernel.

_CONV_TM = {1: 4096, 2: 2048, 3: 1024}   # per-layer M-tile caps (pooled-output rows)
_FC_TM = 512                             # M-tile cap (batch rows) for fused fc1+fc2


def _round_up(x, m):
    return (x + m - 1) // m * m


def _tiles(m, cap):
    """Pick (n_tiles, tile_rows): big tiles to amortize per-step overhead, but at
    least 2 grid steps when there is enough work so v7x's 2nd TensorCore is used."""
    n = max(pl.cdiv(m, cap), 2) if m >= 16 else 1
    tm = _round_up(pl.cdiv(m, n), 8)
    return n, tm


# ---------------------------------------------------------------------------
# Pallas kernels
# ---------------------------------------------------------------------------
def conv_block_kernel(p_ref, w_ref, scale_ref, shift_ref, o_ref):
    """Fused conv(3x3 valid) + BatchNorm(eval) + ReLU + maxpool(2x2) over one M-tile.

    p_ref     : (TM, 16*Cin) bf16 -- 4x4 stride-2 input window per pooled pixel.
    w_ref     : (4, 16*Cin, Cout) bf16 -- conv weights zero-embedded into the 4x4
                window, one slice per 2x2-pool quadrant (VMEM-resident).
    scale_ref : (1, Cout) f32 folded BN scale.
    shift_ref : (1, Cout) f32 folded BN shift (includes conv bias).
    o_ref     : (TM, Cout) bf16 pooled output rows.
    """
    p = p_ref[...]
    scale = scale_ref[...]
    shift = shift_ref[...]

    def quad(q):
        acc = jnp.dot(p, w_ref[q], preferred_element_type=jnp.float32)
        return acc * scale + shift

    pooled = jnp.maximum(jnp.maximum(quad(0), quad(1)),
                         jnp.maximum(quad(2), quad(3)))
    # Single ReLU after the pool max (relu is monotone: relu(max(x)) == max(relu(x))).
    o_ref[...] = jnp.maximum(pooled, 0.0).astype(o_ref.dtype)


def fc1_fc2_kernel(x_ref, w1_ref, b1_ref, w2_ref, b2_ref, o_ref):
    """Fused fc1 + ReLU + fc2 over one batch-row tile; hidden stays on-chip."""
    h = jnp.dot(x_ref[...], w1_ref[...], preferred_element_type=jnp.float32)
    h = jnp.maximum(h + b1_ref[...], 0.0)
    y = jnp.dot(h.astype(jnp.bfloat16), w2_ref[...],
                preferred_element_type=jnp.float32)
    o_ref[...] = (y + b2_ref[...]).astype(o_ref.dtype)


# ---------------------------------------------------------------------------
# Wrappers (glue + pallas_call)
# ---------------------------------------------------------------------------
def conv_block(x, layer_params, tm_cap):
    """x: [B, H, W, Cin] NHWC -> pooled [B, (H-2)//2, (W-2)//2, Cout] bf16."""
    w_quads = layer_params["w"]          # [4, 16*Cin, Cout] bf16
    scale = layer_params["scale"]        # [1, Cout] f32
    shift = layer_params["shift"]        # [1, Cout] f32
    B, H, W, Cin = x.shape
    OH2, OW2 = (H - 2) // 2, (W - 2) // 2   # floor, like nn.MaxPool2d(2, 2)
    Cout = w_quads.shape[-1]
    K = 16 * Cin
    M = B * OH2 * OW2

    # One im2col at pooled resolution: row (b,i,j) holds the 4x4xCin input window
    # x[b, 2i:2i+4, 2j:2j+4, :] flattened as (wh*4+ww)*Cin + c.
    xb = x.astype(jnp.bfloat16)
    cols = [xb[:, wh: wh + 2 * OH2: 2, ww: ww + 2 * OW2: 2, :]
            for wh in range(4) for ww in range(4)]
    patches = jnp.concatenate(cols, axis=-1).reshape(M, K)

    n_tiles, tm = _tiles(M, tm_cap)
    mp = n_tiles * tm
    if mp != M:
        patches = jnp.pad(patches, ((0, mp - M), (0, 0)))

    cost = pl.CostEstimate(
        flops=2 * 4 * mp * K * Cout,
        transcendentals=0,
        bytes_accessed=mp * K * 2 + 4 * K * Cout * 2 + mp * Cout * 2 + 2 * Cout * 4)

    out = pl.pallas_call(
        conv_block_kernel,
        out_shape=jax.ShapeDtypeStruct((mp, Cout), jnp.bfloat16),
        grid=(n_tiles,),
        in_specs=[pl.BlockSpec((tm, K), lambda i: (i, 0)),          # streamed patches
                  pl.BlockSpec((4, K, Cout), lambda i: (0, 0, 0)),  # weights resident
                  pl.BlockSpec((1, Cout), lambda i: (0, 0)),        # scale resident
                  pl.BlockSpec((1, Cout), lambda i: (0, 0))],       # shift resident
        out_specs=pl.BlockSpec((tm, Cout), lambda i: (i, 0)),
        compiler_params=pltpu.CompilerParams(
            dimension_semantics=("parallel",)),
        cost_estimate=cost,
    )(patches, w_quads, scale, shift)
    return out[:M].reshape(B, OH2, OW2, Cout)


def fc1_fc2(x_flat, fc1p, fc2p):
    """x_flat: [B, F] bf16 (already in fc1-weight row order) -> [B, NUM_CLASSES] f32."""
    B, F = x_flat.shape
    w1, b1 = fc1p["w"], fc1p["b"]        # [F, Hdim] bf16, [1, Hdim] f32
    w2, b2 = fc2p["w"], fc2p["b"]        # [Hdim, Np] bf16, [1, Np] f32 (lane-dense)
    Hdim = w1.shape[1]
    Np = w2.shape[1]

    n_tiles, tm = _tiles(B, _FC_TM)
    mp = n_tiles * tm
    xb = x_flat.astype(jnp.bfloat16)
    if mp != B:
        xb = jnp.pad(xb, ((0, mp - B), (0, 0)))

    cost = pl.CostEstimate(
        flops=2 * mp * F * Hdim + 2 * mp * Hdim * Np,
        transcendentals=0,
        bytes_accessed=(mp * F * 2 + F * Hdim * 2 + Hdim * 4
                        + Hdim * Np * 2 + Np * 4 + mp * Np * 4))

    out = pl.pallas_call(
        fc1_fc2_kernel,
        out_shape=jax.ShapeDtypeStruct((mp, Np), jnp.float32),
        grid=(n_tiles,),
        in_specs=[pl.BlockSpec((tm, F), lambda i: (i, 0)),
                  pl.BlockSpec((F, Hdim), lambda i: (0, 0)),
                  pl.BlockSpec((1, Hdim), lambda i: (0, 0)),
                  pl.BlockSpec((Hdim, Np), lambda i: (0, 0)),
                  pl.BlockSpec((1, Np), lambda i: (0, 0))],
        out_specs=pl.BlockSpec((tm, Np), lambda i: (i, 0)),
        compiler_params=pltpu.CompilerParams(
            dimension_semantics=("parallel",)),
        cost_estimate=cost,
    )(xb, w1, b1, w2, b2)
    return out[:B, :NUM_CLASSES]


def neural_net_forward(x_nchw, prepped):
    """Forward pass of NeuralNet.  Input: [B, 3, 32, 32] (NCHW, like PyTorch)."""
    x = jnp.transpose(x_nchw, (0, 2, 3, 1))    # NCHW -> NHWC (channels on lanes)
    for l in (1, 2, 3):
        x = conv_block(x, prepped[f"conv{l}"], _CONV_TM[l])
    B = x.shape[0]
    x_flat = x.reshape(B, -1)                  # NHWC flatten; fc1 rows pre-permuted
    # TODO(synk): stretch goal from the review (fuse conv3 + fc1 + fc2 in one kernel)
    # is skipped: it needs a sublane->lane flatten of the 2x2x128 pooled tile.
    return fc1_fc2(x_flat, prepped["fc1"], prepped["fc2"])


# ---------------------------------------------------------------------------
# One-time weight preprocessing (run OUTSIDE the jitted forward)
# ---------------------------------------------------------------------------
def prepare_params(params, in_hw=32):
    """Fold BN into scale/shift, build per-quadrant 4x4-window conv weights, permute
    fc1 rows from NCHW-flatten order to NHWC-flatten order, pad fc2 to 128 lanes."""
    prepped = {}
    hs = in_hw
    for l in (1, 2, 3):
        cw = params[f"conv{l}"]["w"]                 # [Cout, Cin, 3, 3]
        cb = params[f"conv{l}"]["b"]
        bn = params[f"bn{l}"]
        cout, cin = cw.shape[0], cw.shape[1]
        scale = bn["gamma"] / jnp.sqrt(bn["var"] + BN_EPS)
        shift = bn["beta"] + (cb - bn["mean"]) * scale
        w_hwio = jnp.transpose(cw, (2, 3, 1, 0))     # [3, 3, Cin, Cout]
        quads = []
        for di in (0, 1):
            for dj in (0, 1):
                wq = jnp.zeros((4, 4, cin, cout), jnp.float32)
                wq = wq.at[di:di + 3, dj:dj + 3].set(w_hwio)
                quads.append(wq.reshape(16 * cin, cout))
        prepped[f"conv{l}"] = {
            "w": jnp.stack(quads).astype(jnp.bfloat16),          # [4, 16*Cin, Cout]
            "scale": scale.reshape(1, cout).astype(jnp.float32),
            "shift": shift.reshape(1, cout).astype(jnp.float32)}
        hs = (hs - 2) // 2
    # torch.flatten(x, 1) flattens NCHW (channel-major); fold that permutation into
    # fc1's weight rows so the runtime activation stays NHWC (no transpose at runtime).
    c = params["conv3"]["w"].shape[0]
    perm = (jnp.arange(c)[None, None, :] * (hs * hs)
            + jnp.arange(hs)[:, None, None] * hs
            + jnp.arange(hs)[None, :, None]).reshape(-1)
    w1 = params["fc1"]["w"][perm]
    hdim = w1.shape[1]
    ncls = params["fc2"]["w"].shape[1]
    npad = _round_up(ncls, 128)                      # lane-dense fc2 output store
    prepped["fc1"] = {"w": w1.astype(jnp.bfloat16),
                      "b": params["fc1"]["b"].reshape(1, hdim).astype(jnp.float32)}
    prepped["fc2"] = {
        "w": jnp.pad(params["fc2"]["w"], ((0, 0), (0, npad - ncls))).astype(jnp.bfloat16),
        "b": jnp.pad(params["fc2"]["b"], (0, npad - ncls)).reshape(1, npad).astype(jnp.float32)}
    return prepped


# ---------------------------------------------------------------------------
# Deterministic parameter init (shapes follow NeuralNet.__init__)
# ---------------------------------------------------------------------------
def init_params(key):
    keys = jax.random.split(key, 24)

    def nrm(k, shape, s=0.05):
        return s * jax.random.normal(k, shape, dtype=jnp.float32)

    params = {}
    conv_dims = [(32, 3), (64, 32), (128, 64)]
    ki = 0
    for l, (cout, cin) in enumerate(conv_dims, start=1):
        params[f"conv{l}"] = {"w": nrm(keys[ki], (cout, cin, 3, 3)),
                              "b": nrm(keys[ki + 1], (cout,))}
        params[f"bn{l}"] = {
            "gamma": 1.0 + nrm(keys[ki + 2], (cout,)),
            "beta": nrm(keys[ki + 3], (cout,)),
            "mean": nrm(keys[ki + 4], (cout,)),
            "var": 1.0 + 0.1 * jnp.abs(jax.random.normal(
                keys[ki + 5], (cout,), dtype=jnp.float32)),
        }
        ki += 6
    flatten_size = 128 * 2 * 2  # = 512, as computed by _get_flatten_size()
    params["fc1"] = {"w": nrm(keys[ki], (flatten_size, 512)),
                     "b": nrm(keys[ki + 1], (512,))}
    params["fc2"] = {"w": nrm(keys[ki + 2], (512, NUM_CLASSES)),
                     "b": nrm(keys[ki + 3], (NUM_CLASSES,))}
    return params


if __name__ == "__main__":
    key = jax.random.PRNGKey(0)
    pkey, xkey = jax.random.split(key)
    params = init_params(pkey)
    prepped = prepare_params(params)        # one-time weight prep, outside jit
    # Spatial size must be 32x32 / 3 channels (flatten_size depends on it).
    x = jax.random.normal(xkey, (2, 3, 32, 32), dtype=jnp.float32)
    out = jax.jit(neural_net_forward)(x, prepped)
    out = jax.block_until_ready(out)
    assert out.shape == (2, NUM_CLASSES), out.shape
    assert bool(jnp.all(jnp.isfinite(out)))
    print("KERNEL_OK")
</pallas_src>

<mosaic_0001>
module attributes {stable_mosaic.version = 11 : i64} {
  func.func @conv_block_kernel(%arg0: i32, %arg1: memref<232x48xbf16, #tpu.memory_space<vmem>>, %arg2: memref<4x48x32xbf16, #tpu.memory_space<vmem>>, %arg3: memref<1x32xf32, #tpu.memory_space<vmem>>, %arg4: memref<1x32xf32, #tpu.memory_space<vmem>>, %arg5: memref<232x32xbf16, #tpu.memory_space<vmem>>) attributes {dimension_semantics = [#tpu.dimension_semantics<parallel>], iteration_bounds = array<i64: 2>, scalar_prefetch = 0 : i64, scratch_operands = 0 : i64, tpu.core_type = #tpu.core_type<tc>, window_params = [{transform_indices = @transform_0, window_bounds = array<i64: 232, 48>}, {pipeline_mode = #tpu.pipeline_mode<synchronous>, transform_indices = @transform_1, window_bounds = array<i64: 4, 48, 32>}, {pipeline_mode = #tpu.pipeline_mode<synchronous>, transform_indices = @transform_2, window_bounds = array<i64: 1, 32>}, {pipeline_mode = #tpu.pipeline_mode<synchronous>, transform_indices = @transform_3, window_bounds = array<i64: 1, 32>}, {transform_indices = @transform_4, window_bounds = array<i64: 232, 32>}]} {
    %c0 = arith.constant 0 : index
    %c0_0 = arith.constant 0 : index
    %0 = vector.load %arg1[%c0, %c0_0] : memref<232x48xbf16, #tpu.memory_space<vmem>>, vector<232x48xbf16>
    %c0_1 = arith.constant 0 : index
    %c0_2 = arith.constant 0 : index
    %1 = vector.load %arg3[%c0_1, %c0_2] : memref<1x32xf32, #tpu.memory_space<vmem>>, vector<1x32xf32>
    %c0_3 = arith.constant 0 : index
    %c0_4 = arith.constant 0 : index
    %2 = vector.load %arg4[%c0_3, %c0_4] : memref<1x32xf32, #tpu.memory_space<vmem>>, vector<1x32xf32>
    %c0_5 = arith.constant 0 : index
    %c0_6 = arith.constant 0 : index
    %c0_7 = arith.constant 0 : index
    %3 = vector.load %arg2[%c0_5, %c0_6, %c0_7] : memref<4x48x32xbf16, #tpu.memory_space<vmem>>, vector<1x48x32xbf16>
    %4 = vector.shape_cast %3 : vector<1x48x32xbf16> to vector<48x32xbf16>
    %cst = arith.constant dense<0.000000e+00> : vector<232x32xf32>
    %5 = tpu.matmul %0, %4, %cst {dimension_numbers = #tpu.dot_dimension_numbers<[1], [0], [0], [1], [0, 0, 1, 1], [], []>} : vector<232x48xbf16>, vector<48x32xbf16>, vector<232x32xf32> -> vector<232x32xf32>
    %6 = vector.broadcast %1 : vector<1x32xf32> to vector<232x32xf32>
    %7 = arith.mulf %5, %6 : vector<232x32xf32>
    %8 = vector.broadcast %2 : vector<1x32xf32> to vector<232x32xf32>
    %9 = arith.addf %7, %8 : vector<232x32xf32>
    %c1 = arith.constant 1 : index
    %c0_8 = arith.constant 0 : index
    %c0_9 = arith.constant 0 : index
    %10 = vector.load %arg2[%c1, %c0_8, %c0_9] : memref<4x48x32xbf16, #tpu.memory_space<vmem>>, vector<1x48x32xbf16>
    %11 = vector.shape_cast %10 : vector<1x48x32xbf16> to vector<48x32xbf16>
    %cst_10 = arith.constant dense<0.000000e+00> : vector<232x32xf32>
    %12 = tpu.matmul %0, %11, %cst_10 {dimension_numbers = #tpu.dot_dimension_numbers<[1], [0], [0], [1], [0, 0, 1, 1], [], []>} : vector<232x48xbf16>, vector<48x32xbf16>, vector<232x32xf32> -> vector<232x32xf32>
    %13 = vector.broadcast %1 : vector<1x32xf32> to vector<232x32xf32>
    %14 = arith.mulf %12, %13 : vector<232x32xf32>
    %15 = vector.broadcast %2 : vector<1x32xf32> to vector<232x32xf32>
    %16 = arith.addf %14, %15 : vector<232x32xf32>
    %17 = arith.maximumf %9, %16 : vector<232x32xf32>
    %c2 = arith.constant 2 : index
    %c0_11 = arith.constant 0 : index
    %c0_12 = arith.constant 0 : index
    %18 = vector.load %arg2[%c2, %c0_11, %c0_12] : memref<4x48x32xbf16, #tpu.memory_space<vmem>>, vector<1x48x32xbf16>
    %19 = vector.shape_cast %18 : vector<1x48x32xbf16> to vector<48x32xbf16>
    %cst_13 = arith.constant dense<0.000000e+00> : vector<232x32xf32>
    %20 = tpu.matmul %0, %19, %cst_13 {dimension_numbers = #tpu.dot_dimension_numbers<[1], [0], [0], [1], [0, 0, 1, 1], [], []>} : vector<232x48xbf16>, vector<48x32xbf16>, vector<232x32xf32> -> vector<232x32xf32>
    %21 = vector.broadcast %1 : vector<1x32xf32> to vector<232x32xf32>
    %22 = arith.mulf %20, %21 : vector<232x32xf32>
    %23 = vector.broadcast %2 : vector<1x32xf32> to vector<232x32xf32>
    %24 = arith.addf %22, %23 : vector<232x32xf32>
    %c3 = arith.constant 3 : index
    %c0_14 = arith.constant 0 : index
    %c0_15 = arith.constant 0 : index
    %25 = vector.load %arg2[%c3, %c0_14, %c0_15] : memref<4x48x32xbf16, #tpu.memory_space<vmem>>, vector<1x48x32xbf16>
    %26 = vector.shape_cast %25 : vector<1x48x32xbf16> to vector<48x32xbf16>
    %cst_16 = arith.constant dense<0.000000e+00> : vector<232x32xf32>
    %27 = tpu.matmul %0, %26, %cst_16 {dimension_numbers = #tpu.dot_dimension_numbers<[1], [0], [0], [1], [0, 0, 1, 1], [], []>} : vector<232x48xbf16>, vector<48x32xbf16>, vector<232x32xf32> -> vector<232x32xf32>
    %28 = vector.broadcast %1 : vector<1x32xf32> to vector<232x32xf32>
    %29 = arith.mulf %27, %28 : vector<232x32xf32>
    %30 = vector.broadcast %2 : vector<1x32xf32> to vector<232x32xf32>
    %31 = arith.addf %29, %30 : vector<232x32xf32>
    %32 = arith.maximumf %24, %31 : vector<232x32xf32>
    %33 = arith.maximumf %17, %32 : vector<232x32xf32>
    %cst_17 = arith.constant 0.000000e+00 : f32
    %34 = vector.broadcast %cst_17 : f32 to vector<232x32xf32>
    %35 = arith.maximumf %33, %34 : vector<232x32xf32>
    %36 = arith.truncf %35 : vector<232x32xf32> to vector<232x32xbf16>
    %c0_18 = arith.constant 0 : index
    %c0_19 = arith.constant 0 : index
    %37 = vector.load %arg5[%c0_18, %c0_19] : memref<232x32xbf16, #tpu.memory_space<vmem>>, vector<232x32xbf16>
    tpu.vector_store %arg5[%c0_18, %c0_19], %36 {strides = array<i32>} : memref<232x32xbf16, #tpu.memory_space<vmem>>, vector<232x32xbf16>,
    return
  }
  func.func @transform_0(%arg0: i32) -> (i32, i32) {
    %c0_i32 = arith.constant 0 : i32
    %c0_i32_0 = arith.constant 0 : i32
    return %arg0, %c0_i32 : i32, i32
  }
  func.func @transform_1(%arg0: i32) -> (i32, i32, i32) {
    %c0_i32 = arith.constant 0 : i32
    %c0_i32_0 = arith.constant 0 : i32
    %c0_i32_1 = arith.constant 0 : i32
    %c0_i32_2 = arith.constant 0 : i32
    return %c0_i32, %c0_i32_0, %c0_i32_1 : i32, i32, i32
  }
  func.func @transform_2(%arg0: i32) -> (i32, i32) {
    %c0_i32 = arith.constant 0 : i32
    %c0_i32_0 = arith.constant 0 : i32
    %c0_i32_1 = arith.constant 0 : i32
    return %c0_i32, %c0_i32_0 : i32, i32
  }
  func.func @transform_3(%arg0: i32) -> (i32, i32) {
    %c0_i32 = arith.constant 0 : i32
    %c0_i32_0 = arith.constant 0 : i32
    %c0_i32_1 = arith.constant 0 : i32
    return %c0_i32, %c0_i32_0 : i32, i32
  }
  func.func @transform_4(%arg0: i32) -> (i32, i32) {
    %c0_i32 = arith.constant 0 : i32
    %c0_i32_0 = arith.constant 0 : i32
    return %arg0, %c0_i32 : i32, i32
  }
}

module attributes {stable_mosaic.version = 11 : i64} {
  func.func @conv_block_kernel(%arg0: i32, %arg1: memref<40x512xbf16, #tpu.memory_space<vmem>>, %arg2: memref<4x512x64xbf16, #tpu.memory_space<vmem>>, %arg3: memref<1x64xf32, #tpu.memory_space<vmem>>, %arg4: memref<1x64xf32, #tpu.memory_space<vmem>>, %arg5: memref<40x64xbf16, #tpu.memory_space<vmem>>) attributes {dimension_semantics = [#tpu.dimension_semantics<parallel>], iteration_bounds = array<i64: 2>, scalar_prefetch = 0 : i64, scratch_operands = 0 : i64, tpu.core_type = #tpu.core_type<tc>, window_params = [{transform_indices = @transform_0, window_bounds = array<i64: 40, 512>}, {pipeline_mode = #tpu.pipeline_mode<synchronous>, transform_indices = @transform_1, window_bounds = array<i64: 4, 512, 64>}, {pipeline_mode = #tpu.pipeline_mode<synchronous>, transform_indices = @transform_2, window_bounds = array<i64: 1, 64>}, {pipeline_mode = #tpu.pipeline_mode<synchronous>, transform_indices = @transform_3, window_bounds = array<i64: 1, 64>}, {transform_indices = @transform_4, window_bounds = array<i64: 40, 64>}]} {
    %c0 = arith.constant 0 : index
    %c0_0 = arith.constant 0 : index
    %0 = vector.load %arg1[%c0, %c0_0] : memref<40x512xbf16, #tpu.memory_space<vmem>>, vector<40x512xbf16>
    %c0_1 = arith.constant 0 : index
    %c0_2 = arith.constant 0 : index
    %1 = vector.load %arg3[%c0_1, %c0_2] : memref<1x64xf32, #tpu.memory_space<vmem>>, vector<1x64xf32>
    %c0_3 = arith.constant 0 : index
    %c0_4 = arith.constant 0 : index
    %2 = vector.load %arg4[%c0_3, %c0_4] : memref<1x64xf32, #tpu.memory_space<vmem>>, vector<1x64xf32>
    %c0_5 = arith.constant 0 : index
    %c0_6 = arith.constant 0 : index
    %c0_7 = arith.constant 0 : index
    %3 = vector.load %arg2[%c0_5, %c0_6, %c0_7] : memref<4x512x64xbf16, #tpu.memory_space<vmem>>, vector<1x512x64xbf16>
    %4 = vector.shape_cast %3 : vector<1x512x64xbf16> to vector<512x64xbf16>
    %cst = arith.constant dense<0.000000e+00> : vector<40x64xf32>
    %5 = tpu.matmul %0, %4, %cst {dimension_numbers = #tpu.dot_dimension_numbers<[1], [0], [0], [1], [0, 0, 1, 1], [], []>} : vector<40x512xbf16>, vector<512x64xbf16>, vector<40x64xf32> -> vector<40x64xf32>
    %6 = vector.broadcast %1 : vector<1x64xf32> to vector<40x64xf32>
    %7 = arith.mulf %5, %6 : vector<40x64xf32>
    %8 = vector.broadcast %2 : vector<1x64xf32> to vector<40x64xf32>
    %9 = arith.addf %7, %8 : vector<40x64xf32>
    %c1 = arith.constant 1 : index
    %c0_8 = arith.constant 0 : index
    %c0_9 = arith.constant 0 : index
    %10 = vector.load %arg2[%c1, %c0_8, %c0_9] : memref<4x512x64xbf16, #tpu.memory_space<vmem>>, vector<1x512x64xbf16>
    %11 = vector.shape_cast %10 : vector<1x512x64xbf16> to vector<512x64xbf16>
    %cst_10 = arith.constant dense<0.000000e+00> : vector<40x64xf32>
    %12 = tpu.matmul %0, %11, %cst_10 {dimension_numbers = #tpu.dot_dimension_numbers<[1], [0], [0], [1], [0, 0, 1, 1], [], []>} : vector<40x512xbf16>, vector<512x64xbf16>, vector<40x64xf32> -> vector<40x64xf32>
    %13 = vector.broadcast %1 : vector<1x64xf32> to vector<40x64xf32>
    %14 = arith.mulf %12, %13 : vector<40x64xf32>
    %15 = vector.broadcast %2 : vector<1x64xf32> to vector<40x64xf32>
    %16 = arith.addf %14, %15 : vector<40x64xf32>
    %17 = arith.maximumf %9, %16 : vector<40x64xf32>
    %c2 = arith.constant 2 : index
    %c0_11 = arith.constant 0 : index
    %c0_12 = arith.constant 0 : index
    %18 = vector.load %arg2[%c2, %c0_11, %c0_12] : memref<4x512x64xbf16, #tpu.memory_space<vmem>>, vector<1x512x64xbf16>
    %19 = vector.shape_cast %18 : vector<1x512x64xbf16> to vector<512x64xbf16>
    %cst_13 = arith.constant dense<0.000000e+00> : vector<40x64xf32>
    %20 = tpu.matmul %0, %19, %cst_13 {dimension_numbers = #tpu.dot_dimension_numbers<[1], [0], [0], [1], [0, 0, 1, 1], [], []>} : vector<40x512xbf16>, vector<512x64xbf16>, vector<40x64xf32> -> vector<40x64xf32>
    %21 = vector.broadcast %1 : vector<1x64xf32> to vector<40x64xf32>
    %22 = arith.mulf %20, %21 : vector<40x64xf32>
    %23 = vector.broadcast %2 : vector<1x64xf32> to vector<40x64xf32>
    %24 = arith.addf %22, %23 : vector<40x64xf32>
    %c3 = arith.constant 3 : index
    %c0_14 = arith.constant 0 : index
    %c0_15 = arith.constant 0 : index
    %25 = vector.load %arg2[%c3, %c0_14, %c0_15] : memref<4x512x64xbf16, #tpu.memory_space<vmem>>, vector<1x512x64xbf16>
    %26 = vector.shape_cast %25 : vector<1x512x64xbf16> to vector<512x64xbf16>
    %cst_16 = arith.constant dense<0.000000e+00> : vector<40x64xf32>
    %27 = tpu.matmul %0, %26, %cst_16 {dimension_numbers = #tpu.dot_dimension_numbers<[1], [0], [0], [1], [0, 0, 1, 1], [], []>} : vector<40x512xbf16>, vector<512x64xbf16>, vector<40x64xf32> -> vector<40x64xf32>
    %28 = vector.broadcast %1 : vector<1x64xf32> to vector<40x64xf32>
    %29 = arith.mulf %27, %28 : vector<40x64xf32>
    %30 = vector.broadcast %2 : vector<1x64xf32> to vector<40x64xf32>
    %31 = arith.addf %29, %30 : vector<40x64xf32>
    %32 = arith.maximumf %24, %31 : vector<40x64xf32>
    %33 = arith.maximumf %17, %32 : vector<40x64xf32>
    %cst_17 = arith.constant 0.000000e+00 : f32
    %34 = vector.broadcast %cst_17 : f32 to vector<40x64xf32>
    %35 = arith.maximumf %33, %34 : vector<40x64xf32>
    %36 = arith.truncf %35 : vector<40x64xf32> to vector<40x64xbf16>
    %c0_18 = arith.constant 0 : index
    %c0_19 = arith.constant 0 : index
    %37 = vector.load %arg5[%c0_18, %c0_19] : memref<40x64xbf16, #tpu.memory_space<vmem>>, vector<40x64xbf16>
    tpu.vector_store %arg5[%c0_18, %c0_19], %36 {strides = array<i32>} : memref<40x64xbf16, #tpu.memory_space<vmem>>, vector<40x64xbf16>,
    return
  }
  func.func @transform_0(%arg0: i32) -> (i32, i32) {
    %c0_i32 = arith.constant 0 : i32
    %c0_i32_0 = arith.constant 0 : i32
    return %arg0, %c0_i32 : i32, i32
  }
  func.func @transform_1(%arg0: i32) -> (i32, i32, i32) {
    %c0_i32 = arith.constant 0 : i32
    %c0_i32_0 = arith.constant 0 : i32
    %c0_i32_1 = arith.constant 0 : i32
    %c0_i32_2 = arith.constant 0 : i32
    return %c0_i32, %c0_i32_0, %c0_i32_1 : i32, i32, i32
  }
  func.func @transform_2(%arg0: i32) -> (i32, i32) {
    %c0_i32 = arith.constant 0 : i32
    %c0_i32_0 = arith.constant 0 : i32
    %c0_i32_1 = arith.constant 0 : i32
    return %c0_i32, %c0_i32_0 : i32, i32
  }
  func.func @transform_3(%arg0: i32) -> (i32, i32) {
    %c0_i32 = arith.constant 0 : i32
    %c0_i32_0 = arith.constant 0 : i32
    %c0_i32_1 = arith.constant 0 : i32
    return %c0_i32, %c0_i32_0 : i32, i32
  }
  func.func @transform_4(%arg0: i32) -> (i32, i32) {
    %c0_i32 = arith.constant 0 : i32
    %c0_i32_0 = arith.constant 0 : i32
    return %arg0, %c0_i32 : i32, i32
  }
}

module attributes {stable_mosaic.version = 11 : i64} {
  func.func @conv_block_kernel(%arg0: i32, %arg1: memref<8x1024xbf16, #tpu.memory_space<vmem>>, %arg2: memref<4x1024x128xbf16, #tpu.memory_space<vmem>>, %arg3: memref<1x128xf32, #tpu.memory_space<vmem>>, %arg4: memref<1x128xf32, #tpu.memory_space<vmem>>, %arg5: memref<8x128xbf16, #tpu.memory_space<vmem>>) attributes {dimension_semantics = [#tpu.dimension_semantics<parallel>], iteration_bounds = array<i64: 1>, scalar_prefetch = 0 : i64, scratch_operands = 0 : i64, tpu.core_type = #tpu.core_type<tc>, window_params = [{transform_indices = @transform_0, window_bounds = array<i64: 8, 1024>}, {pipeline_mode = #tpu.pipeline_mode<synchronous>, transform_indices = @transform_1, window_bounds = array<i64: 4, 1024, 128>}, {pipeline_mode = #tpu.pipeline_mode<synchronous>, transform_indices = @transform_2, window_bounds = array<i64: 1, 128>}, {pipeline_mode = #tpu.pipeline_mode<synchronous>, transform_indices = @transform_3, window_bounds = array<i64: 1, 128>}, {transform_indices = @transform_4, window_bounds = array<i64: 8, 128>}]} {
    %c0 = arith.constant 0 : index
    %c0_0 = arith.constant 0 : index
    %0 = vector.load %arg1[%c0, %c0_0] : memref<8x1024xbf16, #tpu.memory_space<vmem>>, vector<8x1024xbf16>
    %c0_1 = arith.constant 0 : index
    %c0_2 = arith.constant 0 : index
    %1 = vector.load %arg3[%c0_1, %c0_2] : memref<1x128xf32, #tpu.memory_space<vmem>>, vector<1x128xf32>
    %c0_3 = arith.constant 0 : index
    %c0_4 = arith.constant 0 : index
    %2 = vector.load %arg4[%c0_3, %c0_4] : memref<1x128xf32, #tpu.memory_space<vmem>>, vector<1x128xf32>
    %c0_5 = arith.constant 0 : index
    %c0_6 = arith.constant 0 : index
    %c0_7 = arith.constant 0 : index
    %3 = vector.load %arg2[%c0_5, %c0_6, %c0_7] : memref<4x1024x128xbf16, #tpu.memory_space<vmem>>, vector<1x1024x128xbf16>
    %4 = vector.shape_cast %3 : vector<1x1024x128xbf16> to vector<1024x128xbf16>
    %cst = arith.constant dense<0.000000e+00> : vector<8x128xf32>
    %5 = tpu.matmul %0, %4, %cst {dimension_numbers = #tpu.dot_dimension_numbers<[1], [0], [0], [1], [0, 0, 1, 1], [], []>} : vector<8x1024xbf16>, vector<1024x128xbf16>, vector<8x128xf32> -> vector<8x128xf32>
    %6 = vector.broadcast %1 : vector<1x128xf32> to vector<8x128xf32>
    %7 = arith.mulf %5, %6 : vector<8x128xf32>
    %8 = vector.broadcast %2 : vector<1x128xf32> to vector<8x128xf32>
    %9 = arith.addf %7, %8 : vector<8x128xf32>
    %c1 = arith.constant 1 : index
    %c0_8 = arith.constant 0 : index
    %c0_9 = arith.constant 0 : index
    %10 = vector.load %arg2[%c1, %c0_8, %c0_9] : memref<4x1024x128xbf16, #tpu.memory_space<vmem>>, vector<1x1024x128xbf16>
    %11 = vector.shape_cast %10 : vector<1x1024x128xbf16> to vector<1024x128xbf16>
    %cst_10 = arith.constant dense<0.000000e+00> : vector<8x128xf32>
    %12 = tpu.matmul %0, %11, %cst_10 {dimension_numbers = #tpu.dot_dimension_numbers<[1], [0], [0], [1], [0, 0, 1, 1], [], []>} : vector<8x1024xbf16>, vector<1024x128xbf16>, vector<8x128xf32> -> vector<8x128xf32>
    %13 = vector.broadcast %1 : vector<1x128xf32> to vector<8x128xf32>
    %14 = arith.mulf %12, %13 : vector<8x128xf32>
    %15 = vector.broadcast %2 : vector<1x128xf32> to vector<8x128xf32>
    %16 = arith.addf %14, %15 : vector<8x128xf32>
    %17 = arith.maximumf %9, %16 : vector<8x128xf32>
    %c2 = arith.constant 2 : index
    %c0_11 = arith.constant 0 : index
    %c0_12 = arith.constant 0 : index
    %18 = vector.load %arg2[%c2, %c0_11, %c0_12] : memref<4x1024x128xbf16, #tpu.memory_space<vmem>>, vector<1x1024x128xbf16>
    %19 = vector.shape_cast %18 : vector<1x1024x128xbf16> to vector<1024x128xbf16>
    %cst_13 = arith.constant dense<0.000000e+00> : vector<8x128xf32>
    %20 = tpu.matmul %0, %19, %cst_13 {dimension_numbers = #tpu.dot_dimension_numbers<[1], [0], [0], [1], [0, 0, 1, 1], [], []>} : vector<8x1024xbf16>, vector<1024x128xbf16>, vector<8x128xf32> -> vector<8x128xf32>
    %21 = vector.broadcast %1 : vector<1x128xf32> to vector<8x128xf32>
    %22 = arith.mulf %20, %21 : vector<8x128xf32>
    %23 = vector.broadcast %2 : vector<1x128xf32> to vector<8x128xf32>
    %24 = arith.addf %22, %23 : vector<8x128xf32>
    %c3 = arith.constant 3 : index
    %c0_14 = arith.constant 0 : index
    %c0_15 = arith.constant 0 : index
    %25 = vector.load %arg2[%c3, %c0_14, %c0_15] : memref<4x1024x128xbf16, #tpu.memory_space<vmem>>, vector<1x1024x128xbf16>
    %26 = vector.shape_cast %25 : vector<1x1024x128xbf16> to vector<1024x128xbf16>
    %cst_16 = arith.constant dense<0.000000e+00> : vector<8x128xf32>
    %27 = tpu.matmul %0, %26, %cst_16 {dimension_numbers = #tpu.dot_dimension_numbers<[1], [0], [0], [1], [0, 0, 1, 1], [], []>} : vector<8x1024xbf16>, vector<1024x128xbf16>, vector<8x128xf32> -> vector<8x128xf32>
    %28 = vector.broadcast %1 : vector<1x128xf32> to vector<8x128xf32>
    %29 = arith.mulf %27, %28 : vector<8x128xf32>
    %30 = vector.broadcast %2 : vector<1x128xf32> to vector<8x128xf32>
    %31 = arith.addf %29, %30 : vector<8x128xf32>
    %32 = arith.maximumf %24, %31 : vector<8x128xf32>
    %33 = arith.maximumf %17, %32 : vector<8x128xf32>
    %cst_17 = arith.constant 0.000000e+00 : f32
    %34 = vector.broadcast %cst_17 : f32 to vector<8x128xf32>
    %35 = arith.maximumf %33, %34 : vector<8x128xf32>
    %36 = arith.truncf %35 : vector<8x128xf32> to vector<8x128xbf16>
    %c0_18 = arith.constant 0 : index
    %c0_19 = arith.constant 0 : index
    %37 = vector.load %arg5[%c0_18, %c0_19] : memref<8x128xbf16, #tpu.memory_space<vmem>>, vector<8x128xbf16>
    tpu.vector_store %arg5[%c0_18, %c0_19], %36 {strides = array<i32>} : memref<8x128xbf16, #tpu.memory_space<vmem>>, vector<8x128xbf16>,
    return
  }
  func.func @transform_0(%arg0: i32) -> (i32, i32) {
    %c0_i32 = arith.constant 0 : i32
    %c0_i32_0 = arith.constant 0 : i32
    return %arg0, %c0_i32 : i32, i32
  }
  func.func @transform_1(%arg0: i32) -> (i32, i32, i32) {
    %c0_i32 = arith.constant 0 : i32
    %c0_i32_0 = arith.constant 0 : i32
    %c0_i32_1 = arith.constant 0 : i32
    %c0_i32_2 = arith.constant 0 : i32
    return %c0_i32, %c0_i32_0, %c0_i32_1 : i32, i32, i32
  }
  func.func @transform_2(%arg0: i32) -> (i32, i32) {
    %c0_i32 = arith.constant 0 : i32
    %c0_i32_0 = arith.constant 0 : i32
    %c0_i32_1 = arith.constant 0 : i32
    return %c0_i32, %c0_i32_0 : i32, i32
  }
  func.func @transform_3(%arg0: i32) -> (i32, i32) {
    %c0_i32 = arith.constant 0 : i32
    %c0_i32_0 = arith.constant 0 : i32
    %c0_i32_1 = arith.constant 0 : i32
    return %c0_i32, %c0_i32_0 : i32, i32
  }
  func.func @transform_4(%arg0: i32) -> (i32, i32) {
    %c0_i32 = arith.constant 0 : i32
    %c0_i32_0 = arith.constant 0 : i32
    return %arg0, %c0_i32 : i32, i32
  }
}

module attributes {stable_mosaic.version = 11 : i64} {
  func.func @fc1_fc2_kernel(%arg0: i32, %arg1: memref<8x512xbf16, #tpu.memory_space<vmem>>, %arg2: memref<512x512xbf16, #tpu.memory_space<vmem>>, %arg3: memref<1x512xf32, #tpu.memory_space<vmem>>, %arg4: memref<512x128xbf16, #tpu.memory_space<vmem>>, %arg5: memref<1x128xf32, #tpu.memory_space<vmem>>, %arg6: memref<8x128xf32, #tpu.memory_space<vmem>>) attributes {dimension_semantics = [#tpu.dimension_semantics<parallel>], iteration_bounds = array<i64: 1>, scalar_prefetch = 0 : i64, scratch_operands = 0 : i64, tpu.core_type = #tpu.core_type<tc>, window_params = [{transform_indices = @transform_0, window_bounds = array<i64: 8, 512>}, {pipeline_mode = #tpu.pipeline_mode<synchronous>, transform_indices = @transform_1, window_bounds = array<i64: 512, 512>}, {pipeline_mode = #tpu.pipeline_mode<synchronous>, transform_indices = @transform_2, window_bounds = array<i64: 1, 512>}, {pipeline_mode = #tpu.pipeline_mode<synchronous>, transform_indices = @transform_3, window_bounds = array<i64: 512, 128>}, {pipeline_mode = #tpu.pipeline_mode<synchronous>, transform_indices = @transform_4, window_bounds = array<i64: 1, 128>}, {transform_indices = @transform_5, window_bounds = array<i64: 8, 128>}]} {
    %c0 = arith.constant 0 : index
    %c0_0 = arith.constant 0 : index
    %0 = vector.load %arg1[%c0, %c0_0] : memref<8x512xbf16, #tpu.memory_space<vmem>>, vector<8x512xbf16>
    %c0_1 = arith.constant 0 : index
    %c0_2 = arith.constant 0 : index
    %1 = vector.load %arg2[%c0_1, %c0_2] : memref<512x512xbf16, #tpu.memory_space<vmem>>, vector<512x512xbf16>
    %cst = arith.constant dense<0.000000e+00> : vector<8x512xf32>
    %2 = tpu.matmul %0, %1, %cst {dimension_numbers = #tpu.dot_dimension_numbers<[1], [0], [0], [1], [0, 0, 1, 1], [], []>} : vector<8x512xbf16>, vector<512x512xbf16>, vector<8x512xf32> -> vector<8x512xf32>
    %c0_3 = arith.constant 0 : index
    %c0_4 = arith.constant 0 : index
    %3 = vector.load %arg3[%c0_3, %c0_4] : memref<1x512xf32, #tpu.memory_space<vmem>>, vector<1x512xf32>
    %4 = vector.broadcast %3 : vector<1x512xf32> to vector<8x512xf32>
    %5 = arith.addf %2, %4 : vector<8x512xf32>
    %cst_5 = arith.constant 0.000000e+00 : f32
    %6 = vector.broadcast %cst_5 : f32 to vector<8x512xf32>
    %7 = arith.maximumf %5, %6 : vector<8x512xf32>
    %8 = arith.truncf %7 : vector<8x512xf32> to vector<8x512xbf16>
    %c0_6 = arith.constant 0 : index
    %c0_7 = arith.constant 0 : index
    %9 = vector.load %arg4[%c0_6, %c0_7] : memref<512x128xbf16, #tpu.memory_space<vmem>>, vector<512x128xbf16>
    %cst_8 = arith.constant dense<0.000000e+00> : vector<8x128xf32>
    %10 = tpu.matmul %8, %9, %cst_8 {dimension_numbers = #tpu.dot_dimension_numbers<[1], [0], [0], [1], [0, 0, 1, 1], [], []>} : vector<8x512xbf16>, vector<512x128xbf16>, vector<8x128xf32> -> vector<8x128xf32>
    %c0_9 = arith.constant 0 : index
    %c0_10 = arith.constant 0 : index
    %11 = vector.load %arg5[%c0_9, %c0_10] : memref<1x128xf32, #tpu.memory_space<vmem>>, vector<1x128xf32>
    %12 = vector.broadcast %11 : vector<1x128xf32> to vector<8x128xf32>
    %13 = arith.addf %10, %12 : vector<8x128xf32>
    %c0_11 = arith.constant 0 : index
    %c0_12 = arith.constant 0 : index
    %14 = vector.load %arg6[%c0_11, %c0_12] : memref<8x128xf32, #tpu.memory_space<vmem>>, vector<8x128xf32>
    tpu.vector_store %arg6[%c0_11, %c0_12], %13 {strides = array<i32>} : memref<8x128xf32, #tpu.memory_space<vmem>>, vector<8x128xf32>,
    return
  }
  func.func @transform_0(%arg0: i32) -> (i32, i32) {
    %c0_i32 = arith.constant 0 : i32
    %c0_i32_0 = arith.constant 0 : i32
    return %arg0, %c0_i32 : i32, i32
  }
  func.func @transform_1(%arg0: i32) -> (i32, i32) {
    %c0_i32 = arith.constant 0 : i32
    %c0_i32_0 = arith.constant 0 : i32
    %c0_i32_1 = arith.constant 0 : i32
    return %c0_i32, %c0_i32_0 : i32, i32
  }
  func.func @transform_2(%arg0: i32) -> (i32, i32) {
    %c0_i32 = arith.constant 0 : i32
    %c0_i32_0 = arith.constant 0 : i32
    %c0_i32_1 = arith.constant 0 : i32
    return %c0_i32, %c0_i32_0 : i32, i32
  }
  func.func @transform_3(%arg0: i32) -> (i32, i32) {
    %c0_i32 = arith.constant 0 : i32
    %c0_i32_0 = arith.constant 0 : i32
    %c0_i32_1 = arith.constant 0 : i32
    return %c0_i32, %c0_i32_0 : i32, i32
  }
  func.func @transform_4(%arg0: i32) -> (i32, i32) {
    %c0_i32 = arith.constant 0 : i32
    %c0_i32_0 = arith.constant 0 : i32
    %c0_i32_1 = arith.constant 0 : i32
    return %c0_i32, %c0_i32_0 : i32, i32
  }
  func.func @transform_5(%arg0: i32) -> (i32, i32) {
    %c0_i32 = arith.constant 0 : i32
    %c0_i32_0 = arith.constant 0 : i32
    return %arg0, %c0_i32 : i32, i32
  }
}

</mosaic_0001>

<bundles_post_ra>
// kernel: neural_net_forward.4
= control target key start
LH: loop header
LB: loop body
LE: loop exit
PB: predicated region body
PF: predicated region fallthrough
CT: control target
= control target key end

     0   :  { %s2206_s15 = smov 0   ;;  %s3138_s0 = inlined_call_operand.vmem [shape: bf16[464,48], index: 0, kind: input, shape index: {}]   ;;  %s3139_s1 = inlined_call_operand.vmem [shape: bf16[4,48,32], index: 1, kind: input, shape index: {}]   ;;  %s3140_s2 = inlined_call_operand.vmem [shape: f32[1,32], index: 2, kind: input, shape index: {}]   ;;  %s3141_s3 = inlined_call_operand.vmem [shape: f32[1,32], index: 3, kind: input, shape index: {}]   ;;  %s3142_s4 = inlined_call_operand.vmem [shape: bf16[464,32], index: 4, kind: output, shape index: {}]  }
   0x1 LB: > { %s1622_s16 = sadd.s32 4294967295, %s2177_s15   ;;  %p1626_p0 = scmp.ge.s32.totalorder %s2177_s15, 1  ;;  %s2177_s15 = sphi %s2206_s15, %s14_s15  }
   0x2   : > { %p163_p1 = scmp.lt.s32.totalorder %s2177_s15, 3 }
   0x4   : > { %p164_p2 = pnand %p1626_p0, %p163_p1 }
   0x6   : > { %167 = sbr.rel (%p164_p2) target bundleno = 484 (0x1e4), region = 36 }
   0xd   : > { %v2142_v0 = vld [vmem:[%s3139_s1] sm:$0xff]   ;;  %v2179_v1 = vmov 0.0   ;;  %v2143_v2 = vld [vmem:[%s3139_s1 + $0x18] sm:$0xff]   ;;  %v2144_v3 = vld [vmem:[%s3139_s1 + $0x8] sm:$0xff]   ;;  %vm2180_vm0 = vmmov 0   ;;  %s189_s23 = smul.u32 29, %s1622_s16 }
   0xe   : > { %1868 = vmatprep.subr.bf16.mxu0 %v2179_v1  ;;  %1934 = vmatprep.subr.bf16.mxu1 %v2179_v1  ;;  %v2145_v4 = vld [vmem:[%s3139_s1 + $0x20] sm:$0xff]   ;;  %v2146_v5 = vld [vmem:[%s3139_s1 + $0x10] sm:$0xff]   ;;  %v2147_v6 = vld [vmem:[%s3139_s1 + $0x28] sm:$0xff]   ;;  %vm330_vm1 = vcmask 392192   ;;  %vm1536_vm2 = vcmask 257024  }
   0xf   : > { %1869 = vmatpush3.bf16.msra.mxu0 %v2142_v0  ;;  %1874 = vmatprep.mubr.msk.bf16.mxu0 %vm2180_vm0, %v2179_v1  ;;  %p190_p3 = scmp.lt.s32.totalorder %s189_s23, 57  ;;  %v2149_v7 = vld [vmem:[%s3139_s1 + $0x30] sm:$0xff]   ;;  %v2150_v9 = vld [vmem:[%s3139_s1 + $0x48] sm:$0xff]   ;;  %v2156_v10 = vld [vmem:[%s3139_s1 + $0x38] sm:$0xff]  }
  0x10   : > { %1935 = vmatpush3.bf16.msra.mxu1 %v2143_v2  ;;  %1870 = vmatprep.subr.bf16.mxu0 %v2179_v1  ;;  %v2157_v11 = vld [vmem:[%s3139_s1 + $0x50] sm:$0xff]   ;;  %v2163_v13 = vld [vmem:[%s3139_s1 + $0x40] sm:$0xff]   ;;  %v2164_v14 = vld [vmem:[%s3139_s1 + $0x58] sm:$0xff]  }
  0x11   : > { %1936 = vmatprep.subr.bf16.mxu1 %v2179_v1  ;;  %1940 = vmatprep.mubr.msk.bf16.mxu1 %vm2180_vm0, %v2179_v1  ;;  %s3212_s23 = smov (!%p190_p3, %s189_s23), 57  ;;  %v2536_v28 = vld [vmem:[%s3140_s2] ss:$0 sm:$0xff] }
  0x12   : > { %s1627_s30 = sshll.u32 %s3212_s23, 2  ;;  %v2545_v29 = vld [vmem:[%s3141_s3] ss:$0 sm:$0xff] }
  0x13   : > { %1871 = vmatpush3.bf16.msra.mxu0 %v2144_v3  ;;  %s2250_s7 = scalar_lea.vmem %s3138_s0, %s1627_s30  ;;  %s2878_s28 = scalar_lea.vmem %s3142_s4, %s1627_s30 }
  0x14   : > { %1937 = vmatpush3.bf16.msra.mxu1 %v2145_v4  ;;  %1872 = vmatprep.subr.bf16.mxu0 %v2179_v1  ;;  %v2256_v8 = vld [vmem:[%s2250_s7] sm:$0xff]   ;;  %v2279_v12 = vld [vmem:[%s2250_s7 + $0x8] sm:$0xff]   ;;  %v2299_v15 = vld [vmem:[%s2250_s7 + $0x10] sm:$0xff]  }
  0x15   : > { %1938 = vmatprep.subr.bf16.mxu1 %v2179_v1  ;;  %v2310_v16 = vld [vmem:[%s2250_s7 + $0x18] sm:$0xff]   ;;  %v2321_v17 = vld [vmem:[%s2250_s7 + $0x20] sm:$0xff]   ;;  %v2332_v18 = vld [vmem:[%s2250_s7 + $0x28] sm:$0xff]  }
  0x16   : > { %v2343_v19 = vld [vmem:[%s2250_s7 + $0x30] sm:$0xff]   ;;  %v2354_v20 = vld [vmem:[%s2250_s7 + $0x38] sm:$0xff]   ;;  %v2365_v21 = vld [vmem:[%s2250_s7 + $0x40] sm:$0xff]  }
  0x17   : > { %1873 = vmatpush3.bf16.msra.mxu0 %v2146_v5  ;;  %v2376_v22 = vld [vmem:[%s2250_s7 + $0x48] sm:$0xff]   ;;  %v2387_v23 = vld [vmem:[%s2250_s7 + $0x50] sm:$0xff]   ;;  %v2398_v24 = vld [vmem:[%s2250_s7 + $0x58] sm:$0xff]  }
  0x18   : > { %1939 = vmatpush3.bf16.msra.mxu1 %v2147_v6  ;;  %2000 = vmatprep.subr.bf16.mxu0 %v2179_v1  ;;  %v2409_v25 = vld [vmem:[%s2250_s7 + $0x60] sm:$0xff]   ;;  %v2420_v26 = vld [vmem:[%s2250_s7 + $0x68] sm:$0xff]   ;;  %v2431_v27 = vld [vmem:[%s2250_s7 + $0x70] ss:$0 sps:$4 sm:$0xff]  }
  0x19   : > { %2066 = vmatprep.subr.bf16.mxu1 %v2179_v1 }
  0x1a   : > { %1875 = vmatmul.mubr.msk.bf16.vlgmr.msra.gmra.mrb[0].mxu0 %vm330_vm1, %v2256_v8 }
  0x1b   : > { %1941 = vmatmul.mubr.msk.bf16.vlgmr.msra.gmra.mrb[0].mxu1 %vm330_vm1, %v2256_v8  ;;  %2001 = vmatpush3.bf16.msra.mxu0 %v2149_v7 }
  0x1c   : > { %2067 = vmatpush3.bf16.msra.mxu1 %v2150_v9  ;;  %1878 = vmatprep.mubr.msk.bf16.mxu0 %vm2180_vm0, %v2179_v1 }
  0x1d   : > { %1944 = vmatprep.mubr.msk.bf16.mxu1 %vm2180_vm0, %v2179_v1  ;;  %2002 = vmatprep.subr.bf16.mxu0 %v2179_v1 }
  0x1e   : > { %2068 = vmatprep.subr.bf16.mxu1 %v2179_v1 }
  0x1f   : > { %2003 = vmatpush3.bf16.msra.mxu0 %v2156_v10 }
  0x20   : > { %2069 = vmatpush3.bf16.msra.mxu1 %v2157_v11  ;;  %2004 = vmatprep.subr.bf16.mxu0 %v2179_v1 }
  0x21   : > { %2070 = vmatprep.subr.bf16.mxu1 %v2179_v1 }
  0x22   : > { %1879 = vmatmul.mubr.msk.bf16.gmra.mrb[4].mxu0 %vm330_vm1, %v2279_v12 }
  0x23   : > { %1945 = vmatmul.mubr.msk.bf16.gmra.mrb[4].mxu1 %vm330_vm1, %v2279_v12  ;;  %1882 = vmatprep.mubr.msk.bf16.mxu0 %vm2180_vm0, %v2179_v1 }
  0x24   : > { %1948 = vmatprep.mubr.msk.bf16.mxu1 %vm2180_vm0, %v2179_v1  ;;  %2005 = vmatpush3.bf16.msra.mxu0 %v2163_v13 }
  0x25   : > { %2071 = vmatpush3.bf16.msra.mxu1 %v2164_v14 }
  0x2a   : > { %1883 = vmatmul.mubr.msk.bf16.gmra.mrb[8].mxu0 %vm330_vm1, %v2299_v15 }
  0x2b   : > { %1949 = vmatmul.mubr.msk.bf16.gmra.mrb[8].mxu1 %vm330_vm1, %v2299_v15  ;;  %1886 = vmatprep.mubr.msk.bf16.mxu0 %vm2180_vm0, %v2179_v1 }
  0x2c   : > { %1952 = vmatprep.mubr.msk.bf16.mxu1 %vm2180_vm0, %v2179_v1 }
  0x32   : > { %1887 = vmatmul.mubr.msk.bf16.gmra.mrb[12].mxu0 %vm330_vm1, %v2310_v16 }
  0x33   : > { %1953 = vmatmul.mubr.msk.bf16.gmra.mrb[12].mxu1 %vm330_vm1, %v2310_v16  ;;  %1890 = vmatprep.mubr.msk.bf16.mxu0 %vm2180_vm0, %v2179_v1 }
  0x34   : > { %1956 = vmatprep.mubr.msk.bf16.mxu1 %vm2180_vm0, %v2179_v1 }
  0x3a   : > { %1891 = vmatmul.mubr.msk.bf16.gmra.mrb[16].mxu0 %vm330_vm1, %v2321_v17 }
  0x3b   : > { %1957 = vmatmul.mubr.msk.bf16.gmra.mrb[16].mxu1 %vm330_vm1, %v2321_v17  ;;  %1894 = vmatprep.mubr.msk.bf16.mxu0 %vm2180_vm0, %v2179_v1 }
  0x3c   : > { %1960 = vmatprep.mubr.msk.bf16.mxu1 %vm2180_vm0, %v2179_v1 }
  0x42   : > { %1895 = vmatmul.mubr.msk.bf16.gmra.mrb[20].mxu0 %vm330_vm1, %v2332_v18 }
  0x43   : > { %1961 = vmatmul.mubr.msk.bf16.gmra.mrb[20].mxu1 %vm330_vm1, %v2332_v18  ;;  %1898 = vmatprep.mubr.msk.bf16.mxu0 %vm2180_vm0, %v2179_v1 }
  0x44   : > { %1964 = vmatprep.mubr.msk.bf16.mxu1 %vm2180_vm0, %v2179_v1 }
  0x4a   : > { %1899 = vmatmul.mubr.msk.bf16.gmra.mrb[24].mxu0 %vm330_vm1, %v2343_v19 }
  0x4b   : > { %1965 = vmatmul.mubr.msk.bf16.gmra.mrb[24].mxu1 %vm330_vm1, %v2343_v19  ;;  %1902 = vmatprep.mubr.msk.bf16.mxu0 %vm2180_vm0, %v2179_v1 }
  0x4c   : > { %1968 = vmatprep.mubr.msk.bf16.mxu1 %vm2180_vm0, %v2179_v1 }
  0x52   : > { %1903 = vmatmul.mubr.msk.bf16.gmra.mrb[28].mxu0 %vm330_vm1, %v2354_v20 }
  0x53   : > { %1969 = vmatmul.mubr.msk.bf16.gmra.mrb[28].mxu1 %vm330_vm1, %v2354_v20  ;;  %1906 = vmatprep.mubr.msk.bf16.mxu0 %vm2180_vm0, %v2179_v1 }
  0x54   : > { %1972 = vmatprep.mubr.msk.bf16.mxu1 %vm2180_vm0, %v2179_v1 }
  0x5a   : > { %1907 = vmatmul.mubr.msk.bf16.gmra.mrb[32].mxu0 %vm330_vm1, %v2365_v21 }
  0x5b   : > { %1973 = vmatmul.mubr.msk.bf16.gmra.mrb[32].mxu1 %vm330_vm1, %v2365_v21  ;;  %1910 = vmatprep.mubr.msk.bf16.mxu0 %vm2180_vm0, %v2179_v1 }
  0x5c   : > { %1976 = vmatprep.mubr.msk.bf16.mxu1 %vm2180_vm0, %v2179_v1 }
  0x62   : > { %1911 = vmatmul.mubr.msk.bf16.gmra.mrb[36].mxu0 %vm330_vm1, %v2376_v22 }
  0x63   : > { %1977 = vmatmul.mubr.msk.bf16.gmra.mrb[36].mxu1 %vm330_vm1, %v2376_v22  ;;  %1914 = vmatprep.mubr.msk.bf16.mxu0 %vm2180_vm0, %v2179_v1 }
  0x64   : > { %1980 = vmatprep.mubr.msk.bf16.mxu1 %vm2180_vm0, %v2179_v1 }
  0x6a   : > { %1915 = vmatmul.mubr.msk.bf16.gmra.mrb[40].mxu0 %vm330_vm1, %v2387_v23 }
  0x6b   : > { %1981 = vmatmul.mubr.msk.bf16.gmra.mrb[40].mxu1 %vm330_vm1, %v2387_v23  ;;  %1918 = vmatprep.mubr.msk.bf16.mxu0 %vm2180_vm0, %v2179_v1 }
  0x6c   : > { %1984 = vmatprep.mubr.msk.bf16.mxu1 %vm2180_vm0, %v2179_v1 }
  0x72   : > { %1919 = vmatmul.mubr.msk.bf16.gmra.mrb[44].mxu0 %vm330_vm1, %v2398_v24 }
  0x73   : > { %1985 = vmatmul.mubr.msk.bf16.gmra.mrb[44].mxu1 %vm330_vm1, %v2398_v24  ;;  %1922 = vmatprep.mubr.msk.bf16.mxu0 %vm2180_vm0, %v2179_v1 }
  0x74   : > { %1988 = vmatprep.mubr.msk.bf16.mxu1 %vm2180_vm0, %v2179_v1 }
  0x7a   : > { %1923 = vmatmul.mubr.msk.bf16.gmra.mrb[48].mxu0 %vm330_vm1, %v2409_v25 }
  0x7b   : > { %1989 = vmatmul.mubr.msk.bf16.gmra.mrb[48].mxu1 %vm330_vm1, %v2409_v25  ;;  %1926 = vmatprep.mubr.msk.bf16.mxu0 %vm2180_vm0, %v2179_v1 }
  0x7c   : > { %1992 = vmatprep.mubr.msk.bf16.mxu1 %vm2180_vm0, %v2179_v1 }
  0x82   : > { %1927 = vmatmul.mubr.msk.bf16.gmra.mrb[52].mxu0 %vm330_vm1, %v2420_v26 }
  0x83   : > { %1993 = vmatmul.mubr.msk.bf16.gmra.mrb[52].mxu1 %vm330_vm1, %v2420_v26  ;;  %1930 = vmatprep.mubr.msk.bf16.mxu0 %vm2180_vm0, %v2179_v1 }
  0x84   : > { %1996 = vmatprep.mubr.msk.bf16.mxu1 %vm2180_vm0, %v2179_v1 }
  0x8a   : > { %1931 = vmatmul.mubr.msk.bf16.gmra.mrb[56].mxu0 %vm330_vm1, %v2431_v27 }
  0x8b   : > { %1997 = vmatmul.mubr.msk.bf16.gmra.mrb[56].mxu1 %vm330_vm1, %v2431_v27  ;;  %2006 = vmatprep.mubr.msk.bf16.mxu0 %vm2180_vm0, %v2179_v1 }
  0x8c   : > { %2072 = vmatprep.mubr.msk.bf16.mxu1 %vm2180_vm0, %v2179_v1 }
  0x92   : > { %2007 = vmatmul.mubr.msk.bf16.vlgmr.msra.gmra.mrb[60].mxu0 %vm330_vm1, %v2256_v8 }
  0x93   : > { %2073 = vmatmul.mubr.msk.bf16.vlgmr.msra.gmra.mrb[60].mxu1 %vm330_vm1, %v2256_v8  ;;  %2010 = vmatprep.mubr.msk.bf16.mxu0 %vm2180_vm0, %v2179_v1 }
  0x94   : > { %2076 = vmatprep.mubr.msk.bf16.mxu1 %vm2180_vm0, %v2179_v1 }
  0x9a   : > { %2011 = vmatmul.mubr.msk.bf16.gmra.mrb[64].mxu0 %vm330_vm1, %v2279_v12 }
  0x9b   : > { %2077 = vmatmul.mubr.msk.bf16.gmra.mrb[64].mxu1 %vm330_vm1, %v2279_v12  ;;  %2014 = vmatprep.mubr.msk.bf16.mxu0 %vm2180_vm0, %v2179_v1 }
  0x9c   : > { %2080 = vmatprep.mubr.msk.bf16.mxu1 %vm2180_vm0, %v2179_v1 }
  0xa2   : > { %2015 = vmatmul.mubr.msk.bf16.gmra.mrb[68].mxu0 %vm330_vm1, %v2299_v15 }
  0xa3   : > { %2081 = vmatmul.mubr.msk.bf16.gmra.mrb[68].mxu1 %vm330_vm1, %v2299_v15  ;;  %2018 = vmatprep.mubr.msk.bf16.mxu0 %vm2180_vm0, %v2179_v1 }
  0xa4   : > { %2084 = vmatprep.mubr.msk.bf16.mxu1 %vm2180_vm0, %v2179_v1 }
  0xaa   : > { %2019 = vmatmul.mubr.msk.bf16.gmra.mrb[72].mxu0 %vm330_vm1, %v2310_v16 }
  0xab   : > { %2085 = vmatmul.mubr.msk.bf16.gmra.mrb[72].mxu1 %vm330_vm1, %v2310_v16  ;;  %2022 = vmatprep.mubr.msk.bf16.mxu0 %vm2180_vm0, %v2179_v1 }
  0xac   : > { %2088 = vmatprep.mubr.msk.bf16.mxu1 %vm2180_vm0, %v2179_v1 }
  0xb2   : > { %2023 = vmatmul.mubr.msk.bf16.gmra.mrb[76].mxu0 %vm330_vm1, %v2321_v17 }
  0xb3   : > { %2089 = vmatmul.mubr.msk.bf16.gmra.mrb[76].mxu1 %vm330_vm1, %v2321_v17  ;;  %2026 = vmatprep.mubr.msk.bf16.mxu0 %vm2180_vm0, %v2179_v1 }
  0xb4   : > { %2092 = vmatprep.mubr.msk.bf16.mxu1 %vm2180_vm0, %v2179_v1 }
  0xba   : > { %2027 = vmatmul.mubr.msk.bf16.gmra.mrb[80].mxu0 %vm330_vm1, %v2332_v18 }
  0xbb   : > { %2093 = vmatmul.mubr.msk.bf16.gmra.mrb[80].mxu1 %vm330_vm1, %v2332_v18  ;;  %2030 = vmatprep.mubr.msk.bf16.mxu0 %vm2180_vm0, %v2179_v1 }
  0xbc   : > { %2096 = vmatprep.mubr.msk.bf16.mxu1 %vm2180_vm0, %v2179_v1 }
  0xc2   : > { %2031 = vmatmul.mubr.msk.bf16.gmra.mrb[84].mxu0 %vm330_vm1, %v2343_v19 }
  0xc3   : > { %2097 = vmatmul.mubr.msk.bf16.gmra.mrb[84].mxu1 %vm330_vm1, %v2343_v19  ;;  %2034 = vmatprep.mubr.msk.bf16.mxu0 %vm2180_vm0, %v2179_v1 }
  0xc4   : > { %2100 = vmatprep.mubr.msk.bf16.mxu1 %vm2180_vm0, %v2179_v1 }
  0xca   : > { %2035 = vmatmul.mubr.msk.bf16.gmra.mrb[88].mxu0 %vm330_vm1, %v2354_v20 }
  0xcb   : > { %2101 = vmatmul.mubr.msk.bf16.gmra.mrb[88].mxu1 %vm330_vm1, %v2354_v20  ;;  %2038 = vmatprep.mubr.msk.bf16.mxu0 %vm2180_vm0, %v2179_v1 }
  0xcc   : > { %2104 = vmatprep.mubr.msk.bf16.mxu1 %vm2180_vm0, %v2179_v1 }
  0xd2   : > { %2039 = vmatmul.mubr.msk.bf16.gmra.mrb[92].mxu0 %vm330_vm1, %v2365_v21 }
  0xd3   : > { %2105 = vmatmul.mubr.msk.bf16.gmra.mrb[92].mxu1 %vm330_vm1, %v2365_v21  ;;  %2042 = vmatprep.mubr.msk.bf16.mxu0 %vm2180_vm0, %v2179_v1 }
  0xd4   : > { %2108 = vmatprep.mubr.msk.bf16.mxu1 %vm2180_vm0, %v2179_v1 }
  0xda   : > { %2043 = vmatmul.mubr.msk.bf16.gmra.mrb[96].mxu0 %vm330_vm1, %v2376_v22 }
  0xdb   : > { %2109 = vmatmul.mubr.msk.bf16.gmra.mrb[96].mxu1 %vm330_vm1, %v2376_v22  ;;  %2046 = vmatprep.mubr.msk.bf16.mxu0 %vm2180_vm0, %v2179_v1 }
  0xdc   : > { %2112 = vmatprep.mubr.msk.bf16.mxu1 %vm2180_vm0, %v2179_v1 }
  0xe2   : > { %2047 = vmatmul.mubr.msk.bf16.gmra.mrb[100].mxu0 %vm330_vm1, %v2387_v23 }
  0xe3   : > { %2113 = vmatmul.mubr.msk.bf16.gmra.mrb[100].mxu1 %vm330_vm1, %v2387_v23  ;;  %2050 = vmatprep.mubr.msk.bf16.mxu0 %vm2180_vm0, %v2179_v1 }
  0xe4   : > { %2116 = vmatprep.mubr.msk.bf16.mxu1 %vm2180_vm0, %v2179_v1 }
  0xea   : > { %2051 = vmatmul.mubr.msk.bf16.gmra.mrb[104].mxu0 %vm330_vm1, %v2398_v24 }
  0xeb   : > { %2117 = vmatmul.mubr.msk.bf16.gmra.mrb[104].mxu1 %vm330_vm1, %v2398_v24  ;;  %2054 = vmatprep.mubr.msk.bf16.mxu0 %vm2180_vm0, %v2179_v1 }
  0xec   : > { %2120 = vmatprep.mubr.msk.bf16.mxu1 %vm2180_vm0, %v2179_v1 }
  0xed   : > { %v410_v30 = vpop.f32.mrb[0].mxu0 }
  0xee   : > { %v534_v31 = vmul.f32 %v2536_v28, %v410_v30  ;;  %v657_v32 = vpop.f32.mrb[0].mxu1  ;;  %v1876_v33 = vpop.f32.mrb[1].mxu0 }
  0xef   : > { %v775_v34 = vmul.f32 %v2536_v28, %v657_v32  ;;  %v1942_v35 = vpop.f32.mrb[1].mxu1  ;;  %v413_v36 = vpop.f32.mrb[2].mxu0 }
  0xf0   : > { %v2550_v37 = vadd.f32 %v2545_v29, %v534_v31  ;;  %v535_v38 = vmul.f32 %v2536_v28, %v413_v36  ;;  %v660_v39 = vpop.f32.mrb[2].mxu1  ;;  %v1877_v40 = vpop.f32.mrb[3].mxu0 }
  0xf1   : > { %v2554_v41 = vadd.f32 %v2545_v29, %v775_v34  ;;  %v776_v42 = vmul.f32 %v2536_v28, %v660_v39  ;;  %v1943_v43 = vpop.f32.mrb[3].mxu1 }
  0xf2   : > { %v2558_v44 = vadd.f32 %v2545_v29, %v535_v38  ;;  %2055 = vmatmul.mubr.msk.bf16.gmra.mrb[108].mxu0 %vm330_vm1, %v2409_v25 }
  0xf3   : > { %v2565_v46 = vadd.f32 %v2545_v29, %v776_v42  ;;  %2121 = vmatmul.mubr.msk.bf16.gmra.mrb[108].mxu1 %vm330_vm1, %v2409_v25  ;;  %2058 = vmatprep.mubr.msk.bf16.mxu0 %vm2180_vm0, %v2179_v1 }
  0xf4   : > { %2124 = vmatprep.mubr.msk.bf16.mxu1 %vm2180_vm0, %v2179_v1 }
  0xf5   : > { %v418_v48 = vpop.f32.mrb[4].mxu0 }
  0xf6   : > { %v536_v49 = vmul.f32 %v2536_v28, %v418_v48  ;;  %v665_v50 = vpop.f32.mrb[4].mxu1  ;;  %v1880_v51 = vpop.f32.mrb[5].mxu0 }
  0xf7   : > { %v777_v52 = vmul.f32 %v2536_v28, %v665_v50  ;;  %v1946_v53 = vpop.f32.mrb[5].mxu1  ;;  %v421_v54 = vpop.f32.mrb[6].mxu0 }
  0xf8   : > { %v2578_v55 = vadd.f32 %v2545_v29, %v536_v49  ;;  %v537_v56 = vmul.f32 %v2536_v28, %v421_v54  ;;  %v668_v57 = vpop.f32.mrb[6].mxu1  ;;  %v1881_v58 = vpop.f32.mrb[7].mxu0 }
  0xf9   : > { %v2582_v59 = vadd.f32 %v2545_v29, %v777_v52  ;;  %v778_v60 = vmul.f32 %v2536_v28, %v668_v57  ;;  %v1947_v61 = vpop.f32.mrb[7].mxu1 }
  0xfa   : > { %v2586_v62 = vadd.f32 %v2545_v29, %v537_v56  ;;  %2059 = vmatmul.mubr.msk.bf16.gmra.mrb[112].mxu0 %vm330_vm1, %v2420_v26 }
  0xfb   : > { %v2593_v0 = vadd.f32 %v2545_v29, %v778_v60  ;;  %2125 = vmatmul.mubr.msk.bf16.gmra.mrb[112].mxu1 %vm330_vm1, %v2420_v26  ;;  %2062 = vmatprep.mubr.msk.bf16.mxu0 %vm2180_vm0, %v2179_v1 }
  0xfc   : > { %2128 = vmatprep.mubr.msk.bf16.mxu1 %vm2180_vm0, %v2179_v1 }
  0xfd   : > { %v426_v3 = vpop.f32.mrb[8].mxu0 }
  0xfe   : > { %v538_v4 = vmul.f32 %v2536_v28, %v426_v3  ;;  %v673_v5 = vpop.f32.mrb[8].mxu1  ;;  %v1884_v6 = vpop.f32.mrb[9].mxu0 }
  0xff   : > { %v779_v7 = vmul.f32 %v2536_v28, %v673_v5  ;;  %v1950_v8 = vpop.f32.mrb[9].mxu1  ;;  %v429_v9 = vpop.f32.mrb[10].mxu0 }
 0x100   : > { %v2606_v10 = vadd.f32 %v2545_v29, %v538_v4  ;;  %v539_v11 = vmul.f32 %v2536_v28, %v429_v9  ;;  %v676_v12 = vpop.f32.mrb[10].mxu1  ;;  %v1885_v13 = vpop.f32.mrb[11].mxu0 }
 0x101   : > { %v2610_v1 = vadd.f32 %v2545_v29, %v779_v7  ;;  %v780_v14 = vmul.f32 %v2536_v28, %v676_v12  ;;  %v1951_v15 = vpop.f32.mrb[11].mxu1 }
 0x102   : > { %v2614_v16 = vadd.f32 %v2545_v29, %v539_v11  ;;  %2063 = vmatmul.mubr.msk.bf16.gmra.mrb[116].mxu0 %vm330_vm1, %v2431_v27 }
 0x103   : > { %v2621_v18 = vadd.f32 %v2545_v29, %v780_v14  ;;  %2129 = vmatmul.mubr.msk.bf16.gmra.mrb[116].mxu1 %vm330_vm1, %v2431_v27 }
 0x105   : > { %v434_v20 = vpop.f32.mrb[12].mxu0 }
 0x106   : > { %v540_v21 = vmul.f32 %v2536_v28, %v434_v20  ;;  %v681_v22 = vpop.f32.mrb[12].mxu1  ;;  %v1888_v23 = vpop.f32.mrb[13].mxu0 }
 0x107   : > { %v781_v24 = vmul.f32 %v2536_v28, %v681_v22  ;;  %v1954_v25 = vpop.f32.mrb[13].mxu1  ;;  %v437_v26 = vpop.f32.mrb[14].mxu0 }
 0x108   : > { %v2630_v30 = vadd.f32 %v2545_v29, %v540_v21  ;;  %v541_v31 = vmul.f32 %v2536_v28, %v437_v26  ;;  %v684_v32 = vpop.f32.mrb[14].mxu1  ;;  %v1889_v33 = vpop.f32.mrb[15].mxu0 }
 0x109   : > { %v2634_v27 = vadd.f32 %v2545_v29, %v781_v24  ;;  %v782_v34 = vmul.f32 %v2536_v28, %v684_v32  ;;  %v1955_v35 = vpop.f32.mrb[15].mxu1 }
 0x10a   : > { %v2638_v36 = vadd.f32 %v2545_v29, %v541_v31 }
 0x10b   : > { %v2643_v39 = vadd.f32 %v2545_v29, %v782_v34 }
 0x10d   : > { %v442_v42 = vpop.f32.mrb[16].mxu0 }
 0x10e   : > { %v542_v43 = vmul.f32 %v2536_v28, %v442_v42  ;;  %v689_v48 = vpop.f32.mrb[16].mxu1  ;;  %v1892_v49 = vpop.f32.mrb[17].mxu0 }
 0x10f   : > { %v783_v50 = vmul.f32 %v2536_v28, %v689_v48  ;;  %v1958_v51 = vpop.f32.mrb[17].mxu1  ;;  %v445_v52 = vpop.f32.mrb[18].mxu0 }
 0x110   : > { %v2650_v53 = vadd.f32 %v2545_v29, %v542_v43  ;;  %v543_v54 = vmul.f32 %v2536_v28, %v445_v52  ;;  %v692_v56 = vpop.f32.mrb[18].mxu1  ;;  %v1893_v57 = vpop.f32.mrb[19].mxu0 }
 0x111   : > { %v2654_v58 = vadd.f32 %v2545_v29, %v783_v50  ;;  %v784_v60 = vmul.f32 %v2536_v28, %v692_v56  ;;  %v1959_v61 = vpop.f32.mrb[19].mxu1 }
 0x112   : > { %v2658_v3 = vadd.f32 %v2545_v29, %v543_v54 }
 0x113   : > { %v2663_v5 = vadd.f32 %v2545_v29, %v784_v60 }
 0x115   : > { %v450_v7 = vpop.f32.mrb[20].mxu0 }
 0x116   : > { %v544_v8 = vmul.f32 %v2536_v28, %v450_v7  ;;  %v697_v9 = vpop.f32.mrb[20].mxu1  ;;  %v1896_v11 = vpop.f32.mrb[21].mxu0 }
 0x117   : > { %v785_v12 = vmul.f32 %v2536_v28, %v697_v9  ;;  %v1962_v13 = vpop.f32.mrb[21].mxu1  ;;  %v453_v14 = vpop.f32.mrb[22].mxu0 }
 0x118   : > { %v2670_v15 = vadd.f32 %v2545_v29, %v544_v8  ;;  %v545_v20 = vmul.f32 %v2536_v28, %v453_v14  ;;  %v700_v21 = vpop.f32.mrb[22].mxu1  ;;  %v1897_v22 = vpop.f32.mrb[23].mxu0 }
 0x119   : > { %v2674_v23 = vadd.f32 %v2545_v29, %v785_v12  ;;  %v786_v24 = vmul.f32 %v2536_v28, %v700_v21  ;;  %v1963_v25 = vpop.f32.mrb[23].mxu1 }
 0x11a   : > { %v2678_v26 = vadd.f32 %v2545_v29, %v545_v20 }
 0x11b   : > { %v2683_v32 = vadd.f32 %v2545_v29, %v786_v24 }
 0x11d   : > { %v458_v34 = vpop.f32.mrb[24].mxu0 }
 0x11e   : > { %v546_v35 = vmul.f32 %v2536_v28, %v458_v34  ;;  %v705_v42 = vpop.f32.mrb[24].mxu1  ;;  %v1900_v43 = vpop.f32.mrb[25].mxu0 }
 0x11f   : > { %v787_v48 = vmul.f32 %v2536_v28, %v705_v42  ;;  %v1966_v49 = vpop.f32.mrb[25].mxu1  ;;  %v461_v50 = vpop.f32.mrb[26].mxu0 }
 0x120   : > { %v2690_v51 = vadd.f32 %v2545_v29, %v546_v35  ;;  %v547_v52 = vmul.f32 %v2536_v28, %v461_v50  ;;  %v708_v54 = vpop.f32.mrb[26].mxu1  ;;  %v1901_v56 = vpop.f32.mrb[27].mxu0 }
 0x121   : > { %v2694_v57 = vadd.f32 %v2545_v29, %v787_v48  ;;  %v788_v60 = vmul.f32 %v2536_v28, %v708_v54  ;;  %v1967_v61 = vpop.f32.mrb[27].mxu1 }
 0x122   : > { %v2698_v7 = vadd.f32 %v2545_v29, %v547_v52 }
 0x123   : > { %v2703_v9 = vadd.f32 %v2545_v29, %v788_v60 }
 0x125   : > { %v466_v12 = vpop.f32.mrb[28].mxu0 }
 0x126   : > { %v548_v13 = vmul.f32 %v2536_v28, %v466_v12  ;;  %v713_v14 = vpop.f32.mrb[28].mxu1  ;;  %v1904_v20 = vpop.f32.mrb[29].mxu0 }
 0x127   : > { %v789_v21 = vmul.f32 %v2536_v28, %v713_v14  ;;  %v1970_v22 = vpop.f32.mrb[29].mxu1  ;;  %v469_v24 = vpop.f32.mrb[30].mxu0 }
 0x128   : > { %v2710_v25 = vadd.f32 %v2545_v29, %v548_v13  ;;  %v549_v34 = vmul.f32 %v2536_v28, %v469_v24  ;;  %v716_v35 = vpop.f32.mrb[30].mxu1  ;;  %v1905_v42 = vpop.f32.mrb[31].mxu0 }
 0x129   : > { %v2714_v43 = vadd.f32 %v2545_v29, %v789_v21  ;;  %v790_v48 = vmul.f32 %v2536_v28, %v716_v35  ;;  %v1971_v49 = vpop.f32.mrb[31].mxu1 }
 0x12a   : > { %v2718_v50 = vadd.f32 %v2545_v29, %v549_v34 }
 0x12b   : > { %v2723_v54 = vadd.f32 %v2545_v29, %v790_v48 }
 0x12d   : > { %v474_v60 = vpop.f32.mrb[32].mxu0 }
 0x12e   : > { %v550_v61 = vmul.f32 %v2536_v28, %v474_v60  ;;  %v721_v12 = vpop.f32.mrb[32].mxu1  ;;  %v1908_v13 = vpop.f32.mrb[33].mxu0 }
 0x12f   : > { %v791_v14 = vmul.f32 %v2536_v28, %v721_v12  ;;  %v1974_v20 = vpop.f32.mrb[33].mxu1  ;;  %v477_v21 = vpop.f32.mrb[34].mxu0 }
 0x130   : > { %v2730_v22 = vadd.f32 %v2545_v29, %v550_v61  ;;  %v551_v24 = vmul.f32 %v2536_v28, %v477_v21  ;;  %v724_v34 = vpop.f32.mrb[34].mxu1  ;;  %v1909_v35 = vpop.f32.mrb[35].mxu0 }
 0x131   : > { %v2734_v42 = vadd.f32 %v2545_v29, %v791_v14  ;;  %v792_v48 = vmul.f32 %v2536_v28, %v724_v34  ;;  %v1975_v49 = vpop.f32.mrb[35].mxu1 }
 0x132   : > { %v2738_v60 = vadd.f32 %v2545_v29, %v551_v24 }
 0x133   : > { %v2743_v13 = vadd.f32 %v2545_v29, %v792_v48 }
 0x135   : > { %v482_v20 = vpop.f32.mrb[36].mxu0 }
 0x136   : > { %v552_v21 = vmul.f32 %v2536_v28, %v482_v20  ;;  %v729_v14 = vpop.f32.mrb[36].mxu1  ;;  %v1912_v35 = vpop.f32.mrb[37].mxu0 }
 0x137   : > { %v793_v34 = vmul.f32 %v2536_v28, %v729_v14  ;;  %v1978_v49 = vpop.f32.mrb[37].mxu1  ;;  %v485_v56 = vpop.f32.mrb[38].mxu0 }
 0x138   : > { %v2750_v24 = vadd.f32 %v2545_v29, %v552_v21  ;;  %v553_v12 = vmul.f32 %v2536_v28, %v485_v56  ;;  %v732_v52 = vpop.f32.mrb[38].mxu1  ;;  %v1913_v48 = vpop.f32.mrb[39].mxu0 }
 0x139   : > { %v2754_v11 = vadd.f32 %v2545_v29, %v793_v34  ;;  %v794_v61 = vmul.f32 %v2536_v28, %v732_v52  ;;  %v1979_v8 = vpop.f32.mrb[39].mxu1 }
 0x13a   : > { %v2758_v20 = vadd.f32 %v2545_v29, %v553_v12 }
 0x13b   : > { %v2763_v35 = vadd.f32 %v2545_v29, %v794_v61 }
 0x13d   : > { %v490_v21 = vpop.f32.mrb[40].mxu0 }
 0x13e   : > { %v554_v49 = vmul.f32 %v2536_v28, %v490_v21  ;;  %v737_v34 = vpop.f32.mrb[40].mxu1  ;;  %v1916_v48 = vpop.f32.mrb[41].mxu0 }
 0x13f   : > { %v795_v52 = vmul.f32 %v2536_v28, %v737_v34  ;;  %v1982_v8 = vpop.f32.mrb[41].mxu1  ;;  %v493_v33 = vpop.f32.mrb[42].mxu0 }
 0x140   : > { %v2770_v12 = vadd.f32 %v2545_v29, %v554_v49  ;;  %v555_v14 = vmul.f32 %v2536_v28, %v493_v33  ;;  %v740_v31 = vpop.f32.mrb[42].mxu1  ;;  %v1917_v61 = vpop.f32.mrb[43].mxu0 }
 0x141   : > { %v2774_v6 = vadd.f32 %v2545_v29, %v795_v52  ;;  %v796_v56 = vmul.f32 %v2536_v28, %v740_v31  ;;  %v1983_v4 = vpop.f32.mrb[43].mxu1 }
 0x142   : > { %v2778_v21 = vadd.f32 %v2545_v29, %v555_v14 }
 0x143   : > { %v2783_v48 = vadd.f32 %v2545_v29, %v796_v56 }
 0x145   : > { %v498_v49 = vpop.f32.mrb[44].mxu0 }
 0x146   : > { %v556_v8 = vmul.f32 %v2536_v28, %v498_v49  ;;  %v745_v52 = vpop.f32.mrb[44].mxu1  ;;  %v1920_v61 = vpop.f32.mrb[45].mxu0 }
 0x147   : > { %v797_v31 = vmul.f32 %v2536_v28, %v745_v52  ;;  %v1986_v4 = vpop.f32.mrb[45].mxu1  ;;  %v501_v40 = vpop.f32.mrb[46].mxu0 }
 0x148   : > { %v2790_v14 = vadd.f32 %v2545_v29, %v556_v8  ;;  %v557_v34 = vmul.f32 %v2536_v28, %v501_v40  ;;  %v748_v38 = vpop.f32.mrb[46].mxu1  ;;  %v1921_v56 = vpop.f32.mrb[47].mxu0 }
 0x149   : > { %v2794_v19 = vadd.f32 %v2545_v29, %v797_v31  ;;  %v798_v33 = vmul.f32 %v2536_v28, %v748_v38  ;;  %v1987_v17 = vpop.f32.mrb[47].mxu1 }
 0x14a   : > { %v2798_v49 = vadd.f32 %v2545_v29, %v557_v34 }
 0x14b   : > { %3156 = vst [vmem:[#allocation2_spill] sm:$0xff] %v2794_v19  ;;  %v2803_v61 = vadd.f32 %v2545_v29, %v798_v33 }
 0x14c   : > { %3157 = vst [vmem:[#allocation3_spill] sm:$0xff] %v2798_v49 }
 0x14d   : > { %3158 = vst [vmem:[#allocation4_spill] sm:$0xff] %v2803_v61  ;;  %v506_v8 = vpop.f32.mrb[48].mxu0 }
 0x14e   : > { %v558_v4 = vmul.f32 %v2536_v28, %v506_v8  ;;  %v753_v31 = vpop.f32.mrb[48].mxu1  ;;  %v1924_v56 = vpop.f32.mrb[49].mxu0 }
 0x14f   : > { %v799_v38 = vmul.f32 %v2536_v28, %v753_v31  ;;  %v1990_v17 = vpop.f32.mrb[49].mxu1  ;;  %v509_v2 = vpop.f32.mrb[50].mxu0 }
 0x150   : > { %v2810_v34 = vadd.f32 %v2545_v29, %v558_v4  ;;  %v559_v52 = vmul.f32 %v2536_v28, %v509_v2  ;;  %v756_v63 = vpop.f32.mrb[50].mxu1  ;;  %v1925_v33 = vpop.f32.mrb[51].mxu0 }
 0x151   : > { %v2814_v47 = vadd.f32 %v2545_v29, %v799_v38  ;;  %v800_v40 = vmul.f32 %v2536_v28, %v756_v63  ;;  %v1991_v45 = vpop.f32.mrb[51].mxu1 }
 0x152   : > { %3159 = vst [vmem:[#allocation5_spill] sm:$0xff] %v2810_v34  ;;  %v2818_v8 = vadd.f32 %v2545_v29, %v559_v52 }
 0x153   : > { %3160 = vst [vmem:[#allocation6_spill] sm:$0xff] %v2814_v47  ;;  %v2823_v56 = vadd.f32 %v2545_v29, %v800_v40 }
 0x154   : > { %3161 = vst [vmem:[#allocation7_spill] sm:$0xff] %v2818_v8 }
 0x155   : > { %3162 = vst [vmem:[#allocation8_spill] sm:$0xff] %v2823_v56  ;;  %v514_v4 = vpop.f32.mrb[52].mxu0 }
 0x156   : > { %v560_v17 = vmul.f32 %v2536_v28, %v514_v4  ;;  %v761_v38 = vpop.f32.mrb[52].mxu1  ;;  %v1928_v33 = vpop.f32.mrb[53].mxu0 }
 0x157   : > { %v801_v63 = vmul.f32 %v2536_v28, %v761_v38  ;;  %v1994_v45 = vpop.f32.mrb[53].mxu1  ;;  %v517_v61 = vpop.f32.mrb[54].mxu0 }
 0x158   : > { %v2830_v52 = vadd.f32 %v2545_v29, %v560_v17  ;;  %v561_v31 = vmul.f32 %v2536_v28, %v517_v61  ;;  %v764_v47 = vpop.f32.mrb[54].mxu1  ;;  %v1929_v40 = vpop.f32.mrb[55].mxu0 }
 0x159   : > { %v2834_v34 = vadd.f32 %v2545_v29, %v801_v63  ;;  %v802_v2 = vmul.f32 %v2536_v28, %v764_v47  ;;  %v1995_v56 = vpop.f32.mrb[55].mxu1 }
 0x15a   : > { %3163 = vst [vmem:[#allocation9_spill] sm:$0xff] %v2830_v52  ;;  %v2838_v4 = vadd.f32 %v2545_v29, %v561_v31 }
 0x15b   : > { %3164 = vst [vmem:[#allocation10_spill] sm:$0xff] %v2834_v34  ;;  %v2843_v33 = vadd.f32 %v2545_v29, %v802_v2 }
 0x15c   : > { %3165 = vst [vmem:[#allocation11_spill] sm:$0xff] %v2838_v4 }
 0x15d   : > { %3166 = vst [vmem:[#allocation12_spill] sm:$0xff] %v2843_v33  ;;  %v522_v17 = vpop.f32.mrb[56].mxu0 }
 0x15e   : > { %v562_v45 = vmul.f32 %v2536_v28, %v522_v17  ;;  %v769_v63 = vpop.f32.mrb[56].mxu1  ;;  %v1932_v40 = vpop.f32.mrb[57].mxu0 }
 0x15f   : > { %v803_v47 = vmul.f32 %v2536_v28, %v769_v63  ;;  %v1998_v56 = vpop.f32.mrb[57].mxu1  ;;  %v525_v8 = vpop.f32.mrb[58].mxu0 }
 0x160   : > { %v2850_v31 = vadd.f32 %v2545_v29, %v562_v45  ;;  %v772_v49 = vpop.f32.mrb[58].mxu1  ;;  %v1933_v38 = vpop.f32.mrb[59].mxu0 }
 0x161   : > { %v2853_v2 = vadd.f32 %v2545_v29, %v803_v47  ;;  %v1999_v34 = vpop.f32.mrb[59].mxu1 }
 0x162   : > { %3167 = vst [vmem:[#allocation13_spill] sm:$0xff] %v2850_v31 }
 0x163   : > { %3168 = vst [vmem:[#allocation14_spill] sm:$0xff] %v2853_v2 }
 0x165   : > { %v921_v33 = vpop.f32.mrb[60].mxu0 }
 0x166   : > { %v1039_v17 = vmul.f32 %v2536_v28, %v921_v33  ;;  %v1156_v40 = vpop.f32.mrb[60].mxu1  ;;  %v2008_v4 = vpop.f32.mrb[61].mxu0 }
 0x167   : > { %v1274_v63 = vmul.f32 %v2536_v28, %v1156_v40  ;;  %v2074_v8 = vpop.f32.mrb[61].mxu1  ;;  %v924_v56 = vpop.f32.mrb[62].mxu0  ;;  %v3169_v40 = vmax.f32 %v2550_v37, %v2554_v41 }
 0x168   : > { %v1068_v45 = vadd.f32 %v2545_v29, %v1039_v17  ;;  %v1040_v49 = vmul.f32 %v2536_v28, %v924_v56  ;;  %v1159_v38 = vpop.f32.mrb[62].mxu1  ;;  %v2009_v47 = vpop.f32.mrb[63].mxu0 }
 0x169   : > { %v1303_v34 = vadd.f32 %v2545_v29, %v1274_v63  ;;  %v1275_v52 = vmul.f32 %v2536_v28, %v1159_v38  ;;  %v2075_v61 = vpop.f32.mrb[63].mxu1  ;;  %v3170_v38 = vmax.f32 %v2558_v44, %v2565_v46 }
 0x16a   : > { %v1069_v33 = vadd.f32 %v2545_v29, %v1040_v49 }
 0x16b   : > { %v1332_v2 = vmax.f32 %v1068_v45, %v1303_v34  ;;  %v1304_v4 = vadd.f32 %v2545_v29, %v1275_v52 }
 0x16d   : > { %v1361_v8 = vmax.f32 %v3169_v40, %v1332_v2  ;;  %v1333_v17 = vmax.f32 %v1069_v33, %v1304_v4  ;;  %v929_v31 = vpop.f32.mrb[64].mxu0 }
 0x16e   : > { %v1041_v56 = vmul.f32 %v2536_v28, %v929_v31  ;;  %v1164_v47 = vpop.f32.mrb[64].mxu1  ;;  %v2012_v19 = vpop.f32.mrb[65].mxu0 }
 0x16f   : > { %v1390_v63 = vmax.f32 %v1361_v8, 0.0  ;;  %v1362_v61 = vmax.f32 %v3170_v38, %v1333_v17  ;;  %v1276_v49 = vmul.f32 %v2536_v28, %v1164_v47  ;;  %v2078_v45 = vpop.f32.mrb[65].mxu1  ;;  %v932_v34 = vpop.f32.mrb[66].mxu0 }
 0x170   : > { %v1070_v37 = vadd.f32 %v2545_v29, %v1041_v56  ;;  %v1042_v41 = vmul.f32 %v2536_v28, %v932_v34  ;;  %v1167_v19 = vpop.f32.mrb[66].mxu1  ;;  %v2013_v44 = vpop.f32.mrb[67].mxu0  ;;  %v3171_v56 = vmax.f32 %v2578_v55, %v2582_v59 }
 0x171   : > { %v1767_v46 = vpack.c.bf16 %v1390_v63, %v1390_v63  ;;  %v1391_v52 = vmax.f32 %v1362_v61, 0.0  ;;  %v1305_v31 = vadd.f32 %v2545_v29, %v1276_v49  ;;  %v1277_v2 = vmul.f32 %v2536_v28, %v1167_v19  ;;  %v2079_v33 = vpop.f32.mrb[67].mxu1 }
 0x172   : > { %v1071_v4 = vadd.f32 %v2545_v29, %v1042_v41  ;;  %v3172_v41 = vmax.f32 %v2586_v62, %v2593_v0 }
 0x173   : > { %1537 = vst.msk [vmem:[%s2878_s28] sm:$0xf] %vm1536_vm2, %v1767_v46  ;;  %v1768_v40 = vpack.c.bf16 %v1391_v52, %v1391_v52  ;;  %v1334_v8 = vmax.f32 %v1070_v37, %v1305_v31  ;;  %v1306_v17 = vadd.f32 %v2545_v29, %v1277_v2 }
 0x175   : > { %1538 = vst.msk [vmem:[%s2878_s28 + $0x4] sm:$0xf] %vm1536_vm2, %v1768_v40  ;;  %v1363_v47 = vmax.f32 %v3171_v56, %v1334_v8  ;;  %v1335_v63 = vmax.f32 %v1071_v4, %v1306_v17  ;;  %v937_v38 = vpop.f32.mrb[68].mxu0 }
 0x176   : > { %v1043_v61 = vmul.f32 %v2536_v28, %v937_v38  ;;  %v1172_v49 = vpop.f32.mrb[68].mxu1  ;;  %v2016_v45 = vpop.f32.mrb[69].mxu0 }
 0x177   : > { %v1392_v34 = vmax.f32 %v1363_v47, 0.0  ;;  %v1364_v37 = vmax.f32 %v3172_v41, %v1335_v63  ;;  %v1278_v19 = vmul.f32 %v2536_v28, %v1172_v49  ;;  %v2082_v44 = vpop.f32.mrb[69].mxu1  ;;  %v940_v46 = vpop.f32.mrb[70].mxu0  ;;  %v3173_v47 = vmax.f32 %v2606_v10, %v2610_v1 }
 0x178   : > { %v1072_v55 = vadd.f32 %v2545_v29, %v1043_v61  ;;  %v1044_v59 = vmul.f32 %v2536_v28, %v940_v46  ;;  %v1175_v52 = vpop.f32.mrb[70].mxu1  ;;  %v2017_v31 = vpop.f32.mrb[71].mxu0 }
 0x179   : > { %v1769_v2 = vpack.c.bf16 %v1392_v34, %v1392_v34  ;;  %v1393_v33 = vmax.f32 %v1364_v37, 0.0  ;;  %v1307_v4 = vadd.f32 %v2545_v29, %v1278_v19  ;;  %v1279_v40 = vmul.f32 %v2536_v28, %v1175_v52  ;;  %v2083_v8 = vpop.f32.mrb[71].mxu1 }
 0x17a   : > { %v1073_v62 = vadd.f32 %v2545_v29, %v1044_v59  ;;  %v3174_v37 = vmax.f32 %v2614_v16, %v2621_v18 }
 0x17b   : > { %1539 = vst.msk [vmem:[%s2878_s28 + $0x8] sm:$0xf] %vm1536_vm2, %v1769_v2  ;;  %v1770_v0 = vpack.c.bf16 %v1393_v33, %v1393_v33  ;;  %v1336_v17 = vmax.f32 %v1072_v55, %v1307_v4  ;;  %v1308_v56 = vadd.f32 %v2545_v29, %v1279_v40 }
 0x17d   : > { %1540 = vst.msk [vmem:[%s2878_s28 + $0xc] sm:$0xf] %vm1536_vm2, %v1770_v0  ;;  %v1365_v63 = vmax.f32 %v3173_v47, %v1336_v17  ;;  %v1337_v38 = vmax.f32 %v1073_v62, %v1308_v56  ;;  %v945_v61 = vpop.f32.mrb[72].mxu0  ;;  %v3175_v0 = vmax.f32 %v2630_v30, %v2634_v27 }
 0x17e   : > { %v1045_v49 = vmul.f32 %v2536_v28, %v945_v61  ;;  %v1180_v45 = vpop.f32.mrb[72].mxu1  ;;  %v2020_v34 = vpop.f32.mrb[73].mxu0 }
 0x17f   : > { %v1394_v41 = vmax.f32 %v1365_v63, 0.0  ;;  %v1366_v19 = vmax.f32 %v3174_v37, %v1337_v38  ;;  %v1280_v44 = vmul.f32 %v2536_v28, %v1180_v45  ;;  %v2086_v46 = vpop.f32.mrb[73].mxu1  ;;  %v948_v55 = vpop.f32.mrb[74].mxu0  ;;  %v3176_v45 = vmax.f32 %v2638_v36, %v2643_v39 }
 0x180   : > { %v1074_v10 = vadd.f32 %v2545_v29, %v1045_v49  ;;  %v1046_v1 = vmul.f32 %v2536_v28, %v948_v55  ;;  %v1183_v59 = vpop.f32.mrb[74].mxu1  ;;  %v2021_v52 = vpop.f32.mrb[75].mxu0 }
 0x181   : > { %v1771_v31 = vpack.c.bf16 %v1394_v41, %v1394_v41  ;;  %v1395_v2 = vmax.f32 %v1366_v19, 0.0  ;;  %v1309_v33 = vadd.f32 %v2545_v29, %v1280_v44  ;;  %v1281_v4 = vmul.f32 %v2536_v28, %v1183_v59  ;;  %v2087_v40 = vpop.f32.mrb[75].mxu1 }
 0x182   : > { %v1075_v16 = vadd.f32 %v2545_v29, %v1046_v1 }
 0x183   : > { %1541 = vst.msk [vmem:[%s2878_s28 + $0x10] sm:$0xf] %vm1536_vm2, %v1771_v31  ;;  %v1772_v18 = vpack.c.bf16 %v1395_v2, %v1395_v2  ;;  %v1338_v8 = vmax.f32 %v1074_v10, %v1309_v33  ;;  %v1310_v62 = vadd.f32 %v2545_v29, %v1281_v4  ;;  %v3177_v33 = vmax.f32 %v2650_v53, %v2654_v58 }
 0x185   : > { %1542 = vst.msk [vmem:[%s2878_s28 + $0x14] sm:$0xf] %vm1536_vm2, %v1772_v18  ;;  %v1367_v17 = vmax.f32 %v3175_v0, %v1338_v8  ;;  %v1339_v56 = vmax.f32 %v1075_v16, %v1310_v62  ;;  %v953_v47 = vpop.f32.mrb[76].mxu0 }
 0x186   : > { %v1047_v63 = vmul.f32 %v2536_v28, %v953_v47  ;;  %v1188_v38 = vpop.f32.mrb[76].mxu1  ;;  %v2024_v61 = vpop.f32.mrb[77].mxu0 }
 0x187   : > { %v1396_v49 = vmax.f32 %v1367_v17, 0.0  ;;  %v1368_v34 = vmax.f32 %v3176_v45, %v1339_v56  ;;  %v1282_v41 = vmul.f32 %v2536_v28, %v1188_v38  ;;  %v2090_v37 = vpop.f32.mrb[77].mxu1  ;;  %v956_v19 = vpop.f32.mrb[78].mxu0  ;;  %v3178_v17 = vmax.f32 %v2658_v3, %v2663_v5 }
 0x188   : > { %v1076_v30 = vadd.f32 %v2545_v29, %v1047_v63  ;;  %v1048_v27 = vmul.f32 %v2536_v28, %v956_v19  ;;  %v1191_v44 = vpop.f32.mrb[78].mxu1  ;;  %v2025_v46 = vpop.f32.mrb[79].mxu0 }
 0x189   : > { %v1773_v55 = vpack.c.bf16 %v1396_v49, %v1396_v49  ;;  %v1397_v10 = vmax.f32 %v1368_v34, 0.0  ;;  %v1311_v1 = vadd.f32 %v2545_v29, %v1282_v41  ;;  %v1283_v59 = vmul.f32 %v2536_v28, %v1191_v44  ;;  %v2091_v52 = vpop.f32.mrb[79].mxu1 }
 0x18a   : > { %v1077_v36 = vadd.f32 %v2545_v29, %v1048_v27  ;;  %v3179_v44 = vmax.f32 %v2670_v15, %v2674_v23 }
 0x18b   : > { %1543 = vst.msk [vmem:[%s2878_s28 + $0x18] sm:$0xf] %vm1536_vm2, %v1773_v55  ;;  %v1774_v39 = vpack.c.bf16 %v1397_v10, %v1397_v10  ;;  %v1340_v31 = vmax.f32 %v1076_v30, %v1311_v1  ;;  %v1312_v2 = vadd.f32 %v2545_v29, %v1283_v59 }
 0x18d   : > { %1544 = vst.msk [vmem:[%s2878_s28 + $0x1c] sm:$0xf] %vm1536_vm2, %v1774_v39  ;;  %v1369_v4 = vmax.f32 %v3177_v33, %v1340_v31  ;;  %v1341_v40 = vmax.f32 %v1077_v36, %v1312_v2  ;;  %v961_v16 = vpop.f32.mrb[80].mxu0  ;;  %v3180_v39 = vmax.f32 %v2678_v26, %v2683_v32 }
 0x18e   : > { %v1049_v18 = vmul.f32 %v2536_v28, %v961_v16  ;;  %v1196_v8 = vpop.f32.mrb[80].mxu1  ;;  %v2028_v62 = vpop.f32.mrb[81].mxu0 }
 0x18f   : > { %v1398_v0 = vmax.f32 %v1369_v4, 0.0  ;;  %v1370_v56 = vmax.f32 %v3178_v17, %v1341_v40  ;;  %v1284_v47 = vmul.f32 %v2536_v28, %v1196_v8  ;;  %v2094_v63 = vpop.f32.mrb[81].mxu1  ;;  %v964_v38 = vpop.f32.mrb[82].mxu0 }
 0x190   : > { %v1078_v53 = vadd.f32 %v2545_v29, %v1049_v18  ;;  %v1050_v58 = vmul.f32 %v2536_v28, %v964_v38  ;;  %v1199_v61 = vpop.f32.mrb[82].mxu1  ;;  %v2029_v49 = vpop.f32.mrb[83].mxu0  ;;  %v3181_v63 = vmax.f32 %v2690_v51, %v2694_v57 }
 0x191   : > { %v1775_v45 = vpack.c.bf16 %v1398_v0, %v1398_v0  ;;  %v1399_v34 = vmax.f32 %v1370_v56, 0.0  ;;  %v1313_v41 = vadd.f32 %v2545_v29, %v1284_v47  ;;  %v1285_v37 = vmul.f32 %v2536_v28, %v1199_v61  ;;  %v2095_v19 = vpop.f32.mrb[83].mxu1 }
 0x192   : > { %v1079_v3 = vadd.f32 %v2545_v29, %v1050_v58 }
 0x193   : > { %1545 = vst.msk [vmem:[%s2878_s28 + $0x20] sm:$0xf] %vm1536_vm2, %v1775_v45  ;;  %v1776_v5 = vpack.c.bf16 %v1399_v34, %v1399_v34  ;;  %v1342_v30 = vmax.f32 %v1078_v53, %v1313_v41  ;;  %v1314_v27 = vadd.f32 %v2545_v29, %v1285_v37  ;;  %v3182_v41 = vmax.f32 %v2698_v7, %v2703_v9 }
 0x195   : > { %1546 = vst.msk [vmem:[%s2878_s28 + $0x24] sm:$0xf] %vm1536_vm2, %v1776_v5  ;;  %v1371_v46 = vmax.f32 %v3179_v44, %v1342_v30  ;;  %v1343_v55 = vmax.f32 %v1079_v3, %v1314_v27  ;;  %v969_v10 = vpop.f32.mrb[84].mxu0 }
 0x196   : > { %v1051_v1 = vmul.f32 %v2536_v28, %v969_v10  ;;  %v1204_v59 = vpop.f32.mrb[84].mxu1  ;;  %v2032_v52 = vpop.f32.mrb[85].mxu0 }
 0x197   : > { %v1400_v36 = vmax.f32 %v1371_v46, 0.0  ;;  %v1372_v31 = vmax.f32 %v3180_v39, %v1343_v55  ;;  %v1286_v2 = vmul.f32 %v2536_v28, %v1204_v59  ;;  %v2098_v33 = vpop.f32.mrb[85].mxu1  ;;  %v972_v4 = vpop.f32.mrb[86].mxu0 }
 0x198   : > { %v1080_v15 = vadd.f32 %v2545_v29, %v1051_v1  ;;  %v1052_v23 = vmul.f32 %v2536_v28, %v972_v4  ;;  %v1207_v40 = vpop.f32.mrb[86].mxu1  ;;  %v2033_v16 = vpop.f32.mrb[87].mxu0 }
 0x199   : > { %v1777_v18 = vpack.c.bf16 %v1400_v36, %v1400_v36  ;;  %v1401_v8 = vmax.f32 %v1372_v31, 0.0  ;;  %v1315_v62 = vadd.f32 %v2545_v29, %v1286_v2  ;;  %v1287_v0 = vmul.f32 %v2536_v28, %v1207_v40  ;;  %v2099_v17 = vpop.f32.mrb[87].mxu1 }
 0x19a   : > { %v1081_v26 = vadd.f32 %v2545_v29, %v1052_v23  ;;  %v3183_v36 = vmax.f32 %v2710_v25, %v2714_v43  ;;  %v3184_v40 = vmax.f32 %v2718_v50, %v2723_v54 }
 0x19b   : > { %1547 = vst.msk [vmem:[%s2878_s28 + $0x28] sm:$0xf] %vm1536_vm2, %v1777_v18  ;;  %v1778_v32 = vpack.c.bf16 %v1401_v8, %v1401_v8  ;;  %v1344_v56 = vmax.f32 %v1080_v15, %v1315_v62  ;;  %v1316_v47 = vadd.f32 %v2545_v29, %v1287_v0 }
 0x19d   : > { %1548 = vst.msk [vmem:[%s2878_s28 + $0x2c] sm:$0xf] %vm1536_vm2, %v1778_v32  ;;  %v1373_v38 = vmax.f32 %v3181_v63, %v1344_v56  ;;  %v1345_v53 = vmax.f32 %v1081_v26, %v1316_v47  ;;  %v977_v58 = vpop.f32.mrb[88].mxu0 }
 0x19e   : > { %v1053_v61 = vmul.f32 %v2536_v28, %v977_v58  ;;  %v1212_v49 = vpop.f32.mrb[88].mxu1  ;;  %v2036_v45 = vpop.f32.mrb[89].mxu0  ;;  %v3185_v58 = vmax.f32 %v2730_v22, %v2734_v42 }
 0x19f   : > { %v1402_v34 = vmax.f32 %v1373_v38, 0.0  ;;  %v1374_v37 = vmax.f32 %v3182_v41, %v1345_v53  ;;  %v1288_v19 = vmul.f32 %v2536_v28, %v1212_v49  ;;  %v2102_v3 = vpop.f32.mrb[89].mxu1  ;;  %v980_v5 = vpop.f32.mrb[90].mxu0 }
 0x1a0   : > { %v1082_v51 = vadd.f32 %v2545_v29, %v1053_v61  ;;  %v1054_v57 = vmul.f32 %v2536_v28, %v980_v5  ;;  %v1215_v30 = vpop.f32.mrb[90].mxu1  ;;  %v2037_v27 = vpop.f32.mrb[91].mxu0  ;;  %v3186_v3 = vmax.f32 %v2738_v60, %v2743_v13 }
 0x1a1   : > { %v1779_v44 = vpack.c.bf16 %v1402_v34, %v1402_v34  ;;  %v1403_v46 = vmax.f32 %v1374_v37, 0.0  ;;  %v1317_v55 = vadd.f32 %v2545_v29, %v1288_v19  ;;  %v1289_v10 = vmul.f32 %v2536_v28, %v1215_v30  ;;  %v2103_v1 = vpop.f32.mrb[91].mxu1 }
 0x1a2   : > { %v1083_v7 = vadd.f32 %v2545_v29, %v1054_v57 }
 0x1a3   : > { %1549 = vst.msk [vmem:[%s2878_s28 + $0x30] sm:$0xf] %vm1536_vm2, %v1779_v44  ;;  %v1780_v9 = vpack.c.bf16 %v1403_v46, %v1403_v46  ;;  %v1346_v59 = vmax.f32 %v1082_v51, %v1317_v55  ;;  %v1318_v52 = vadd.f32 %v2545_v29, %v1289_v10 }
 0x1a5   : > { %1550 = vst.msk [vmem:[%s2878_s28 + $0x34] sm:$0xf] %vm1536_vm2, %v1780_v9  ;;  %v1375_v39 = vmax.f32 %v3183_v36, %v1346_v59  ;;  %v1347_v31 = vmax.f32 %v1083_v7, %v1318_v52  ;;  %v985_v2 = vpop.f32.mrb[92].mxu0  ;;  %v3187_v52 = vmax.f32 %v2750_v24, %v2754_v11 }
 0x1a6   : > { %v1055_v33 = vmul.f32 %v2536_v28, %v985_v2  ;;  %v1220_v4 = vpop.f32.mrb[92].mxu1  ;;  %v2040_v15 = vpop.f32.mrb[93].mxu0 }
 0x1a7   : > { %v1404_v23 = vmax.f32 %v1375_v39, 0.0  ;;  %v1376_v16 = vmax.f32 %v3184_v40, %v1347_v31  ;;  %v1290_v18 = vmul.f32 %v2536_v28, %v1220_v4  ;;  %v2106_v8 = vpop.f32.mrb[93].mxu1  ;;  %v988_v62 = vpop.f32.mrb[94].mxu0 }
 0x1a8   : > { %v1084_v25 = vadd.f32 %v2545_v29, %v1055_v33  ;;  %v1056_v43 = vmul.f32 %v2536_v28, %v988_v62  ;;  %v1223_v0 = vpop.f32.mrb[94].mxu1  ;;  %v2041_v17 = vpop.f32.mrb[95].mxu0 }
 0x1a9   : > { %v1781_v26 = vpack.c.bf16 %v1404_v23, %v1404_v23  ;;  %v1405_v32 = vmax.f32 %v1376_v16, 0.0  ;;  %v1319_v56 = vadd.f32 %v2545_v29, %v1290_v18  ;;  %v1291_v47 = vmul.f32 %v2536_v28, %v1223_v0  ;;  %v2107_v63 = vpop.f32.mrb[95].mxu1 }
 0x1aa   : > { %v1085_v50 = vadd.f32 %v2545_v29, %v1056_v43  ;;  %v3188_v23 = vmax.f32 %v2758_v20, %v2763_v35  ;;  %v3189_v63 = vmax.f32 %v2770_v12, %v2774_v6 }
 0x1ab   : > { %1551 = vst.msk [vmem:[%s2878_s28 + $0x38] sm:$0xf] %vm1536_vm2, %v1781_v26  ;;  %v1782_v54 = vpack.c.bf16 %v1405_v32, %v1405_v32  ;;  %v1348_v38 = vmax.f32 %v1084_v25, %v1319_v56  ;;  %v1320_v53 = vadd.f32 %v2545_v29, %v1291_v47  ;;  %v3026_v29 = vld [vmem:[%s3140_s2] ss:$0 sm:$0xff] }
 0x1ad   : > { %1552 = vst.msk [vmem:[%s2878_s28 + $0x3c] sm:$0xf] %vm1536_vm2, %v1782_v54  ;;  %v1377_v61 = vmax.f32 %v3185_v58, %v1348_v38  ;;  %v1349_v49 = vmax.f32 %v1085_v50, %v1320_v53  ;;  %v993_v45 = vpop.f32.mrb[96].mxu0 }
 0x1ae   : > { %v1057_v34 = vmul.f32 %v2536_v28, %v993_v45  ;;  %v1228_v41 = vpop.f32.mrb[96].mxu1  ;;  %v2044_v37 = vpop.f32.mrb[97].mxu0  ;;  %v3032_v28 = vld [vmem:[%s3141_s3] ss:$0 sm:$0xff]  ;;  %v3190_v45 = vmax.f32 %v2778_v21, %v2783_v48 }
 0x1af   : > { %v1406_v19 = vmax.f32 %v1377_v61, 0.0  ;;  %v1378_v5 = vmax.f32 %v3186_v3, %v1349_v49  ;;  %v1292_v22 = vmul.f32 %v3026_v29, %v1228_v41  ;;  %v2110_v42 = vpop.f32.mrb[97].mxu1  ;;  %v996_v51 = vpop.f32.mrb[98].mxu0 }
 0x1b0   : > { %v1086_v57 = vadd.f32 %v3032_v28, %v1057_v34  ;;  %v1058_v60 = vmul.f32 %v3026_v29, %v996_v51  ;;  %v1231_v13 = vpop.f32.mrb[98].mxu1  ;;  %v2045_v30 = vpop.f32.mrb[99].mxu0 }
 0x1b1   : > { %v1783_v27 = vpack.c.bf16 %v1406_v19, %v1406_v19  ;;  %v1407_v44 = vmax.f32 %v1378_v5, 0.0  ;;  %v1321_v46 = vadd.f32 %v3032_v28, %v1292_v22  ;;  %v1293_v55 = vmul.f32 %v3026_v29, %v1231_v13  ;;  %v2111_v10 = vpop.f32.mrb[99].mxu1 }
 0x1b2   : > { %v1087_v1 = vadd.f32 %v3032_v28, %v1058_v60 }
 0x1b3   : > { %1553 = vst.msk [vmem:[%s2878_s28 + $0x40] sm:$0xf] %vm1536_vm2, %v1783_v27  ;;  %v1784_v7 = vpack.c.bf16 %v1407_v44, %v1407_v44  ;;  %v1350_v9 = vmax.f32 %v1086_v57, %v1321_v46  ;;  %v1322_v59 = vadd.f32 %v3032_v28, %v1293_v55  ;;  %v3191_v27 = vld [vmem:[#allocation2_spill] sm:$0xff] }
 0x1b4   : > { %v3192_v44 = vmax.f32 %v2790_v14, %v3191_v27 }
 0x1b5   : > { %1554 = vst.msk [vmem:[%s2878_s28 + $0x44] sm:$0xf] %vm1536_vm2, %v1784_v7  ;;  %v1379_v36 = vmax.f32 %v3187_v52, %v1350_v9  ;;  %v1351_v39 = vmax.f32 %v1087_v1, %v1322_v59  ;;  %v1001_v31 = vpop.f32.mrb[100].mxu0  ;;  %v3193_v52 = vld [vmem:[#allocation3_spill] sm:$0xff] }
 0x1b6   : > { %v1059_v2 = vmul.f32 %v3026_v29, %v1001_v31  ;;  %v1236_v33 = vpop.f32.mrb[100].mxu1  ;;  %v2048_v4 = vpop.f32.mrb[101].mxu0 }
 0x1b7   : > { %v1408_v15 = vmax.f32 %v1379_v36, 0.0  ;;  %v1380_v40 = vmax.f32 %v3188_v23, %v1351_v39  ;;  %v1294_v16 = vmul.f32 %v3026_v29, %v1236_v33  ;;  %v2114_v18 = vpop.f32.mrb[101].mxu1  ;;  %v1004_v8 = vpop.f32.mrb[102].mxu0  ;;  %v3194_v36 = vld [vmem:[#allocation4_spill] sm:$0xff] }
 0x1b8   : > { %v1088_v11 = vadd.f32 %v3032_v28, %v1059_v2  ;;  %v1060_v24 = vmul.f32 %v3026_v29, %v1004_v8  ;;  %v1239_v62 = vpop.f32.mrb[102].mxu1  ;;  %v2049_v25 = vpop.f32.mrb[103].mxu0  ;;  %v3195_v39 = vmax.f32 %v3193_v52, %v3194_v36 }
 0x1b9   : > { %v1785_v43 = vpack.c.bf16 %v1408_v15, %v1408_v15  ;;  %v1409_v0 = vmax.f32 %v1380_v40, 0.0  ;;  %v1323_v17 = vadd.f32 %v3032_v28, %v1294_v16  ;;  %v1295_v26 = vmul.f32 %v3026_v29, %v1239_v62  ;;  %v2115_v32 = vpop.f32.mrb[103].mxu1 }
 0x1ba   : > { %v1089_v20 = vadd.f32 %v3032_v28, %v1060_v24 }
 0x1bb   : > { %1555 = vst.msk [vmem:[%s2878_s28 + $0x48] sm:$0xf] %vm1536_vm2, %v1785_v43  ;;  %v1786_v35 = vpack.c.bf16 %v1409_v0, %v1409_v0  ;;  %v1352_v56 = vmax.f32 %v1088_v11, %v1323_v17  ;;  %v1324_v47 = vadd.f32 %v3032_v28, %v1295_v26  ;;  %v3196_v17 = vld [vmem:[#allocation5_spill] sm:$0xff]  ;;  %v3197_v26 = vld [vmem:[#allocation6_spill] sm:$0xff] }
 0x1bc   : > { %v3198_v32 = vmax.f32 %v3196_v17, %v3197_v26 }
 0x1bd   : > { %1556 = vst.msk [vmem:[%s2878_s28 + $0x4c] sm:$0xf] %vm1536_vm2, %v1786_v35  ;;  %v1381_v50 = vmax.f32 %v3189_v63, %v1352_v56  ;;  %v1353_v54 = vmax.f32 %v1089_v20, %v1324_v47  ;;  %v1009_v38 = vpop.f32.mrb[104].mxu0 }
 0x1be   : > { %v1061_v53 = vmul.f32 %v3026_v29, %v1009_v38  ;;  %v1244_v58 = vpop.f32.mrb[104].mxu1  ;;  %v2052_v61 = vpop.f32.mrb[105].mxu0  ;;  %v3199_v38 = vld [vmem:[#allocation7_spill] sm:$0xff] }
 0x1bf   : > { %v1410_v49 = vmax.f32 %v1381_v50, 0.0  ;;  %v1382_v34 = vmax.f32 %v3190_v45, %v1353_v54  ;;  %v1296_v41 = vmul.f32 %v3026_v29, %v1244_v58  ;;  %v2118_v37 = vpop.f32.mrb[105].mxu1  ;;  %v1012_v19 = vpop.f32.mrb[106].mxu0 }
 0x1c0   : > { %v1090_v6 = vadd.f32 %v3032_v28, %v1061_v53  ;;  %v1062_v12 = vmul.f32 %v3026_v29, %v1012_v19  ;;  %v1247_v3 = vpop.f32.mrb[106].mxu1  ;;  %v2053_v5 = vpop.f32.mrb[107].mxu0  ;;  %v3200_v53 = vld [vmem:[#allocation8_spill] sm:$0xff] }
 0x1c1   : > { %v1787_v22 = vpack.c.bf16 %v1410_v49, %v1410_v49  ;;  %v1411_v42 = vmax.f32 %v1382_v34, 0.0  ;;  %v1325_v51 = vadd.f32 %v3032_v28, %v1296_v41  ;;  %v1297_v57 = vmul.f32 %v3026_v29, %v1247_v3  ;;  %v2119_v60 = vpop.f32.mrb[107].mxu1 }
 0x1c2   : > { %v1091_v21 = vadd.f32 %v3032_v28, %v1062_v12  ;;  %v3201_v58 = vmax.f32 %v3199_v38, %v3200_v53 }
 0x1c3   : > { %1557 = vst.msk [vmem:[%s2878_s28 + $0x50] sm:$0xf] %vm1536_vm2, %v1787_v22  ;;  %v1788_v48 = vpack.c.bf16 %v1411_v42, %v1411_v42  ;;  %v1354_v13 = vmax.f32 %v1090_v6, %v1325_v51  ;;  %v1326_v30 = vadd.f32 %v3032_v28, %v1297_v57 }
 0x1c5   : > { %1558 = vst.msk [vmem:[%s2878_s28 + $0x54] sm:$0xf] %vm1536_vm2, %v1788_v48  ;;  %v1383_v46 = vmax.f32 %v3192_v44, %v1354_v13  ;;  %v1355_v55 = vmax.f32 %v1091_v21, %v1326_v30  ;;  %v1017_v10 = vpop.f32.mrb[108].mxu0  ;;  %v3202_v48 = vld [vmem:[#allocation9_spill] sm:$0xff]  ;;  %v3203_v13 = vld [vmem:[#allocation10_spill] sm:$0xff] }
 0x1c6   : > { %v1063_v1 = vmul.f32 %v3026_v29, %v1017_v10  ;;  %v1252_v7 = vpop.f32.mrb[108].mxu1  ;;  %v2056_v9 = vpop.f32.mrb[109].mxu0  ;;  %v3204_v30 = vmax.f32 %v3202_v48, %v3203_v13 }
 0x1c7   : > { %v1412_v59 = vmax.f32 %v1383_v46, 0.0  ;;  %v1384_v31 = vmax.f32 %v3195_v39, %v1355_v55  ;;  %v1298_v2 = vmul.f32 %v3026_v29, %v1252_v7  ;;  %v2122_v33 = vpop.f32.mrb[109].mxu1  ;;  %v1020_v4 = vpop.f32.mrb[110].mxu0  ;;  %v3205_v9 = vld [vmem:[#allocation11_spill] sm:$0xff] }
 0x1c8   : > { %v1092_v14 = vadd.f32 %v3032_v28, %v1063_v1  ;;  %v1064_v15 = vmul.f32 %v3026_v29, %v1020_v4  ;;  %v1255_v23 = vpop.f32.mrb[110].mxu1  ;;  %v2057_v40 = vpop.f32.mrb[111].mxu0 }
 0x1c9   : > { %v1789_v16 = vpack.c.bf16 %v1412_v59, %v1412_v59  ;;  %v1413_v18 = vmax.f32 %v1384_v31, 0.0  ;;  %v1327_v8 = vadd.f32 %v3032_v28, %v1298_v2  ;;  %v1299_v11 = vmul.f32 %v3026_v29, %v1255_v23  ;;  %v2123_v24 = vpop.f32.mrb[111].mxu1  ;;  %v3206_v59 = vld [vmem:[#allocation12_spill] sm:$0xff] }
 0x1ca   : > { %v1093_v62 = vadd.f32 %v3032_v28, %v1064_v15  ;;  %v3207_v52 = vmax.f32 %v3205_v9, %v3206_v59 }
 0x1cb   : > { %1559 = vst.msk [vmem:[%s2878_s28 + $0x58] sm:$0xf] %vm1536_vm2, %v1789_v16  ;;  %v1790_v25 = vpack.c.bf16 %v1413_v18, %v1413_v18  ;;  %v1356_v43 = vmax.f32 %v1092_v14, %v1327_v8  ;;  %v1328_v0 = vadd.f32 %v3032_v28, %v1299_v11  ;;  %v3208_v11 = vld [vmem:[#allocation13_spill] sm:$0xff] }
 0x1cd   : > { %1560 = vst.msk [vmem:[%s2878_s28 + $0x5c] sm:$0xf] %vm1536_vm2, %v1790_v25  ;;  %v1385_v20 = vmax.f32 %v3198_v32, %v1356_v43  ;;  %v1357_v35 = vmax.f32 %v1093_v62, %v1328_v0  ;;  %v1025_v56 = vpop.f32.mrb[112].mxu0 }
 0x1ce   : > { %v1065_v47 = vmul.f32 %v3026_v29, %v1025_v56  ;;  %v1260_v63 = vpop.f32.mrb[112].mxu1  ;;  %v2060_v50 = vpop.f32.mrb[113].mxu0 }
 0x1cf   : > { %v1414_v54 = vmax.f32 %v1385_v20, 0.0  ;;  %v1386_v61 = vmax.f32 %v3201_v58, %v1357_v35  ;;  %v1300_v49 = vmul.f32 %v3026_v29, %v1260_v63  ;;  %v2126_v45 = vpop.f32.mrb[113].mxu1  ;;  %v1028_v34 = vpop.f32.mrb[114].mxu0 }
 0x1d0   : > { %v1094_v41 = vadd.f32 %v3032_v28, %v1065_v47  ;;  %v1066_v37 = vmul.f32 %v3026_v29, %v1028_v34  ;;  %v1263_v19 = vpop.f32.mrb[114].mxu1  ;;  %v2061_v6 = vpop.f32.mrb[115].mxu0 }
 0x1d1   : > { %v1791_v12 = vpack.c.bf16 %v1414_v54, %v1414_v54  ;;  %v1415_v3 = vmax.f32 %v1386_v61, 0.0  ;;  %v1329_v5 = vadd.f32 %v3032_v28, %v1300_v49  ;;  %v1301_v22 = vmul.f32 %v3026_v29, %v1263_v19  ;;  %v2127_v42 = vpop.f32.mrb[115].mxu1 }
 0x1d2   : > { %v1095_v51 = vadd.f32 %v3032_v28, %v1066_v37 }
 0x1d3   : > { %1561 = vst.msk [vmem:[%s2878_s28 + $0x60] sm:$0xf] %vm1536_vm2, %v1791_v12  ;;  %v1792_v57 = vpack.c.bf16 %v1415_v3, %v1415_v3  ;;  %v1358_v60 = vmax.f32 %v1094_v41, %v1329_v5  ;;  %v1330_v21 = vadd.f32 %v3032_v28, %v1301_v22 }
 0x1d5   : > { %1562 = vst.msk [vmem:[%s2878_s28 + $0x64] sm:$0xf] %vm1536_vm2, %v1792_v57  ;;  %v1387_v27 = vmax.f32 %v3204_v30, %v1358_v60  ;;  %v1359_v44 = vmax.f32 %v1095_v51, %v1330_v21  ;;  %v1033_v46 = vpop.f32.mrb[116].mxu0 }
 0x1d6   : > { %v1067_v55 = vmul.f32 %v3026_v29, %v1033_v46  ;;  %v1268_v10 = vpop.f32.mrb[116].mxu1  ;;  %v2064_v1 = vpop.f32.mrb[117].mxu0 }
 0x1d7   : > { %v1416_v7 = vmax.f32 %v1387_v27, 0.0  ;;  %v1388_v36 = vmax.f32 %v3207_v52, %v1359_v44  ;;  %v1302_v39 = vmul.f32 %v3026_v29, %v1268_v10  ;;  %v2130_v31 = vpop.f32.mrb[117].mxu1  ;;  %v1036_v2 = vpop.f32.mrb[118].mxu0  ;;  %v3209_v29 = vld [vmem:[#allocation14_spill] sm:$0xff] }
 0x1d8   : > { %v1096_v33 = vadd.f32 %v3032_v28, %v1067_v55  ;;  %v1271_v4 = vpop.f32.mrb[118].mxu1  ;;  %v2065_v14 = vpop.f32.mrb[119].mxu0  ;;  %v3210_v24 = vmax.f32 %v3208_v11, %v3209_v29 }
 0x1d9   : > { %v1793_v15 = vpack.c.bf16 %v1416_v7, %v1416_v7  ;;  %v1417_v23 = vmax.f32 %v1388_v36, 0.0  ;;  %v1331_v40 = vadd.f32 %v3032_v28, %v1302_v39  ;;  %v2131_v16 = vpop.f32.mrb[119].mxu1 }
 0x1db   : > { %1563 = vst.msk [vmem:[%s2878_s28 + $0x68] sm:$0xf] %vm1536_vm2, %v1793_v15  ;;  %v1794_v18 = vpack.c.bf16 %v1417_v23, %v1417_v23  ;;  %v1360_v8 = vmax.f32 %v1096_v33, %v1331_v40 }
 0x1dd   : > { %1564 = vst.msk [vmem:[%s2878_s28 + $0x6c] sm:$0xf] %vm1536_vm2, %v1794_v18  ;;  %v1389_v62 = vmax.f32 %v3210_v24, %v1360_v8 }
 0x1df   : > { %v1418_v25 = vmax.f32 %v1389_v62, 0.0 }
 0x1e1   : > { %v1795_v43 = vpack.c.bf16 %v1418_v25, %v1418_v25 }
 0x1e3   : > { %1565 = vst.msk [vmem:[%s2878_s28 + $0x70] sm:$0xf] %vm1536_vm2, %v1795_v43 }
 0x1e4 PF: > { %s14_s15 = sadd.s32 1, %s2177_s15  }
 0x1e5   : > { %p11_p4 = scmp.ge.s32.totalorder %s14_s15, 4  }
 0x1e7   :  { %13 = sbr.rel (!%p11_p4) target bundleno = 1 (0x1), region = 69 }

// kernel: neural_net_forward.5
= control target key start
LH: loop header
LB: loop body
LE: loop exit
PB: predicated region body
PF: predicated region fallthrough
CT: control target
= control target key end

     0   :  { %s2713_s15 = smov 0   ;;  %s3314_s0 = inlined_call_operand.vmem [shape: bf16[80,512], index: 0, kind: input, shape index: {}]   ;;  %s3315_s1 = inlined_call_operand.vmem [shape: bf16[4,512,64], index: 1, kind: input, shape index: {}]   ;;  %s3316_s2 = inlined_call_operand.vmem [shape: f32[1,64], index: 2, kind: input, shape index: {}]   ;;  %s3317_s3 = inlined_call_operand.vmem [shape: f32[1,64], index: 3, kind: input, shape index: {}]   ;;  %s3318_s4 = inlined_call_operand.vmem [shape: bf16[80,64], index: 4, kind: output, shape index: {}]  }
   0x1 LB: > { %s1901_s16 = sadd.s32 4294967295, %s2686_s15   ;;  %p1905_p0 = scmp.ge.s32.totalorder %s2686_s15, 1  ;;  %s2686_s15 = sphi %s2713_s15, %s14_s15  }
   0x2   : > { %p164_p1 = scmp.lt.s32.totalorder %s2686_s15, 3 }
   0x4   : > { %p165_p2 = pnand %p1905_p0, %p164_p1 }
   0x5   : > { %v2536_v0 = vld [vmem:[%s3315_s1 + $0x40] sm:$0xff] (!%p165_p2)   ;;  %v2540_v4 = vld [vmem:[%s3315_s1 + $0x48] sm:$0xff] (!%p165_p2)   ;;  %v2544_v8 = vld [vmem:[%s3315_s1 + $0x50] sm:$0xff] (!%p165_p2)   ;;  %s191_s23 = smul.u32 (!%p165_p2), 5, %s1901_s16  ;;  %vm1839_vm0 = vcmask (!%p165_p2), 519168  }
   0x6   : > { %168 = sbr.rel (%p165_p2) target bundleno = 382 (0x17e), region = 36  ;;  %v2537_v1 = vld [vmem:[%s3315_s1 + $0xc0] sm:$0xff] (!%p165_p2)   ;;  %2256 = vmatprep.subr.bf16.mxu0 (!%p165_p2), %v2536_v0  ;;  %v2541_v5 = vld [vmem:[%s3315_s1 + $0xc8] sm:$0xff] (!%p165_p2)   ;;  %v2545_v9 = vld [vmem:[%s3315_s1 + $0xd0] sm:$0xff] (!%p165_p2)  }
   0x7   : > { %v2538_v2 = vld [vmem:[%s3315_s1] sm:$0xff] (!%p165_p2)   ;;  %2290 = vmatprep.subr.bf16.mxu1 (!%p165_p2), %v2537_v1  ;;  %v2542_v6 = vld [vmem:[%s3315_s1 + $0x8] sm:$0xff] (!%p165_p2)   ;;  %v2546_v10 = vld [vmem:[%s3315_s1 + $0x10] sm:$0xff] (!%p165_p2)   ;;  %p192_p3 = scmp.lt.s32.totalorder (!%p165_p2), %s191_s23, 9 }
   0x8   : > { %v2539_v3 = vld [vmem:[%s3315_s1 + $0x80] sm:$0xff] (!%p165_p2)   ;;  %2257 = vmatpush3.bf16.msra.mxu0 (!%p165_p2), %v2538_v2  ;;  %v2543_v7 = vld [vmem:[%s3315_s1 + $0x88] sm:$0xff] (!%p165_p2)   ;;  %v2547_v11 = vld [vmem:[%s3315_s1 + $0x90] sm:$0xff] (!%p165_p2)  }
   0x9   : > { %2291 = vmatpush3.bf16.msra.mxu1 (!%p165_p2), %v2539_v3  ;;  %2258 = vmatprep.subr.bf16.mxu0 (!%p165_p2), %v2540_v4  ;;  %v2548_v12 = vld [vmem:[%s3315_s1 + $0x58] sm:$0xff] (!%p165_p2)   ;;  %v2552_v16 = vld [vmem:[%s3315_s1 + $0x60] sm:$0xff] (!%p165_p2)   ;;  %v2556_v20 = vld [vmem:[%s3315_s1 + $0x68] sm:$0xff] (!%p165_p2)  }
   0xa   : > { %2292 = vmatprep.subr.bf16.mxu1 (!%p165_p2), %v2541_v5  ;;  %v2549_v13 = vld [vmem:[%s3315_s1 + $0xd8] sm:$0xff] (!%p165_p2)   ;;  %v2553_v17 = vld [vmem:[%s3315_s1 + $0xe0] sm:$0xff] (!%p165_p2)   ;;  %v2557_v21 = vld [vmem:[%s3315_s1 + $0xe8] sm:$0xff] (!%p165_p2)  }
   0xb   : > { %v2550_v14 = vld [vmem:[%s3315_s1 + $0x18] sm:$0xff] (!%p165_p2)   ;;  %v2554_v18 = vld [vmem:[%s3315_s1 + $0x20] sm:$0xff] (!%p165_p2)   ;;  %v2558_v22 = vld [vmem:[%s3315_s1 + $0x28] sm:$0xff] (!%p165_p2)  }
   0xc   : > { %2259 = vmatpush3.bf16.msra.mxu0 (!%p165_p2), %v2542_v6  ;;  %v2551_v15 = vld [vmem:[%s3315_s1 + $0x98] sm:$0xff] (!%p165_p2)   ;;  %v2555_v19 = vld [vmem:[%s3315_s1 + $0xa0] sm:$0xff] (!%p165_p2)   ;;  %v2559_v23 = vld [vmem:[%s3315_s1 + $0xa8] sm:$0xff] (!%p165_p2)  }
   0xd   : > { %2293 = vmatpush3.bf16.msra.mxu1 %v2543_v7  ;;  %2260 = vmatprep.subr.bf16.mxu0 %v2544_v8  ;;  %s3320_s23 = smov (!%p192_p3, %s191_s23), 9  ;;  %v2560_v24 = vld [vmem:[%s3315_s1 + $0x70] sm:$0xff]   ;;  %v2564_v28 = vld [vmem:[%s3315_s1 + $0x78] sm:$0xff]   ;;  %v2574_v36 = vld [vmem:[%s3315_s1 + $0x140] sm:$0xff]  }
   0xe   : > { %2294 = vmatprep.subr.bf16.mxu1 %v2545_v9  ;;  %v2561_v25 = vld [vmem:[%s3315_s1 + $0xf0] sm:$0xff]   ;;  %s2250_s24 = sshll.u32 %s3320_s23, 4  ;;  %v2565_v29 = vld [vmem:[%s3315_s1 + $0xf8] sm:$0xff]   ;;  %v2575_v37 = vld [vmem:[%s3315_s1 + $0x1c0] sm:$0xff]   ;;  %s1908_s18 = sshll.u32 %s3320_s23, 2 }
   0xf   : > { %v2562_v26 = vld [vmem:[%s3315_s1 + $0x30] sm:$0xff]   ;;  %s2819_s6 = scalar_lea.vmem %s3314_s0, %s2250_s24  ;;  %v2566_v30 = vld [vmem:[%s3315_s1 + $0x38] sm:$0xff]   ;;  %v2576_v38 = vld [vmem:[%s3315_s1 + $0x100] sm:$0xff]   ;;  %s3280_s23 = scalar_lea.vmem %s3318_s4, %s1908_s18 }
  0x10   : > { %2261 = vmatpush3.bf16.msra.mxu0 %v2546_v10  ;;  %v2563_v27 = vld [vmem:[%s3315_s1 + $0xb0] sm:$0xff]   ;;  %v2567_v31 = vld [vmem:[%s3315_s1 + $0xb8] sm:$0xff]   ;;  %v2577_v39 = vld [vmem:[%s3315_s1 + $0x180] sm:$0xff]  }
  0x11   : > { %2295 = vmatpush3.bf16.msra.mxu1 %v2547_v11  ;;  %2262 = vmatprep.subr.bf16.mxu0 %v2548_v12  ;;  %v2828_v32 = vld [vmem:[%s2819_s6 + $0x4] ss:$16 sps:$4 sm:$0xff]   ;;  %v2831_v33 = vld [vmem:[%s2819_s6 + $0xc] ss:$16 sps:$4 sm:$0xff]   ;;  %v2835_v34 = vld [vmem:[%s2819_s6] ss:$16 sps:$4 sm:$0xff]  }
  0x12   : > { %2296 = vmatprep.subr.bf16.mxu1 %v2549_v13  ;;  %559 = vmatprep.mubr.bf16.mxu0 %v2828_v32  ;;  %v2838_v35 = vld [vmem:[%s2819_s6 + $0x8] ss:$16 sps:$4 sm:$0xff]   ;;  %v2582_v44 = vld [vmem:[%s3315_s1 + $0x150] sm:$0xff]   ;;  %v2889_v51 = vld [vmem:[%s2819_s6 + $0x2c] ss:$16 sps:$4 sm:$0xff]  }
  0x13   : > { %615 = vmatprep.mubr.bf16.mxu1 %v2831_v33  ;;  %v2578_v40 = vld [vmem:[%s3315_s1 + $0x148] sm:$0xff]   ;;  %v2583_v45 = vld [vmem:[%s3315_s1 + $0x1d0] sm:$0xff]   ;;  %v2586_v48 = vld [vmem:[%s3315_s1 + $0x158] sm:$0xff]  }
  0x14   : > { %2263 = vmatpush3.bf16.msra.mxu0 %v2550_v14  ;;  %v2579_v41 = vld [vmem:[%s3315_s1 + $0x1c8] sm:$0xff]   ;;  %v2584_v46 = vld [vmem:[%s3315_s1 + $0x110] sm:$0xff]   ;;  %v2587_v49 = vld [vmem:[%s3315_s1 + $0x1d8] sm:$0xff]  }
  0x15   : > { %2297 = vmatpush3.bf16.msra.mxu1 %v2551_v15  ;;  %2264 = vmatprep.subr.bf16.mxu0 %v2552_v16  ;;  %v2580_v42 = vld [vmem:[%s3315_s1 + $0x108] sm:$0xff]   ;;  %v2585_v47 = vld [vmem:[%s3315_s1 + $0x190] sm:$0xff]   ;;  %v2592_v52 = vld [vmem:[%s3315_s1 + $0x118] sm:$0xff]  }
  0x16   : > { %2298 = vmatprep.subr.bf16.mxu1 %v2553_v17  ;;  %v2581_v43 = vld [vmem:[%s3315_s1 + $0x188] sm:$0xff]   ;;  %v2886_v50 = vld [vmem:[%s2819_s6 + $0x24] ss:$16 sps:$4 sm:$0xff]   ;;  %v2593_v53 = vld [vmem:[%s3315_s1 + $0x198] sm:$0xff]  }
  0x17   : > { %v2900_v54 = vld [vmem:[%s2819_s6 + $0x20] ss:$16 sps:$4 sm:$0xff]   ;;  %v2903_v55 = vld [vmem:[%s2819_s6 + $0x28] ss:$16 sps:$4 sm:$0xff]  }
  0x18   : > { %2265 = vmatpush3.bf16.msra.mxu0 %v2554_v18  ;;  %v2596_v56 = vld [vmem:[%s3315_s1 + $0x160] sm:$0xff]   ;;  %v2600_v60 = vld [vmem:[%s3315_s1 + $0x168] sm:$0xff]   ;;  %v2608_v6 = vld [vmem:[%s3315_s1 + $0x170] sm:$0xff]  }
  0x19   : > { %2299 = vmatpush3.bf16.msra.mxu1 %v2555_v19  ;;  %2266 = vmatprep.subr.bf16.mxu0 %v2556_v20  ;;  %v2597_v57 = vld [vmem:[%s3315_s1 + $0x1e0] sm:$0xff]   ;;  %v2601_v61 = vld [vmem:[%s3315_s1 + $0x1e8] sm:$0xff]   ;;  %v2609_v7 = vld [vmem:[%s3315_s1 + $0x1f0] sm:$0xff]  }
  0x1a   : > { %2300 = vmatprep.subr.bf16.mxu1 %v2557_v21  ;;  %v2598_v58 = vld [vmem:[%s3315_s1 + $0x120] sm:$0xff]   ;;  %v214_v63 = vld [vmem:[%s2819_s6 + $0x48] sm:$0xff]  ;;  %v2610_v8 = vld [vmem:[%s3315_s1 + $0x130] sm:$0xff]  }
  0x1b   : > { %v2599_v59 = vld [vmem:[%s3315_s1 + $0x1a0] sm:$0xff]   ;;  %v2929_v1 = vcombine.high %v214_v63, %v214_v63  ;;  %v2604_v2 = vld [vmem:[%s3315_s1 + $0x128] sm:$0xff]   ;;  %v2936_v4 = vcombine.low %v214_v63, %v214_v63  ;;  %v2611_v9 = vld [vmem:[%s3315_s1 + $0x1b0] sm:$0xff]  }
  0x1c   : > { %2267 = vmatpush3.bf16.msra.mxu0 %v2558_v22  ;;  %v213_v62 = vld [vmem:[%s2819_s6 + $0x40] sm:$0xff]  ;;  %v2605_v5 = vld [vmem:[%s3315_s1 + $0x1a8] sm:$0xff]   ;;  %v2612_v10 = vld [vmem:[%s3315_s1 + $0x178] sm:$0xff]  }
  0x1d   : > { %2301 = vmatpush3.bf16.msra.mxu1 %v2559_v23  ;;  %2268 = vmatprep.subr.bf16.mxu0 %v2560_v24  ;;  %v2927_v0 = vcombine.high %v213_v62, %v213_v62  ;;  %v2934_v3 = vcombine.low %v213_v62, %v213_v62  ;;  %v2613_v11 = vld [vmem:[%s3315_s1 + $0x1f8] sm:$0xff]   ;;  %v2616_v14 = vld [vmem:[%s3315_s1 + $0x240] sm:$0xff]   ;;  %v2620_v18 = vld [vmem:[%s3315_s1 + $0x248] sm:$0xff]  }
  0x1e   : > { %2302 = vmatprep.subr.bf16.mxu1 %v2561_v25  ;;  %v2614_v12 = vld [vmem:[%s3315_s1 + $0x138] sm:$0xff]   ;;  %v2617_v15 = vld [vmem:[%s3315_s1 + $0x2c0] sm:$0xff]   ;;  %v2621_v19 = vld [vmem:[%s3315_s1 + $0x2c8] sm:$0xff]  }
  0x1f   : > { %v2615_v13 = vld [vmem:[%s3315_s1 + $0x1b8] sm:$0xff]   ;;  %v2618_v16 = vld [vmem:[%s3315_s1 + $0x200] sm:$0xff]   ;;  %v2622_v20 = vld [vmem:[%s3315_s1 + $0x208] sm:$0xff]  }
  0x20   : > { %2269 = vmatpush3.bf16.msra.mxu0 %v2562_v26  ;;  %v2619_v17 = vld [vmem:[%s3315_s1 + $0x280] sm:$0xff]   ;;  %v2623_v21 = vld [vmem:[%s3315_s1 + $0x288] sm:$0xff]   ;;  %v2624_v22 = vld [vmem:[%s3315_s1 + $0x250] sm:$0xff]  }
  0x21   : > { %2303 = vmatpush3.bf16.msra.mxu1 %v2563_v27  ;;  %2270 = vmatprep.subr.bf16.mxu0 %v2564_v28  ;;  %v2625_v23 = vld [vmem:[%s3315_s1 + $0x2d0] sm:$0xff]   ;;  %v2628_v26 = vld [vmem:[%s3315_s1 + $0x258] sm:$0xff]  }
  0x22   : > { %2304 = vmatprep.subr.bf16.mxu1 %v2565_v29  ;;  %v2626_v24 = vld [vmem:[%s3315_s1 + $0x210] sm:$0xff]   ;;  %v2629_v27 = vld [vmem:[%s3315_s1 + $0x2d8] sm:$0xff]  }
  0x23   : > { %v2627_v25 = vld [vmem:[%s3315_s1 + $0x290] sm:$0xff]   ;;  %v2630_v28 = vld [vmem:[%s3315_s1 + $0x218] sm:$0xff]  }
  0x24   : > { %2271 = vmatpush3.bf16.msra.mxu0 %v2566_v30  ;;  %v2631_v29 = vld [vmem:[%s3315_s1 + $0x298] sm:$0xff]   ;;  %v2632_v30 = vld [vmem:[%s3315_s1 + $0x260] sm:$0xff]   ;;  %v2656_v62 = vld [vmem:[%s3315_s1 + $0x350] sm:$0xff]  }
  0x25   : > { %2305 = vmatpush3.bf16.msra.mxu1 %v2567_v31  ;;  %2324 = vmatprep.subr.bf16.mxu0 %v2574_v36  ;;  %v2633_v31 = vld [vmem:[%s3315_s1 + $0x2e0] sm:$0xff]   ;;  %v2657_v63 = vld [vmem:[%s3315_s1 + $0x3d0] sm:$0xff]  }
  0x26   : > { %2358 = vmatprep.subr.bf16.mxu1 %v2575_v37  ;;  %v2634_v36 = vld [vmem:[%s3315_s1 + $0x220] sm:$0xff]  }
  0x27   : > { %560 = vmatmul.mubr.bf16.vlgmr.msra.gmra.mrb[0].mxu0 %v2835_v34  ;;  %v2635_v37 = vld [vmem:[%s3315_s1 + $0x2a0] sm:$0xff]  }
  0x28   : > { %616 = vmatmul.mubr.bf16.vlgmr.msra.gmra.mrb[0].mxu1 %v2838_v35  ;;  %2325 = vmatpush3.bf16.msra.mxu0 %v2576_v38  ;;  %v2636_v38 = vld [vmem:[%s3315_s1 + $0x268] sm:$0xff]  }
  0x29   : > { %2359 = vmatpush3.bf16.msra.mxu1 %v2577_v39  ;;  %2326 = vmatprep.subr.bf16.mxu0 %v2578_v40  ;;  %v2637_v39 = vld [vmem:[%s3315_s1 + $0x2e8] sm:$0xff]  }
  0x2a   : > { %2360 = vmatprep.subr.bf16.mxu1 %v2579_v41  ;;  %567 = vmatprep.mubr.bf16.mxu0 %v2886_v50  ;;  %v2638_v40 = vld [vmem:[%s3315_s1 + $0x228] sm:$0xff]  }
  0x2b   : > { %623 = vmatprep.mubr.bf16.mxu1 %v2889_v51  ;;  %v2639_v41 = vld [vmem:[%s3315_s1 + $0x2a8] sm:$0xff]  }
  0x2c   : > { %2327 = vmatpush3.bf16.msra.mxu0 %v2580_v42  ;;  %v2640_v42 = vld [vmem:[%s3315_s1 + $0x270] sm:$0xff]  }
  0x2d   : > { %2361 = vmatpush3.bf16.msra.mxu1 %v2581_v43  ;;  %2328 = vmatprep.subr.bf16.mxu0 %v2582_v44  ;;  %v2641_v43 = vld [vmem:[%s3315_s1 + $0x2f0] sm:$0xff]  }
  0x2e   : > { %2362 = vmatprep.subr.bf16.mxu1 %v2583_v45  ;;  %v2642_v44 = vld [vmem:[%s3315_s1 + $0x230] sm:$0xff]  }
  0x2f   : > { %568 = vmatmul.mubr.bf16.gmra.mrb[4].mxu0 %v2900_v54  ;;  %v2643_v45 = vld [vmem:[%s3315_s1 + $0x2b0] sm:$0xff]  }
  0x30   : > { %2329 = vmatpush3.bf16.msra.mxu0 %v2584_v46  ;;  %624 = vmatmul.mubr.bf16.gmra.mrb[4].mxu1 %v2903_v55  ;;  %v2644_v46 = vld [vmem:[%s3315_s1 + $0x278] sm:$0xff]  }
  0x31   : > { %2363 = vmatpush3.bf16.msra.mxu1 %v2585_v47  ;;  %2330 = vmatprep.subr.bf16.mxu0 %v2586_v48  ;;  %v2645_v47 = vld [vmem:[%s3315_s1 + $0x2f8] sm:$0xff]  }
  0x32   : > { %2364 = vmatprep.subr.bf16.mxu1 %v2587_v49  ;;  %575 = vmatprep.mubr.bf16.mxu0 %v2927_v0  ;;  %v2646_v48 = vld [vmem:[%s3315_s1 + $0x238] sm:$0xff]  }
  0x33   : > { %631 = vmatprep.mubr.bf16.mxu1 %v2929_v1  ;;  %v2647_v49 = vld [vmem:[%s3315_s1 + $0x2b8] sm:$0xff]  }
  0x34   : > { %2331 = vmatpush3.bf16.msra.mxu0 %v2592_v52  ;;  %v2648_v52 = vld [vmem:[%s3315_s1 + $0x340] sm:$0xff]  }
  0x35   : > { %2365 = vmatpush3.bf16.msra.mxu1 %v2593_v53  ;;  %2332 = vmatprep.subr.bf16.mxu0 %v2596_v56  ;;  %v2649_v53 = vld [vmem:[%s3315_s1 + $0x3c0] sm:$0xff]  }
  0x36   : > { %2366 = vmatprep.subr.bf16.mxu1 %v2597_v57  ;;  %v2650_v56 = vld [vmem:[%s3315_s1 + $0x300] sm:$0xff]  }
  0x37   : > { %576 = vmatmul.mubr.bf16.gmra.mrb[8].mxu0 %v2934_v3  ;;  %v2651_v57 = vld [vmem:[%s3315_s1 + $0x380] sm:$0xff]  }
  0x38   : > { %2333 = vmatpush3.bf16.msra.mxu0 %v2598_v58  ;;  %632 = vmatmul.mubr.bf16.gmra.mrb[8].mxu1 %v2936_v4  ;;  %v2652_v58 = vld [vmem:[%s3315_s1 + $0x348] sm:$0xff]  }
  0x39   : > { %2367 = vmatpush3.bf16.msra.mxu1 %v2599_v59  ;;  %2334 = vmatprep.subr.bf16.mxu0 %v2600_v60  ;;  %v2653_v59 = vld [vmem:[%s3315_s1 + $0x3c8] sm:$0xff]  }
  0x3a   : > { %2368 = vmatprep.subr.bf16.mxu1 %v2601_v61  ;;  %950 = vmatprep.mubr.bf16.mxu0 %v2828_v32  ;;  %v2654_v60 = vld [vmem:[%s3315_s1 + $0x308] sm:$0xff]  }
  0x3b   : > { %1006 = vmatprep.mubr.bf16.mxu1 %v2831_v33  ;;  %v2655_v61 = vld [vmem:[%s3315_s1 + $0x388] sm:$0xff]  }
  0x3c   : > { %2335 = vmatpush3.bf16.msra.mxu0 %v2604_v2  ;;  %v2658_v2 = vld [vmem:[%s3315_s1 + $0x310] sm:$0xff]  }
  0x3d   : > { %2369 = vmatpush3.bf16.msra.mxu1 %v2605_v5  ;;  %2336 = vmatprep.subr.bf16.mxu0 %v2608_v6  ;;  %v2659_v5 = vld [vmem:[%s3315_s1 + $0x390] sm:$0xff]   ;;  %v2660_v6 = vld [vmem:[%s3315_s1 + $0x358] sm:$0xff]  }
  0x3e   : > { %2370 = vmatprep.subr.bf16.mxu1 %v2609_v7  ;;  %v2661_v7 = vld [vmem:[%s3315_s1 + $0x3d8] sm:$0xff]  }
  0x40   : > { %2337 = vmatpush3.bf16.msra.mxu0 %v2610_v8  ;;  %v2662_v8 = vld [vmem:[%s3315_s1 + $0x318] sm:$0xff]  }
  0x41   : > { %2371 = vmatpush3.bf16.msra.mxu1 %v2611_v9  ;;  %2338 = vmatprep.subr.bf16.mxu0 %v2612_v10  ;;  %v2663_v9 = vld [vmem:[%s3315_s1 + $0x398] sm:$0xff]   ;;  %v2664_v10 = vld [vmem:[%s3315_s1 + $0x360] sm:$0xff]  }
  0x42   : > { %2372 = vmatprep.subr.bf16.mxu1 %v2613_v11  ;;  %v2665_v11 = vld [vmem:[%s3315_s1 + $0x3e0] sm:$0xff]  }
  0x44   : > { %2339 = vmatpush3.bf16.msra.mxu0 %v2614_v12  ;;  %v2666_v12 = vld [vmem:[%s3315_s1 + $0x320] sm:$0xff]  }
  0x45   : > { %2373 = vmatpush3.bf16.msra.mxu1 %v2615_v13  ;;  %2392 = vmatprep.subr.bf16.mxu0 %v2616_v14  ;;  %v2667_v13 = vld [vmem:[%s3315_s1 + $0x3a0] sm:$0xff]   ;;  %v2668_v14 = vld [vmem:[%s3315_s1 + $0x368] sm:$0xff]  }
  0x46   : > { %2426 = vmatprep.subr.bf16.mxu1 %v2617_v15  ;;  %v2669_v15 = vld [vmem:[%s3315_s1 + $0x3e8] sm:$0xff]  }
  0x47   : > { %951 = vmatmul.mubr.bf16.vlgmr.msra.gmra.mrb[12].mxu0 %v2835_v34 }
  0x48   : > { %1007 = vmatmul.mubr.bf16.vlgmr.msra.gmra.mrb[12].mxu1 %v2838_v35  ;;  %2393 = vmatpush3.bf16.msra.mxu0 %v2618_v16  ;;  %v2670_v16 = vld [vmem:[%s3315_s1 + $0x328] sm:$0xff]  }
  0x49   : > { %2427 = vmatpush3.bf16.msra.mxu1 %v2619_v17  ;;  %2394 = vmatprep.subr.bf16.mxu0 %v2620_v18  ;;  %v2671_v17 = vld [vmem:[%s3315_s1 + $0x3a8] sm:$0xff]   ;;  %v2672_v18 = vld [vmem:[%s3315_s1 + $0x370] sm:$0xff]  }
  0x4a   : > { %958 = vmatprep.mubr.bf16.mxu0 %v2886_v50  ;;  %2428 = vmatprep.subr.bf16.mxu1 %v2621_v19  ;;  %v2673_v19 = vld [vmem:[%s3315_s1 + $0x3f0] sm:$0xff]  }
  0x4b   : > { %1014 = vmatprep.mubr.bf16.mxu1 %v2889_v51 }
  0x4c   : > { %2395 = vmatpush3.bf16.msra.mxu0 %v2622_v20  ;;  %v2676_v20 = vld [vmem:[%s3315_s1 + $0x378] sm:$0xff]  }
  0x4d   : > { %2429 = vmatpush3.bf16.msra.mxu1 %v2623_v21  ;;  %2396 = vmatprep.subr.bf16.mxu0 %v2624_v22  ;;  %v2677_v21 = vld [vmem:[%s3315_s1 + $0x3f8] sm:$0xff]  }
  0x4e   : > { %2430 = vmatprep.subr.bf16.mxu1 %v2625_v23  ;;  %v2678_v22 = vld [vmem:[%s3315_s1 + $0x338] sm:$0xff]  }
  0x4f   : > { %959 = vmatmul.mubr.bf16.gmra.mrb[16].mxu0 %v2900_v54  ;;  %v2679_v23 = vld [vmem:[%s3315_s1 + $0x3b8] sm:$0xff]  }
  0x50   : > { %1015 = vmatmul.mubr.bf16.gmra.mrb[16].mxu1 %v2903_v55  ;;  %2397 = vmatpush3.bf16.msra.mxu0 %v2626_v24 }
  0x51   : > { %2431 = vmatpush3.bf16.msra.mxu1 %v2627_v25  ;;  %2398 = vmatprep.subr.bf16.mxu0 %v2628_v26 }
  0x52   : > { %966 = vmatprep.mubr.bf16.mxu0 %v2927_v0  ;;  %2432 = vmatprep.subr.bf16.mxu1 %v2629_v27 }
  0x53   : > { %1022 = vmatprep.mubr.bf16.mxu1 %v2929_v1 }
  0x54   : > { %2399 = vmatpush3.bf16.msra.mxu0 %v2630_v28 }
  0x55   : > { %2433 = vmatpush3.bf16.msra.mxu1 %v2631_v29  ;;  %2400 = vmatprep.subr.bf16.mxu0 %v2632_v30 }
  0x56   : > { %2434 = vmatprep.subr.bf16.mxu1 %v2633_v31 }
  0x57   : > { %967 = vmatmul.mubr.bf16.gmra.mrb[20].mxu0 %v2934_v3 }
  0x58   : > { %1023 = vmatmul.mubr.bf16.gmra.mrb[20].mxu1 %v2936_v4  ;;  %2401 = vmatpush3.bf16.msra.mxu0 %v2634_v36 }
  0x59   : > { %2435 = vmatpush3.bf16.msra.mxu1 %v2635_v37  ;;  %2402 = vmatprep.subr.bf16.mxu0 %v2636_v38 }
  0x5a   : > { %1334 = vmatprep.mubr.bf16.mxu0 %v2828_v32  ;;  %2436 = vmatprep.subr.bf16.mxu1 %v2637_v39 }
  0x5b   : > { %1390 = vmatprep.mubr.bf16.mxu1 %v2831_v33 }
  0x5c   : > { %2403 = vmatpush3.bf16.msra.mxu0 %v2638_v40 }
  0x5d   : > { %2437 = vmatpush3.bf16.msra.mxu1 %v2639_v41  ;;  %2404 = vmatprep.subr.bf16.mxu0 %v2640_v42 }
  0x5e   : > { %2438 = vmatprep.subr.bf16.mxu1 %v2641_v43 }
  0x60   : > { %2405 = vmatpush3.bf16.msra.mxu0 %v2642_v44 }
  0x61   : > { %2439 = vmatpush3.bf16.msra.mxu1 %v2643_v45  ;;  %2406 = vmatprep.subr.bf16.mxu0 %v2644_v46 }
  0x62   : > { %2440 = vmatprep.subr.bf16.mxu1 %v2645_v47 }
  0x64   : > { %2407 = vmatpush3.bf16.msra.mxu0 %v2646_v48 }
  0x65   : > { %2441 = vmatpush3.bf16.msra.mxu1 %v2647_v49  ;;  %2460 = vmatprep.subr.bf16.mxu0 %v2648_v52 }
  0x66   : > { %2494 = vmatprep.subr.bf16.mxu1 %v2649_v53 }
  0x67   : > { %1335 = vmatmul.mubr.bf16.vlgmr.msra.gmra.mrb[24].mxu0 %v2835_v34 }
  0x68   : > { %1391 = vmatmul.mubr.bf16.vlgmr.msra.gmra.mrb[24].mxu1 %v2838_v35  ;;  %2461 = vmatpush3.bf16.msra.mxu0 %v2650_v56 }
  0x69   : > { %2495 = vmatpush3.bf16.msra.mxu1 %v2651_v57  ;;  %2462 = vmatprep.subr.bf16.mxu0 %v2652_v58 }
  0x6a   : > { %1342 = vmatprep.mubr.bf16.mxu0 %v2886_v50  ;;  %2496 = vmatprep.subr.bf16.mxu1 %v2653_v59 }
  0x6b   : > { %1398 = vmatprep.mubr.bf16.mxu1 %v2889_v51 }
  0x6c   : > { %2463 = vmatpush3.bf16.msra.mxu0 %v2654_v60 }
  0x6d   : > { %2497 = vmatpush3.bf16.msra.mxu1 %v2655_v61  ;;  %2464 = vmatprep.subr.bf16.mxu0 %v2656_v62 }
  0x6e   : > { %2498 = vmatprep.subr.bf16.mxu1 %v2657_v63  ;;  %v3200_v63 = vld [vmem:[%s3316_s2] ss:$0 sm:$0xff] }
  0x6f   : > { %1343 = vmatmul.mubr.bf16.gmra.mrb[28].mxu0 %v2900_v54 }
  0x70   : > { %1399 = vmatmul.mubr.bf16.gmra.mrb[28].mxu1 %v2903_v55  ;;  %2465 = vmatpush3.bf16.msra.mxu0 %v2658_v2 }
  0x71   : > { %2499 = vmatpush3.bf16.msra.mxu1 %v2659_v5  ;;  %2466 = vmatprep.subr.bf16.mxu0 %v2660_v6 }
  0x72   : > { %1350 = vmatprep.mubr.bf16.mxu0 %v2927_v0  ;;  %2500 = vmatprep.subr.bf16.mxu1 %v2661_v7 }
  0x73   : > { %1406 = vmatprep.mubr.bf16.mxu1 %v2929_v1 }
  0x74   : > { %2467 = vmatpush3.bf16.msra.mxu0 %v2662_v8 }
  0x75   : > { %2501 = vmatpush3.bf16.msra.mxu1 %v2663_v9  ;;  %2468 = vmatprep.subr.bf16.mxu0 %v2664_v10 }
  0x76   : > { %2502 = vmatprep.subr.bf16.mxu1 %v2665_v11 }
  0x77   : > { %1351 = vmatmul.mubr.bf16.gmra.mrb[32].mxu0 %v2934_v3 }
  0x78   : > { %1407 = vmatmul.mubr.bf16.gmra.mrb[32].mxu1 %v2936_v4  ;;  %2469 = vmatpush3.bf16.msra.mxu0 %v2666_v12 }
  0x79   : > { %2503 = vmatpush3.bf16.msra.mxu1 %v2667_v13  ;;  %2470 = vmatprep.subr.bf16.mxu0 %v2668_v14 }
  0x7a   : > { %1713 = vmatprep.mubr.bf16.mxu0 %v2828_v32  ;;  %2504 = vmatprep.subr.bf16.mxu1 %v2669_v15  ;;  %v2674_v32 = vld [vmem:[%s3315_s1 + $0x330] sm:$0xff]  }
  0x7b   : > { %1769 = vmatprep.mubr.bf16.mxu1 %v2831_v33  ;;  %v2675_v33 = vld [vmem:[%s3315_s1 + $0x3b0] sm:$0xff]  }
  0x7c   : > { %2471 = vmatpush3.bf16.msra.mxu0 %v2670_v16  ;;  %v3206_v16 = vld [vmem:[%s3317_s3] ss:$0 sm:$0xff] }
  0x7d   : > { %2505 = vmatpush3.bf16.msra.mxu1 %v2671_v17  ;;  %2472 = vmatprep.subr.bf16.mxu0 %v2672_v18 }
  0x7e   : > { %2506 = vmatprep.subr.bf16.mxu1 %v2673_v19 }
  0x80   : > { %2473 = vmatpush3.bf16.msra.mxu0 %v2674_v32 }
  0x81   : > { %2507 = vmatpush3.bf16.msra.mxu1 %v2675_v33  ;;  %2474 = vmatprep.subr.bf16.mxu0 %v2676_v20 }
  0x82   : > { %2508 = vmatprep.subr.bf16.mxu1 %v2677_v21 }
  0x84   : > { %2475 = vmatpush3.bf16.msra.mxu0 %v2678_v22 }
  0x85   : > { %2509 = vmatpush3.bf16.msra.mxu1 %v2679_v23 }
  0x87   : > { %1714 = vmatmul.mubr.bf16.vlgmr.msra.gmra.mrb[36].mxu0 %v2835_v34 }
  0x88   : > { %1770 = vmatmul.mubr.bf16.vlgmr.msra.gmra.mrb[36].mxu1 %v2838_v35  ;;  %1721 = vmatprep.mubr.bf16.mxu0 %v2886_v50 }
  0x89   : > { %1777 = vmatprep.mubr.bf16.mxu1 %v2889_v51 }
  0x8f   : > { %1722 = vmatmul.mubr.bf16.gmra.mrb[40].mxu0 %v2900_v54 }
  0x90   : > { %1778 = vmatmul.mubr.bf16.gmra.mrb[40].mxu1 %v2903_v55  ;;  %1729 = vmatprep.mubr.bf16.mxu0 %v2927_v0 }
  0x91   : > { %1785 = vmatprep.mubr.bf16.mxu1 %v2929_v1 }
  0x97   : > { %1730 = vmatmul.mubr.bf16.gmra.mrb[44].mxu0 %v2934_v3 }
  0x98   : > { %1786 = vmatmul.mubr.bf16.gmra.mrb[44].mxu1 %v2936_v4 }
  0xfa   : > { %v2272_v24 = vpop.f32.mrb[0].mxu0 }
  0xfb   : > { %v2306_v34 = vpop.f32.mrb[0].mxu1  ;;  %v2273_v25 = vpop.f32.mrb[1].mxu0 }
  0xfc   : > { %v2307_v35 = vpop.f32.mrb[1].mxu1  ;;  %v2274_v26 = vadd.f32 %v2273_v25, %v2272_v24  ;;  %v2275_v27 = vpop.f32.mrb[2].mxu0 }
  0xfd   : > { %v2308_v50 = vadd.f32 %v2307_v35, %v2306_v34  ;;  %v2309_v51 = vpop.f32.mrb[2].mxu1  ;;  %v2276_v28 = vpop.f32.mrb[3].mxu0 }
  0xfe   : > { %v2310_v54 = vpop.f32.mrb[3].mxu1  ;;  %v2277_v55 = vadd.f32 %v2276_v28, %v2275_v27 }
  0xff   : > { %v618_v29 = vadd.f32 %v2308_v50, %v2274_v26  ;;  %v2311_v30 = vadd.f32 %v2310_v54, %v2309_v51 }
 0x101   : > { %v621_v0 = vadd.f32 %v2311_v30, %v2277_v55  ;;  %v645_v12 = vmul.f32 %v3200_v63, %v618_v29 }
 0x102   : > { %v2278_v31 = vpop.f32.mrb[4].mxu0 }
 0x103   : > { %v2312_v1 = vpop.f32.mrb[4].mxu1  ;;  %v2279_v36 = vpop.f32.mrb[5].mxu0  ;;  %v646_v17 = vmul.f32 %v3200_v63, %v621_v0  ;;  %v3211_v32 = vadd.f32 %v3206_v16, %v645_v12 }
 0x104   : > { %v2280_v3 = vadd.f32 %v2279_v36, %v2278_v31  ;;  %v2313_v37 = vpop.f32.mrb[5].mxu1  ;;  %v2281_v4 = vpop.f32.mrb[6].mxu0 }
 0x105   : > { %v2314_v38 = vadd.f32 %v2313_v37, %v2312_v1  ;;  %v2315_v39 = vpop.f32.mrb[6].mxu1  ;;  %v2282_v40 = vpop.f32.mrb[7].mxu0  ;;  %v3218_v23 = vadd.f32 %v3206_v16, %v646_v17 }
 0x106   : > { %v2283_v41 = vadd.f32 %v2282_v40, %v2281_v4  ;;  %v2316_v42 = vpop.f32.mrb[7].mxu1 }
 0x107   : > { %v626_v43 = vadd.f32 %v2314_v38, %v2280_v3  ;;  %v2317_v44 = vadd.f32 %v2316_v42, %v2315_v39 }
 0x109   : > { %v629_v45 = vadd.f32 %v2317_v44, %v2283_v41  ;;  %v647_v28 = vmul.f32 %v3200_v63, %v626_v43 }
 0x10a   : > { %v2284_v46 = vpop.f32.mrb[8].mxu0 }
 0x10b   : > { %v2318_v47 = vpop.f32.mrb[8].mxu1  ;;  %v2285_v48 = vpop.f32.mrb[9].mxu0  ;;  %v648_v1 = vmul.f32 %v3200_v63, %v629_v45  ;;  %v3231_v37 = vadd.f32 %v3206_v16, %v647_v28 }
 0x10c   : > { %v2319_v49 = vpop.f32.mrb[9].mxu1  ;;  %v2286_v52 = vadd.f32 %v2285_v48, %v2284_v46  ;;  %v2287_v56 = vpop.f32.mrb[10].mxu0 }
 0x10d   : > { %v2320_v53 = vadd.f32 %v2319_v49, %v2318_v47  ;;  %v2321_v57 = vpop.f32.mrb[10].mxu1  ;;  %v2288_v58 = vpop.f32.mrb[11].mxu0  ;;  %v3238_v41 = vadd.f32 %v3206_v16, %v648_v1 }
 0x10e   : > { %v2322_v59 = vpop.f32.mrb[11].mxu1 }
 0x10f   : > { %v634_v60 = vadd.f32 %v2320_v53, %v2286_v52 }
 0x111   : > { %v649_v56 = vmul.f32 %v3200_v63, %v634_v60 }
 0x11a   : > { %v2340_v61 = vpop.f32.mrb[12].mxu0 }
 0x11b   : > { %v2374_v62 = vpop.f32.mrb[12].mxu1  ;;  %v2341_v2 = vpop.f32.mrb[13].mxu0 }
 0x11c   : > { %v2375_v5 = vpop.f32.mrb[13].mxu1  ;;  %v2342_v6 = vadd.f32 %v2341_v2, %v2340_v61  ;;  %v2343_v8 = vpop.f32.mrb[14].mxu0  ;;  %v3250_v61 = vadd.f32 %v3206_v16, %v649_v56 }
 0x11d   : > { %v2376_v7 = vadd.f32 %v2375_v5, %v2374_v62  ;;  %v2377_v9 = vpop.f32.mrb[14].mxu1  ;;  %v2344_v10 = vpop.f32.mrb[15].mxu0 }
 0x11e   : > { %v2378_v11 = vpop.f32.mrb[15].mxu1  ;;  %v2345_v14 = vadd.f32 %v2344_v10, %v2343_v8 }
 0x11f   : > { %v1009_v13 = vadd.f32 %v2376_v7, %v2342_v6  ;;  %v2379_v15 = vadd.f32 %v2378_v11, %v2377_v9 }
 0x121   : > { %v1030_v18 = vmul.f32 %v3200_v63, %v1009_v13  ;;  %v1012_v19 = vadd.f32 %v2379_v15, %v2345_v14 }
 0x122   : > { %v2346_v21 = vpop.f32.mrb[16].mxu0 }
 0x123   : > { %v3214_v33 = vadd.f32 %v3206_v16, %v1030_v18  ;;  %v1031_v20 = vmul.f32 %v3200_v63, %v1012_v19  ;;  %v2380_v22 = vpop.f32.mrb[16].mxu1  ;;  %v2347_v24 = vpop.f32.mrb[17].mxu0 }
 0x124   : > { %v2381_v34 = vpop.f32.mrb[17].mxu1  ;;  %v2348_v26 = vadd.f32 %v2347_v24, %v2346_v21  ;;  %v2349_v27 = vpop.f32.mrb[18].mxu0 }
 0x125   : > { %v1040_v25 = vmax.f32 %v3211_v32, %v3214_v33  ;;  %v3223_v35 = vadd.f32 %v3206_v16, %v1031_v20  ;;  %v2382_v50 = vadd.f32 %v2381_v34, %v2380_v22  ;;  %v2383_v51 = vpop.f32.mrb[18].mxu1  ;;  %v2350_v54 = vpop.f32.mrb[19].mxu0 }
 0x126   : > { %v2384_v29 = vpop.f32.mrb[19].mxu1  ;;  %v2351_v0 = vadd.f32 %v2350_v54, %v2349_v27 }
 0x127   : > { %v1041_v55 = vmax.f32 %v3218_v23, %v3223_v35  ;;  %v1017_v30 = vadd.f32 %v2382_v50, %v2348_v26  ;;  %v2385_v31 = vadd.f32 %v2384_v29, %v2383_v51 }
 0x129   : > { %v1032_v36 = vmul.f32 %v3200_v63, %v1017_v30  ;;  %v1020_v3 = vadd.f32 %v2385_v31, %v2351_v0 }
 0x12a   : > { %v2352_v39 = vpop.f32.mrb[20].mxu0 }
 0x12b   : > { %v3234_v4 = vadd.f32 %v3206_v16, %v1032_v36  ;;  %v1033_v38 = vmul.f32 %v3200_v63, %v1020_v3  ;;  %v2386_v40 = vpop.f32.mrb[20].mxu1  ;;  %v2353_v42 = vpop.f32.mrb[21].mxu0 }
 0x12c   : > { %v2387_v43 = vpop.f32.mrb[21].mxu1  ;;  %v2354_v46 = vadd.f32 %v2353_v42, %v2352_v39  ;;  %v2355_v48 = vpop.f32.mrb[22].mxu0 }
 0x12d   : > { %v1042_v44 = vmax.f32 %v3231_v37, %v3234_v4  ;;  %v3243_v45 = vadd.f32 %v3206_v16, %v1033_v38  ;;  %v2388_v47 = vadd.f32 %v2387_v43, %v2386_v40  ;;  %v2389_v49 = vpop.f32.mrb[22].mxu1  ;;  %v2356_v52 = vpop.f32.mrb[23].mxu0 }
 0x12e   : > { %v2390_v53 = vpop.f32.mrb[23].mxu1 }
 0x12f   : > { %v1043_v57 = vmax.f32 %v3238_v41, %v3243_v45  ;;  %v1025_v58 = vadd.f32 %v2388_v47, %v2354_v46 }
 0x131   : > { %v1034_v59 = vmul.f32 %v3200_v63, %v1025_v58 }
 0x133   : > { %v3253_v62 = vadd.f32 %v3206_v16, %v1034_v59 }
 0x135   : > { %v1044_v2 = vmax.f32 %v3250_v61, %v3253_v62 }
 0x13a   : > { %v2408_v5 = vpop.f32.mrb[24].mxu0 }
 0x13b   : > { %v2442_v6 = vpop.f32.mrb[24].mxu1  ;;  %v2409_v7 = vpop.f32.mrb[25].mxu0 }
 0x13c   : > { %v2443_v8 = vpop.f32.mrb[25].mxu1  ;;  %v2410_v60 = vadd.f32 %v2409_v7, %v2408_v5  ;;  %v2411_v10 = vpop.f32.mrb[26].mxu0 }
 0x13d   : > { %v2444_v9 = vadd.f32 %v2443_v8, %v2442_v6  ;;  %v2445_v11 = vpop.f32.mrb[26].mxu1  ;;  %v2412_v12 = vpop.f32.mrb[27].mxu0 }
 0x13e   : > { %v2446_v13 = vpop.f32.mrb[27].mxu1  ;;  %v2413_v15 = vadd.f32 %v2412_v12, %v2411_v10 }
 0x13f   : > { %v1393_v14 = vadd.f32 %v2444_v9, %v2410_v60  ;;  %v2447_v17 = vadd.f32 %v2446_v13, %v2445_v11 }
 0x141   : > { %v1396_v18 = vadd.f32 %v2447_v17, %v2413_v15  ;;  %v1414_v7 = vmul.f32 %v3200_v63, %v1393_v14 }
 0x142   : > { %v2414_v19 = vpop.f32.mrb[28].mxu0 }
 0x143   : > { %v2448_v20 = vpop.f32.mrb[28].mxu1  ;;  %v2415_v21 = vpop.f32.mrb[29].mxu0  ;;  %v1415_v10 = vmul.f32 %v3200_v63, %v1396_v18  ;;  %v1419_v13 = vadd.f32 %v3206_v16, %v1414_v7 }
 0x144   : > { %v2449_v22 = vpop.f32.mrb[29].mxu1  ;;  %v2416_v24 = vadd.f32 %v2415_v21, %v2414_v19  ;;  %v2417_v26 = vpop.f32.mrb[30].mxu0 }
 0x145   : > { %v2450_v34 = vadd.f32 %v2449_v22, %v2448_v20  ;;  %v2451_v50 = vpop.f32.mrb[30].mxu1  ;;  %v2418_v27 = vpop.f32.mrb[31].mxu0  ;;  %v1420_v21 = vadd.f32 %v3206_v16, %v1415_v10 }
 0x146   : > { %v2452_v51 = vpop.f32.mrb[31].mxu1  ;;  %v2419_v54 = vadd.f32 %v2418_v27, %v2417_v26 }
 0x147   : > { %v1401_v28 = vadd.f32 %v2450_v34, %v2416_v24  ;;  %v2453_v29 = vadd.f32 %v2452_v51, %v2451_v50 }
 0x149   : > { %v1404_v30 = vadd.f32 %v2453_v29, %v2419_v54  ;;  %v1416_v51 = vmul.f32 %v3200_v63, %v1401_v28 }
 0x14a   : > { %v2420_v0 = vpop.f32.mrb[32].mxu0 }
 0x14b   : > { %v2454_v31 = vpop.f32.mrb[32].mxu1  ;;  %v2421_v1 = vpop.f32.mrb[33].mxu0  ;;  %v1417_v28 = vmul.f32 %v3200_v63, %v1404_v30  ;;  %v1421_v33 = vadd.f32 %v3206_v16, %v1416_v51 }
 0x14c   : > { %v2455_v36 = vpop.f32.mrb[33].mxu1  ;;  %v2422_v3 = vadd.f32 %v2421_v1, %v2420_v0  ;;  %v2423_v39 = vpop.f32.mrb[34].mxu0 }
 0x14d   : > { %v2456_v38 = vadd.f32 %v2455_v36, %v2454_v31  ;;  %v2457_v40 = vpop.f32.mrb[34].mxu1  ;;  %v2424_v42 = vpop.f32.mrb[35].mxu0 }
 0x14e   : > { %v2458_v43 = vpop.f32.mrb[35].mxu1 }
 0x14f   : > { %v3257_v46 = vadd.f32 %v2456_v38, %v2422_v3 }
 0x15a   : > { %v2476_v47 = vpop.f32.mrb[36].mxu0 }
 0x15b   : > { %v2510_v48 = vpop.f32.mrb[36].mxu1  ;;  %v2477_v49 = vpop.f32.mrb[37].mxu0 }
 0x15c   : > { %v2511_v52 = vpop.f32.mrb[37].mxu1  ;;  %v2478_v53 = vadd.f32 %v2477_v49, %v2476_v47  ;;  %v2479_v58 = vpop.f32.mrb[38].mxu0 }
 0x15d   : > { %v2512_v56 = vadd.f32 %v2511_v52, %v2510_v48  ;;  %v2513_v59 = vpop.f32.mrb[38].mxu1  ;;  %v2480_v5 = vpop.f32.mrb[39].mxu0 }
 0x15e   : > { %v2514_v6 = vpop.f32.mrb[39].mxu1  ;;  %v2481_v60 = vadd.f32 %v2480_v5, %v2479_v58 }
 0x15f   : > { %v1772_v8 = vadd.f32 %v2512_v56, %v2478_v53  ;;  %v2515_v9 = vadd.f32 %v2514_v6, %v2513_v59  ;;  %v1422_v59 = vadd.f32 %v3206_v16, %v1417_v28 }
 0x161   : > { %v1793_v11 = vmul.f32 %v3200_v63, %v1772_v8  ;;  %v1775_v12 = vadd.f32 %v2515_v9, %v2481_v60  ;;  %v1418_v8 = vmul.f32 %v3200_v63, %v3257_v46 }
 0x162   : > { %v2482_v19 = vpop.f32.mrb[40].mxu0 }
 0x163   : > { %v1798_v15 = vadd.f32 %v3206_v16, %v1793_v11  ;;  %v1794_v17 = vmul.f32 %v3200_v63, %v1775_v12  ;;  %v2516_v20 = vpop.f32.mrb[40].mxu1  ;;  %v2483_v14 = vpop.f32.mrb[41].mxu0 }
 0x164   : > { %v2517_v22 = vpop.f32.mrb[41].mxu1  ;;  %v2484_v18 = vadd.f32 %v2483_v14, %v2482_v19  ;;  %v2485_v50 = vpop.f32.mrb[42].mxu0 }
 0x165   : > { %v1803_v24 = vmax.f32 %v1419_v13, %v1798_v15  ;;  %v1799_v34 = vadd.f32 %v3206_v16, %v1794_v17  ;;  %v2518_v26 = vadd.f32 %v2517_v22, %v2516_v20  ;;  %v2519_v27 = vpop.f32.mrb[42].mxu1  ;;  %v2486_v54 = vpop.f32.mrb[43].mxu0  ;;  %v1423_v15 = vadd.f32 %v3206_v16, %v1418_v8 }
 0x166   : > { %v2520_v29 = vpop.f32.mrb[43].mxu1  ;;  %v2487_v36 = vadd.f32 %v2486_v54, %v2485_v50 }
 0x167   : > { %v1808_v0 = vmax.f32 %v1040_v25, %v1803_v24  ;;  %v1804_v31 = vmax.f32 %v1420_v21, %v1799_v34  ;;  %v1780_v1 = vadd.f32 %v2518_v26, %v2484_v18  ;;  %v2521_v3 = vadd.f32 %v2520_v29, %v2519_v27 }
 0x169   : > { %v1813_v38 = vmax.f32 %v1808_v0, 0.0  ;;  %v1809_v39 = vmax.f32 %v1041_v55, %v1804_v31  ;;  %v1795_v40 = vmul.f32 %v3200_v63, %v1780_v1  ;;  %v1783_v32 = vadd.f32 %v2521_v3, %v2487_v36 }
 0x16a   : > { %v2488_v23 = vpop.f32.mrb[44].mxu0 }
 0x16b   : > { %v2251_v25 = vpack.c.bf16 %v1813_v38, %v1813_v38  ;;  %v1814_v42 = vmax.f32 %v1809_v39, 0.0  ;;  %v1800_v43 = vadd.f32 %v3206_v16, %v1795_v40  ;;  %v2522_v35 = vpop.f32.mrb[44].mxu1  ;;  %v1796_v55 = vmul.f32 %v3200_v63, %v1783_v32  ;;  %v2489_v30 = vpop.f32.mrb[45].mxu0 }
 0x16c   : > { %v2523_v47 = vpop.f32.mrb[45].mxu1  ;;  %v2490_v52 = vadd.f32 %v2489_v30, %v2488_v23  ;;  %v2491_v56 = vpop.f32.mrb[46].mxu0 }
 0x16d   : > { %1840 = vst.msk [vmem:[%s3280_s23] sm:$0xf] %vm1839_vm0, %v2251_v25  ;;  %v2252_v48 = vpack.c.bf16 %v1814_v42, %v1814_v42  ;;  %v1805_v49 = vmax.f32 %v1421_v33, %v1800_v43  ;;  %v2524_v53 = vadd.f32 %v2523_v47, %v2522_v35  ;;  %v2525_v58 = vpop.f32.mrb[46].mxu1  ;;  %v1801_v5 = vadd.f32 %v3206_v16, %v1796_v55  ;;  %v2492_v6 = vpop.f32.mrb[47].mxu0 }
 0x16e   : > { %v2526_v7 = vpop.f32.mrb[47].mxu1 }
 0x16f   : > { %1841 = vst.msk [vmem:[%s3280_s23 + $0x4] sm:$0xf] %vm1839_vm0, %v2252_v48  ;;  %v1810_v60 = vmax.f32 %v1042_v44, %v1805_v49  ;;  %v1788_v9 = vadd.f32 %v2524_v53, %v2490_v52  ;;  %v1806_v10 = vmax.f32 %v1422_v59, %v1801_v5 }
 0x171   : > { %v1815_v11 = vmax.f32 %v1810_v60, 0.0  ;;  %v1797_v12 = vmul.f32 %v3200_v63, %v1788_v9  ;;  %v1811_v13 = vmax.f32 %v1043_v57, %v1806_v10 }
 0x173   : > { %v2253_v46 = vpack.c.bf16 %v1815_v11, %v1815_v11  ;;  %v1802_v17 = vadd.f32 %v3206_v16, %v1797_v12  ;;  %v1816_v19 = vmax.f32 %v1811_v13, 0.0 }
 0x175   : > { %1842 = vst.msk [vmem:[%s3280_s23 + $0x8] sm:$0xf] %vm1839_vm0, %v2253_v46  ;;  %v1807_v37 = vmax.f32 %v1423_v15, %v1802_v17  ;;  %v2254_v4 = vpack.c.bf16 %v1816_v19, %v1816_v19 }
 0x177   : > { %v1812_v44 = vmax.f32 %v1044_v2, %v1807_v37  ;;  %1843 = vst.msk [vmem:[%s3280_s23 + $0xc] sm:$0xf] %vm1839_vm0, %v2254_v4 }
 0x179   : > { %v1817_v63 = vmax.f32 %v1812_v44, 0.0 }
 0x17b   : > { %v2255_v20 = vpack.c.bf16 %v1817_v63, %v1817_v63 }
 0x17d   : > { %1844 = vst.msk [vmem:[%s3280_s23 + $0x10] sm:$0xf] %vm1839_vm0, %v2255_v20 }
 0x17e PF: > { %s14_s15 = sadd.s32 1, %s2686_s15  }
 0x17f   : > { %p11_p4 = scmp.ge.s32.totalorder %s14_s15, 4  }
 0x181   :  { %13 = sbr.rel (!%p11_p4) target bundleno = 1 (0x1), region = 69 }

// kernel: neural_net_forward.7
= control target key start
LH: loop header
LB: loop body
LE: loop exit
PB: predicated region body
PF: predicated region fallthrough
CT: control target
= control target key end

     0   :  { %s2327_s1 = inlined_call_operand.vmem [shape: bf16[512,512], index: 1, kind: input, shape index: {}]   ;;  %s2328_s0 = inlined_call_operand.vmem [shape: bf16[8,512], index: 0, kind: input, shape index: {}]   ;;  %s2329_s3 = inlined_call_operand.vmem [shape: bf16[512,128], index: 3, kind: input, shape index: {}]   ;;  %s2330_s2 = inlined_call_operand.vmem [shape: f32[1,512], index: 2, kind: input, shape index: {}]   ;;  %s2331_s4 = inlined_call_operand.vmem [shape: f32[1,128], index: 4, kind: input, shape index: {}]   ;;  %s2332_s5 = inlined_call_operand.vmem [shape: f32[8,128], index: 5, kind: output, shape index: {}]  }
   0x1   :  { %v1568_v0 = vld [vmem:[%s2327_s1 + $0x4] ss:$16 sps:$4 sm:$0xff]   ;;  %v1570_v1 = vld [vmem:[%s2327_s1 + $0xc] ss:$16 sps:$4 sm:$0xff]   ;;  %v1572_v2 = vld [vmem:[%s2327_s1] ss:$16 sps:$4 sm:$0xff]  }
   0x2   :  { %827 = vmatprep.subr.bf16.mxu0 %v1568_v0  ;;  %v1573_v3 = vld [vmem:[%s2327_s1 + $0x8] ss:$16 sps:$4 sm:$0xff]   ;;  %909 = vmatprep.subr.bf16.mxu1 %v1570_v1  ;;  %v1574_v4 = vld [vmem:[%s2327_s1 + $0x24] ss:$16 sps:$4 sm:$0xff]   ;;  %v1576_v5 = vld [vmem:[%s2327_s1 + $0x2c] ss:$16 sps:$4 sm:$0xff]  }
   0x3   :  { %828 = vmatpush1.bf16.msra.mxu0 %v1572_v2  ;;  %910 = vmatpush1.bf16.msra.mxu1 %v1573_v3  ;;  %v1578_v6 = vld [vmem:[%s2327_s1 + $0x20] ss:$16 sps:$4 sm:$0xff]   ;;  %v1579_v7 = vld [vmem:[%s2327_s1 + $0x28] ss:$16 sps:$4 sm:$0xff]   ;;  %v1580_v8 = vld [vmem:[%s2327_s1 + $0x44] ss:$16 sps:$4 sm:$0xff]  }
   0x4   :  { %829 = vmatprep.subr.bf16.mxu0 %v1574_v4  ;;  %911 = vmatprep.subr.bf16.mxu1 %v1576_v5  ;;  %v1582_v9 = vld [vmem:[%s2327_s1 + $0x4c] ss:$16 sps:$4 sm:$0xff]   ;;  %v1584_v10 = vld [vmem:[%s2327_s1 + $0x40] ss:$16 sps:$4 sm:$0xff]   ;;  %v1585_v11 = vld [vmem:[%s2327_s1 + $0x48] ss:$16 sps:$4 sm:$0xff]  }
   0x5   :  { %v1586_v12 = vld [vmem:[%s2327_s1 + $0x64] ss:$16 sps:$4 sm:$0xff]   ;;  %v1588_v13 = vld [vmem:[%s2327_s1 + $0x6c] ss:$16 sps:$4 sm:$0xff]   ;;  %v1590_v14 = vld [vmem:[%s2327_s1 + $0x60] ss:$16 sps:$4 sm:$0xff]  }
   0x6   :  { %v1591_v15 = vld [vmem:[%s2327_s1 + $0x68] ss:$16 sps:$4 sm:$0xff]   ;;  %v1592_v16 = vld [vmem:[%s2327_s1 + $0x84] ss:$16 sps:$4 sm:$0xff]   ;;  %v1594_v17 = vld [vmem:[%s2327_s1 + $0x8c] ss:$16 sps:$4 sm:$0xff]  }
   0x7   :  { %830 = vmatpush1.bf16.msra.mxu0 %v1578_v6  ;;  %912 = vmatpush1.bf16.msra.mxu1 %v1579_v7  ;;  %v1596_v18 = vld [vmem:[%s2327_s1 + $0x80] ss:$16 sps:$4 sm:$0xff]   ;;  %v1597_v19 = vld [vmem:[%s2327_s1 + $0x88] ss:$16 sps:$4 sm:$0xff]   ;;  %v1598_v20 = vld [vmem:[%s2327_s1 + $0xa4] ss:$16 sps:$4 sm:$0xff]  }
   0x8   :  { %831 = vmatprep.subr.bf16.mxu0 %v1580_v8  ;;  %913 = vmatprep.subr.bf16.mxu1 %v1582_v9  ;;  %v1600_v21 = vld [vmem:[%s2327_s1 + $0xac] ss:$16 sps:$4 sm:$0xff]   ;;  %v1602_v22 = vld [vmem:[%s2327_s1 + $0xa0] ss:$16 sps:$4 sm:$0xff]   ;;  %v1603_v23 = vld [vmem:[%s2327_s1 + $0xa8] ss:$16 sps:$4 sm:$0xff]  }
   0x9   :  { %v1604_v24 = vld [vmem:[%s2327_s1 + $0xc4] ss:$16 sps:$4 sm:$0xff]   ;;  %v1606_v25 = vld [vmem:[%s2327_s1 + $0xcc] ss:$16 sps:$4 sm:$0xff]   ;;  %v1608_v26 = vld [vmem:[%s2327_s1 + $0xc0] ss:$16 sps:$4 sm:$0xff]  }
   0xa   :  { %v1609_v27 = vld [vmem:[%s2327_s1 + $0xc8] ss:$16 sps:$4 sm:$0xff]   ;;  %v1610_v28 = vld [vmem:[%s2327_s1 + $0xe4] ss:$16 sps:$4 sm:$0xff]   ;;  %v1612_v29 = vld [vmem:[%s2327_s1 + $0xec] ss:$16 sps:$4 sm:$0xff]  }
   0xb   :  { %832 = vmatpush1.bf16.msra.mxu0 %v1584_v10  ;;  %914 = vmatpush1.bf16.msra.mxu1 %v1585_v11  ;;  %v1614_v30 = vld [vmem:[%s2327_s1 + $0xe0] ss:$16 sps:$4 sm:$0xff]   ;;  %v1615_v31 = vld [vmem:[%s2327_s1 + $0xe8] ss:$16 sps:$4 sm:$0xff]   ;;  %v1616_v32 = vld [vmem:[%s2327_s1 + $0x104] ss:$16 sps:$4 sm:$0xff]  }
   0xc   :  { %833 = vmatprep.subr.bf16.mxu0 %v1586_v12  ;;  %915 = vmatprep.subr.bf16.mxu1 %v1588_v13  ;;  %v1618_v33 = vld [vmem:[%s2327_s1 + $0x10c] ss:$16 sps:$4 sm:$0xff]   ;;  %v1620_v34 = vld [vmem:[%s2327_s1 + $0x100] ss:$16 sps:$4 sm:$0xff]   ;;  %v1621_v35 = vld [vmem:[%s2327_s1 + $0x108] ss:$16 sps:$4 sm:$0xff]  }
   0xd   :  { %v1622_v36 = vld [vmem:[%s2327_s1 + $0x124] ss:$16 sps:$4 sm:$0xff]   ;;  %v1624_v37 = vld [vmem:[%s2327_s1 + $0x12c] ss:$16 sps:$4 sm:$0xff]   ;;  %v1626_v38 = vld [vmem:[%s2327_s1 + $0x120] ss:$16 sps:$4 sm:$0xff]  }
   0xe   :  { %v1627_v39 = vld [vmem:[%s2327_s1 + $0x128] ss:$16 sps:$4 sm:$0xff]   ;;  %v1628_v40 = vld [vmem:[%s2327_s1 + $0x144] ss:$16 sps:$4 sm:$0xff]   ;;  %v1630_v41 = vld [vmem:[%s2327_s1 + $0x14c] ss:$16 sps:$4 sm:$0xff]  }
   0xf   :  { %834 = vmatpush1.bf16.msra.mxu0 %v1590_v14  ;;  %916 = vmatpush1.bf16.msra.mxu1 %v1591_v15  ;;  %v1632_v42 = vld [vmem:[%s2327_s1 + $0x140] ss:$16 sps:$4 sm:$0xff]   ;;  %v1633_v43 = vld [vmem:[%s2327_s1 + $0x148] ss:$16 sps:$4 sm:$0xff]   ;;  %v1634_v44 = vld [vmem:[%s2327_s1 + $0x164] ss:$16 sps:$4 sm:$0xff]  }
  0x10   :  { %835 = vmatprep.subr.bf16.mxu0 %v1592_v16  ;;  %917 = vmatprep.subr.bf16.mxu1 %v1594_v17  ;;  %v1636_v45 = vld [vmem:[%s2327_s1 + $0x16c] ss:$16 sps:$4 sm:$0xff]   ;;  %v21_v46 = vld [vmem:[%s2328_s0] sm:$0xff]  ;;  %v1639_v49 = vld [vmem:[%s2327_s1 + $0x168] ss:$16 sps:$4 sm:$0xff]  }
  0x11   :  { %v1348_v47 = vcombine.high %v21_v46, %v21_v46  ;;  %v1638_v48 = vld [vmem:[%s2327_s1 + $0x160] ss:$16 sps:$4 sm:$0xff]   ;;  %v1640_v50 = vld [vmem:[%s2327_s1 + $0x184] ss:$16 sps:$4 sm:$0xff]   ;;  %v1642_v51 = vld [vmem:[%s2327_s1 + $0x18c] ss:$16 sps:$4 sm:$0xff]   ;;  %v1347_v5 = vcombine.low %v21_v46, %v21_v46 }
  0x12   :  { %v1644_v52 = vld [vmem:[%s2327_s1 + $0x180] ss:$16 sps:$4 sm:$0xff]   ;;  %v1645_v53 = vld [vmem:[%s2327_s1 + $0x188] ss:$16 sps:$4 sm:$0xff]   ;;  %v1646_v54 = vld [vmem:[%s2327_s1 + $0x1a4] ss:$16 sps:$4 sm:$0xff]  }
  0x13   :  { %836 = vmatpush1.bf16.msra.mxu0 %v1596_v18  ;;  %918 = vmatpush1.bf16.msra.mxu1 %v1597_v19  ;;  %v1648_v55 = vld [vmem:[%s2327_s1 + $0x1ac] ss:$16 sps:$4 sm:$0xff]   ;;  %v1650_v56 = vld [vmem:[%s2327_s1 + $0x1a0] ss:$16 sps:$4 sm:$0xff]   ;;  %v1651_v57 = vld [vmem:[%s2327_s1 + $0x1a8] ss:$16 sps:$4 sm:$0xff]  }
  0x14   :  { %837 = vmatprep.subr.bf16.mxu0 %v1598_v20  ;;  %919 = vmatprep.subr.bf16.mxu1 %v1600_v21  ;;  %v1652_v58 = vld [vmem:[%s2327_s1 + $0x1c4] ss:$16 sps:$4 sm:$0xff]   ;;  %v1654_v59 = vld [vmem:[%s2327_s1 + $0x1cc] ss:$16 sps:$4 sm:$0xff]   ;;  %v1656_v60 = vld [vmem:[%s2327_s1 + $0x1c0] ss:$16 sps:$4 sm:$0xff]  }
  0x15   :  { %859 = vmatprep.mubr.bf16.mxu0 %v1348_v47  ;;  %941 = vmatprep.mubr.bf16.mxu1 %v1348_v47  ;;  %v1657_v61 = vld [vmem:[%s2327_s1 + $0x1c8] ss:$16 sps:$4 sm:$0xff]   ;;  %v1658_v62 = vld [vmem:[%s2327_s1 + $0x1e4] ss:$16 sps:$4 sm:$0xff]   ;;  %v1660_v63 = vld [vmem:[%s2327_s1 + $0x1ec] ss:$16 sps:$4 sm:$0xff]  }
  0x16   :  { %v1662_v0 = vld [vmem:[%s2327_s1 + $0x1e0] ss:$16 sps:$4 sm:$0xff]   ;;  %v1663_v1 = vld [vmem:[%s2327_s1 + $0x1e8] ss:$16 sps:$4 sm:$0xff]   ;;  %v1669_v2 = vld [vmem:[%s2327_s1 + $0x204] ss:$16 sps:$4 sm:$0xff]  }
  0x17   :  { %838 = vmatpush1.bf16.msra.mxu0 %v1602_v22  ;;  %920 = vmatpush1.bf16.msra.mxu1 %v1603_v23  ;;  %v1672_v3 = vld [vmem:[%s2327_s1 + $0x20c] ss:$16 sps:$4 sm:$0xff]   ;;  %v1667_v6 = vld [vmem:[%s2327_s1 + $0x200] ss:$16 sps:$4 sm:$0xff]   ;;  %v1670_v7 = vld [vmem:[%s2327_s1 + $0x208] ss:$16 sps:$4 sm:$0xff]  }
  0x18   :  { %839 = vmatprep.subr.bf16.mxu0 %v1604_v24  ;;  %921 = vmatprep.subr.bf16.mxu1 %v1606_v25  ;;  %v2030_v4 = vld [vmem:[%s2328_s0 + $0x8] sm:$0xff]  ;;  %v1675_v8 = vld [vmem:[%s2327_s1 + $0x224] ss:$16 sps:$4 sm:$0xff]   ;;  %v1673_v11 = vld [vmem:[%s2327_s1 + $0x220] ss:$16 sps:$4 sm:$0xff]  }
  0x19   :  { %v1678_v9 = vld [vmem:[%s2327_s1 + $0x22c] ss:$16 sps:$4 sm:$0xff]   ;;  %v1350_v10 = vcombine.high %v2030_v4, %v2030_v4  ;;  %v1676_v12 = vld [vmem:[%s2327_s1 + $0x228] ss:$16 sps:$4 sm:$0xff]   ;;  %v1681_v13 = vld [vmem:[%s2327_s1 + $0x244] ss:$16 sps:$4 sm:$0xff]  }
  0x1a   :  { %v1684_v14 = vld [vmem:[%s2327_s1 + $0x24c] ss:$16 sps:$4 sm:$0xff]   ;;  %v1679_v15 = vld [vmem:[%s2327_s1 + $0x240] ss:$16 sps:$4 sm:$0xff]   ;;  %v1682_v16 = vld [vmem:[%s2327_s1 + $0x248] ss:$16 sps:$4 sm:$0xff]  }
  0x1b   :  { %840 = vmatpush1.bf16.msra.mxu0 %v1608_v26  ;;  %922 = vmatpush1.bf16.msra.mxu1 %v1609_v27  ;;  %v1687_v17 = vld [vmem:[%s2327_s1 + $0x264] ss:$16 sps:$4 sm:$0xff]   ;;  %v1690_v18 = vld [vmem:[%s2327_s1 + $0x26c] ss:$16 sps:$4 sm:$0xff]   ;;  %v1685_v19 = vld [vmem:[%s2327_s1 + $0x260] ss:$16 sps:$4 sm:$0xff]  }
  0x1c   :  { %841 = vmatprep.subr.bf16.mxu0 %v1610_v28  ;;  %923 = vmatprep.subr.bf16.mxu1 %v1612_v29  ;;  %v1688_v20 = vld [vmem:[%s2327_s1 + $0x268] ss:$16 sps:$4 sm:$0xff]   ;;  %v1693_v21 = vld [vmem:[%s2327_s1 + $0x284] ss:$16 sps:$4 sm:$0xff]   ;;  %v1696_v22 = vld [vmem:[%s2327_s1 + $0x28c] ss:$16 sps:$4 sm:$0xff]  }
  0x1d   :  { %v1691_v23 = vld [vmem:[%s2327_s1 + $0x280] ss:$16 sps:$4 sm:$0xff]   ;;  %v1694_v24 = vld [vmem:[%s2327_s1 + $0x288] ss:$16 sps:$4 sm:$0xff]   ;;  %v1699_v25 = vld [vmem:[%s2327_s1 + $0x2a4] ss:$16 sps:$4 sm:$0xff]  }
  0x1e   :  { %v1702_v26 = vld [vmem:[%s2327_s1 + $0x2ac] ss:$16 sps:$4 sm:$0xff]   ;;  %v1697_v27 = vld [vmem:[%s2327_s1 + $0x2a0] ss:$16 sps:$4 sm:$0xff]   ;;  %v1700_v28 = vld [vmem:[%s2327_s1 + $0x2a8] ss:$16 sps:$4 sm:$0xff]  }
  0x1f   :  { %842 = vmatpush1.bf16.msra.mxu0 %v1614_v30  ;;  %924 = vmatpush1.bf16.msra.mxu1 %v1615_v31  ;;  %v1705_v29 = vld [vmem:[%s2327_s1 + $0x2c4] ss:$16 sps:$4 sm:$0xff]   ;;  %v1708_v30 = vld [vmem:[%s2327_s1 + $0x2cc] ss:$16 sps:$4 sm:$0xff]   ;;  %v1703_v31 = vld [vmem:[%s2327_s1 + $0x2c0] ss:$16 sps:$4 sm:$0xff]  }
  0x20   :  { %843 = vmatprep.subr.bf16.mxu0 %v1616_v32  ;;  %925 = vmatprep.subr.bf16.mxu1 %v1618_v33  ;;  %v1706_v32 = vld [vmem:[%s2327_s1 + $0x2c8] ss:$16 sps:$4 sm:$0xff]   ;;  %v1711_v33 = vld [vmem:[%s2327_s1 + $0x2e4] ss:$16 sps:$4 sm:$0xff]   ;;  %v1732_v46 = vld [vmem:[%s2327_s1 + $0x34c] ss:$16 sps:$4 sm:$0xff]  }
  0x21   :  { %v1727_v47 = vld [vmem:[%s2327_s1 + $0x340] ss:$16 sps:$4 sm:$0xff]  }
  0x23   :  { %844 = vmatpush1.bf16.msra.mxu0 %v1620_v34  ;;  %926 = vmatpush1.bf16.msra.mxu1 %v1621_v35  ;;  %v1714_v34 = vld [vmem:[%s2327_s1 + $0x2ec] ss:$16 sps:$4 sm:$0xff]   ;;  %v1709_v35 = vld [vmem:[%s2327_s1 + $0x2e0] ss:$16 sps:$4 sm:$0xff]  }
  0x24   :  { %845 = vmatprep.subr.bf16.mxu0 %v1622_v36  ;;  %927 = vmatprep.subr.bf16.mxu1 %v1624_v37  ;;  %v1712_v36 = vld [vmem:[%s2327_s1 + $0x2e8] ss:$16 sps:$4 sm:$0xff]   ;;  %v1717_v37 = vld [vmem:[%s2327_s1 + $0x304] ss:$16 sps:$4 sm:$0xff]  }
  0x27   :  { %846 = vmatpush1.bf16.msra.mxu0 %v1626_v38  ;;  %928 = vmatpush1.bf16.msra.mxu1 %v1627_v39  ;;  %v1720_v38 = vld [vmem:[%s2327_s1 + $0x30c] ss:$16 sps:$4 sm:$0xff]   ;;  %v1715_v39 = vld [vmem:[%s2327_s1 + $0x300] ss:$16 sps:$4 sm:$0xff]  }
  0x28   :  { %847 = vmatprep.subr.bf16.mxu0 %v1628_v40  ;;  %929 = vmatprep.subr.bf16.mxu1 %v1630_v41  ;;  %v1718_v40 = vld [vmem:[%s2327_s1 + $0x308] ss:$16 sps:$4 sm:$0xff]   ;;  %v1723_v41 = vld [vmem:[%s2327_s1 + $0x324] ss:$16 sps:$4 sm:$0xff]  }
  0x2b   :  { %848 = vmatpush1.bf16.msra.mxu0 %v1632_v42  ;;  %930 = vmatpush1.bf16.msra.mxu1 %v1633_v43  ;;  %v1726_v42 = vld [vmem:[%s2327_s1 + $0x32c] ss:$16 sps:$4 sm:$0xff]   ;;  %v1721_v43 = vld [vmem:[%s2327_s1 + $0x320] ss:$16 sps:$4 sm:$0xff]  }
  0x2c   :  { %849 = vmatprep.subr.bf16.mxu0 %v1634_v44  ;;  %931 = vmatprep.subr.bf16.mxu1 %v1636_v45  ;;  %v1724_v44 = vld [vmem:[%s2327_s1 + $0x328] ss:$16 sps:$4 sm:$0xff]   ;;  %v1729_v45 = vld [vmem:[%s2327_s1 + $0x344] ss:$16 sps:$4 sm:$0xff]  }
  0x2f   :  { %850 = vmatpush1.bf16.msra.mxu0 %v1638_v48  ;;  %932 = vmatpush1.bf16.msra.mxu1 %v1639_v49  ;;  %v1730_v48 = vld [vmem:[%s2327_s1 + $0x348] ss:$16 sps:$4 sm:$0xff]   ;;  %v1735_v49 = vld [vmem:[%s2327_s1 + $0x364] ss:$16 sps:$4 sm:$0xff]  }
  0x30   :  { %851 = vmatprep.subr.bf16.mxu0 %v1640_v50  ;;  %933 = vmatprep.subr.bf16.mxu1 %v1642_v51  ;;  %v1738_v50 = vld [vmem:[%s2327_s1 + $0x36c] ss:$16 sps:$4 sm:$0xff]   ;;  %v1733_v51 = vld [vmem:[%s2327_s1 + $0x360] ss:$16 sps:$4 sm:$0xff]  }
  0x33   :  { %852 = vmatpush1.bf16.msra.mxu0 %v1644_v52  ;;  %934 = vmatpush1.bf16.msra.mxu1 %v1645_v53  ;;  %v1736_v52 = vld [vmem:[%s2327_s1 + $0x368] ss:$16 sps:$4 sm:$0xff]   ;;  %v1741_v53 = vld [vmem:[%s2327_s1 + $0x384] ss:$16 sps:$4 sm:$0xff]  }
  0x34   :  { %853 = vmatprep.subr.bf16.mxu0 %v1646_v54  ;;  %935 = vmatprep.subr.bf16.mxu1 %v1648_v55  ;;  %v1744_v54 = vld [vmem:[%s2327_s1 + $0x38c] ss:$16 sps:$4 sm:$0xff]   ;;  %v1739_v55 = vld [vmem:[%s2327_s1 + $0x380] ss:$16 sps:$4 sm:$0xff]  }
  0x37   :  { %854 = vmatpush1.bf16.msra.mxu0 %v1650_v56  ;;  %936 = vmatpush1.bf16.msra.mxu1 %v1651_v57  ;;  %v1742_v56 = vld [vmem:[%s2327_s1 + $0x388] ss:$16 sps:$4 sm:$0xff]   ;;  %v1747_v57 = vld [vmem:[%s2327_s1 + $0x3a4] ss:$16 sps:$4 sm:$0xff]  }
  0x38   :  { %855 = vmatprep.subr.bf16.mxu0 %v1652_v58  ;;  %937 = vmatprep.subr.bf16.mxu1 %v1654_v59  ;;  %v1750_v58 = vld [vmem:[%s2327_s1 + $0x3ac] ss:$16 sps:$4 sm:$0xff]   ;;  %v1745_v59 = vld [vmem:[%s2327_s1 + $0x3a0] ss:$16 sps:$4 sm:$0xff]  }
  0x3b   :  { %856 = vmatpush1.bf16.msra.mxu0 %v1656_v60  ;;  %938 = vmatpush1.bf16.msra.mxu1 %v1657_v61  ;;  %v1748_v60 = vld [vmem:[%s2327_s1 + $0x3a8] ss:$16 sps:$4 sm:$0xff]   ;;  %v1753_v61 = vld [vmem:[%s2327_s1 + $0x3c4] ss:$16 sps:$4 sm:$0xff]  }
  0x3c   :  { %857 = vmatprep.subr.bf16.mxu0 %v1658_v62  ;;  %939 = vmatprep.subr.bf16.mxu1 %v1660_v63  ;;  %v1756_v62 = vld [vmem:[%s2327_s1 + $0x3cc] ss:$16 sps:$4 sm:$0xff]   ;;  %v1751_v63 = vld [vmem:[%s2327_s1 + $0x3c0] ss:$16 sps:$4 sm:$0xff]  }
  0x3f   :  { %858 = vmatpush1.bf16.msra.mxu0 %v1662_v0  ;;  %940 = vmatpush1.bf16.msra.mxu1 %v1663_v1  ;;  %v1754_v0 = vld [vmem:[%s2327_s1 + $0x3c8] ss:$16 sps:$4 sm:$0xff]   ;;  %v1759_v1 = vld [vmem:[%s2327_s1 + $0x3e4] ss:$16 sps:$4 sm:$0xff]  }
  0x40   :  { %868 = vmatprep.subr.bf16.mxu0 %v1669_v2  ;;  %950 = vmatprep.subr.bf16.mxu1 %v1672_v3  ;;  %v1762_v2 = vld [vmem:[%s2327_s1 + $0x3ec] ss:$16 sps:$4 sm:$0xff]   ;;  %v1757_v3 = vld [vmem:[%s2327_s1 + $0x3e0] ss:$16 sps:$4 sm:$0xff]  }
  0x42   :  { %860 = vmatmul.mubr.bf16.vlgmr.msra.gmra.mrb[0].mxu0 %v1347_v5  ;;  %942 = vmatmul.mubr.bf16.vlgmr.msra.gmra.mrb[0].mxu1 %v1347_v5  ;;  %v1760_v5 = vld [vmem:[%s2327_s1 + $0x3e8] ss:$16 sps:$4 sm:$0xff]  }
  0x43   :  { %869 = vmatpush1.bf16.msra.mxu0 %v1667_v6  ;;  %951 = vmatpush1.bf16.msra.mxu1 %v1670_v7  ;;  %v1764_v6 = vld [vmem:[%s2329_s3 + $0x40] sm:$0xff]  }
  0x44   :  { %870 = vmatprep.subr.bf16.mxu0 %v1675_v8  ;;  %952 = vmatprep.subr.bf16.mxu1 %v1678_v9  ;;  %v1765_v7 = vld [vmem:[%s2329_s3 + $0xc0] sm:$0xff]   ;;  %v1349_v8 = vcombine.low %v2030_v4, %v2030_v4  ;;  %v1769_v4 = vld [vmem:[%s2329_s3 + $0xc8] sm:$0xff]  }
  0x45   :  { %900 = vmatprep.mubr.bf16.mxu0 %v1350_v10  ;;  %982 = vmatprep.mubr.bf16.mxu1 %v1350_v10  ;;  %v1766_v9 = vld [vmem:[%s2329_s3] sm:$0xff]  }
  0x46   :  { %v1767_v10 = vld [vmem:[%s2329_s3 + $0x80] sm:$0xff]  }
  0x47   :  { %871 = vmatpush1.bf16.msra.mxu0 %v1673_v11  ;;  %953 = vmatpush1.bf16.msra.mxu1 %v1676_v12  ;;  %v1768_v11 = vld [vmem:[%s2329_s3 + $0x48] sm:$0xff]  }
  0x48   :  { %872 = vmatprep.subr.bf16.mxu0 %v1681_v13  ;;  %954 = vmatprep.subr.bf16.mxu1 %v1684_v14  ;;  %v1770_v12 = vld [vmem:[%s2329_s3 + $0x8] sm:$0xff]   ;;  %v1772_v14 = vld [vmem:[%s2329_s3 + $0x50] sm:$0xff]  }
  0x49   :  { %v1771_v13 = vld [vmem:[%s2329_s3 + $0x88] sm:$0xff]  }
  0x4b   :  { %873 = vmatpush1.bf16.msra.mxu0 %v1679_v15  ;;  %955 = vmatpush1.bf16.msra.mxu1 %v1682_v16  ;;  %v1773_v15 = vld [vmem:[%s2329_s3 + $0xd0] sm:$0xff]  }
  0x4c   :  { %874 = vmatprep.subr.bf16.mxu0 %v1687_v17  ;;  %956 = vmatprep.subr.bf16.mxu1 %v1690_v18  ;;  %v1774_v16 = vld [vmem:[%s2329_s3 + $0x10] sm:$0xff]   ;;  %v1776_v18 = vld [vmem:[%s2329_s3 + $0x58] sm:$0xff]  }
  0x4d   :  { %v1775_v17 = vld [vmem:[%s2329_s3 + $0x90] sm:$0xff]  }
  0x4f   :  { %875 = vmatpush1.bf16.msra.mxu0 %v1685_v19  ;;  %957 = vmatpush1.bf16.msra.mxu1 %v1688_v20  ;;  %v1777_v19 = vld [vmem:[%s2329_s3 + $0xd8] sm:$0xff]  }
  0x50   :  { %876 = vmatprep.subr.bf16.mxu0 %v1693_v21  ;;  %958 = vmatprep.subr.bf16.mxu1 %v1696_v22  ;;  %v1778_v20 = vld [vmem:[%s2329_s3 + $0x18] sm:$0xff]   ;;  %v1780_v22 = vld [vmem:[%s2329_s3 + $0x60] sm:$0xff]  }
  0x51   :  { %v1779_v21 = vld [vmem:[%s2329_s3 + $0x98] sm:$0xff]  }
  0x53   :  { %877 = vmatpush1.bf16.msra.mxu0 %v1691_v23  ;;  %959 = vmatpush1.bf16.msra.mxu1 %v1694_v24  ;;  %v1781_v23 = vld [vmem:[%s2329_s3 + $0xe0] sm:$0xff]  }
  0x54   :  { %878 = vmatprep.subr.bf16.mxu0 %v1699_v25  ;;  %960 = vmatprep.subr.bf16.mxu1 %v1702_v26  ;;  %v1782_v24 = vld [vmem:[%s2329_s3 + $0x20] sm:$0xff]   ;;  %v1784_v26 = vld [vmem:[%s2329_s3 + $0x68] sm:$0xff]  }
  0x55   :  { %v1783_v25 = vld [vmem:[%s2329_s3 + $0xa0] sm:$0xff]  }
  0x57   :  { %879 = vmatpush1.bf16.msra.mxu0 %v1697_v27  ;;  %961 = vmatpush1.bf16.msra.mxu1 %v1700_v28  ;;  %v1785_v27 = vld [vmem:[%s2329_s3 + $0xe8] sm:$0xff]  }
  0x58   :  { %880 = vmatprep.subr.bf16.mxu0 %v1705_v29  ;;  %962 = vmatprep.subr.bf16.mxu1 %v1708_v30  ;;  %v1786_v28 = vld [vmem:[%s2329_s3 + $0x28] sm:$0xff]   ;;  %v1788_v30 = vld [vmem:[%s2329_s3 + $0x70] sm:$0xff]  }
  0x59   :  { %v1787_v29 = vld [vmem:[%s2329_s3 + $0xa8] sm:$0xff]  }
  0x5b   :  { %881 = vmatpush1.bf16.msra.mxu0 %v1703_v31  ;;  %963 = vmatpush1.bf16.msra.mxu1 %v1706_v32  ;;  %v1789_v31 = vld [vmem:[%s2329_s3 + $0xf0] sm:$0xff]  }
  0x5c   :  { %882 = vmatprep.subr.bf16.mxu0 %v1711_v33  ;;  %964 = vmatprep.subr.bf16.mxu1 %v1714_v34  ;;  %v1790_v32 = vld [vmem:[%s2329_s3 + $0x30] sm:$0xff]   ;;  %v1792_v34 = vld [vmem:[%s2329_s3 + $0x78] sm:$0xff]  }
  0x5d   :  { %v1791_v33 = vld [vmem:[%s2329_s3 + $0xb0] sm:$0xff]  }
  0x5f   :  { %883 = vmatpush1.bf16.msra.mxu0 %v1709_v35  ;;  %965 = vmatpush1.bf16.msra.mxu1 %v1712_v36  ;;  %v1793_v35 = vld [vmem:[%s2329_s3 + $0xf8] sm:$0xff]  }
  0x60   :  { %884 = vmatprep.subr.bf16.mxu0 %v1717_v37  ;;  %966 = vmatprep.subr.bf16.mxu1 %v1720_v38  ;;  %v1794_v36 = vld [vmem:[%s2329_s3 + $0x38] sm:$0xff]   ;;  %v153_v38 = vlaneseq }
  0x61   :  { %v1795_v37 = vld [vmem:[%s2329_s3 + $0xb8] sm:$0xff]  }
  0x63   :  { %885 = vmatpush1.bf16.msra.mxu0 %v1715_v39  ;;  %967 = vmatpush1.bf16.msra.mxu1 %v1718_v40  ;;  %v154_v39 = vshrl.u32 %v153_v38, 7 }
  0x64   :  { %886 = vmatprep.subr.bf16.mxu0 %v1723_v41  ;;  %968 = vmatprep.subr.bf16.mxu1 %v1726_v42  ;;  %v151_v42 = vld [vmem:[%s2330_s2] sm:$0xf] }
  0x65   :  { %v155_v40 = vsub.s32 0, %v154_v39  ;;  %v163_v41 = vsub.s32 2, %v154_v39 }
  0x67   :  { %887 = vmatpush1.bf16.msra.mxu0 %v1721_v43  ;;  %969 = vmatpush1.bf16.msra.mxu1 %v1724_v44  ;;  %v159_v43 = vsub.s32 1, %v154_v39  ;;  %v167_v44 = vsub.s32 3, %v154_v39 }
  0x68   :  { %888 = vmatprep.subr.bf16.mxu0 %v1729_v45  ;;  %970 = vmatprep.subr.bf16.mxu1 %v1732_v46  ;;  %v156_v45 = vrot.slane %v151_v42, %v155_v40  ;;  %v164_v46 = vrot.slane %v151_v42, %v163_v41 }
  0x6b   :  { %889 = vmatpush1.bf16.msra.mxu0 %v1727_v47  ;;  %971 = vmatpush1.bf16.msra.mxu1 %v1730_v48  ;;  %v160_v47 = vrot.slane %v151_v42, %v159_v43  ;;  %v168_v48 = vrot.slane %v151_v42, %v167_v44 }
  0x6c   :  { %890 = vmatprep.subr.bf16.mxu0 %v1735_v49  ;;  %972 = vmatprep.subr.bf16.mxu1 %v1738_v50 }
  0x6f   :  { %891 = vmatpush1.bf16.msra.mxu0 %v1733_v51  ;;  %973 = vmatpush1.bf16.msra.mxu1 %v1736_v52 }
  0x70   :  { %892 = vmatprep.subr.bf16.mxu0 %v1741_v53  ;;  %974 = vmatprep.subr.bf16.mxu1 %v1744_v54 }
  0x73   :  { %893 = vmatpush1.bf16.msra.mxu0 %v1739_v55  ;;  %975 = vmatpush1.bf16.msra.mxu1 %v1742_v56 }
  0x74   :  { %894 = vmatprep.subr.bf16.mxu0 %v1747_v57  ;;  %976 = vmatprep.subr.bf16.mxu1 %v1750_v58 }
  0x77   :  { %895 = vmatpush1.bf16.msra.mxu0 %v1745_v59  ;;  %977 = vmatpush1.bf16.msra.mxu1 %v1748_v60 }
  0x78   :  { %896 = vmatprep.subr.bf16.mxu0 %v1753_v61  ;;  %978 = vmatprep.subr.bf16.mxu1 %v1756_v62 }
  0x7b   :  { %897 = vmatpush1.bf16.msra.mxu0 %v1751_v63  ;;  %979 = vmatpush1.bf16.msra.mxu1 %v1754_v0 }
  0x7c   :  { %898 = vmatprep.subr.bf16.mxu0 %v1759_v1  ;;  %980 = vmatprep.subr.bf16.mxu1 %v1762_v2 }
  0x7f   :  { %899 = vmatpush1.bf16.msra.mxu0 %v1757_v3  ;;  %981 = vmatpush1.bf16.msra.mxu1 %v1760_v5 }
  0x80   :  { %1512 = vmatprep.subr.bf16.mxu0 %v1764_v6  ;;  %1534 = vmatprep.subr.bf16.mxu1 %v1765_v7 }
  0x82   :  { %901 = vmatmul.mubr.bf16.vlgmr.msra.gmra.mrb[0].mxu0 %v1349_v8  ;;  %983 = vmatmul.mubr.bf16.vlgmr.msra.gmra.mrb[0].mxu1 %v1349_v8  ;;  %v1479_v8 = vld [vmem:[%s2331_s4] ss:$0 sm:$0xff] }
  0x83   :  { %1513 = vmatpush3.bf16.msra.mxu0 %v1766_v9  ;;  %1535 = vmatpush3.bf16.msra.mxu1 %v1767_v10 }
  0x84   :  { %1514 = vmatprep.subr.bf16.mxu0 %v1768_v11  ;;  %1536 = vmatprep.subr.bf16.mxu1 %v1769_v4 }
  0x87   :  { %1515 = vmatpush3.bf16.msra.mxu0 %v1770_v12  ;;  %1537 = vmatpush3.bf16.msra.mxu1 %v1771_v13 }
  0x88   :  { %1516 = vmatprep.subr.bf16.mxu0 %v1772_v14  ;;  %1538 = vmatprep.subr.bf16.mxu1 %v1773_v15 }
  0x8b   :  { %1517 = vmatpush3.bf16.msra.mxu0 %v1774_v16  ;;  %1539 = vmatpush3.bf16.msra.mxu1 %v1775_v17 }
  0x8c   :  { %1518 = vmatprep.subr.bf16.mxu0 %v1776_v18  ;;  %1540 = vmatprep.subr.bf16.mxu1 %v1777_v19 }
  0x8f   :  { %1519 = vmatpush3.bf16.msra.mxu0 %v1778_v20  ;;  %1541 = vmatpush3.bf16.msra.mxu1 %v1779_v21 }
  0x90   :  { %1520 = vmatprep.subr.bf16.mxu0 %v1780_v22  ;;  %1542 = vmatprep.subr.bf16.mxu1 %v1781_v23 }
  0x93   :  { %1521 = vmatpush3.bf16.msra.mxu0 %v1782_v24  ;;  %1543 = vmatpush3.bf16.msra.mxu1 %v1783_v25 }
  0x94   :  { %1522 = vmatprep.subr.bf16.mxu0 %v1784_v26  ;;  %1544 = vmatprep.subr.bf16.mxu1 %v1785_v27 }
  0x97   :  { %1523 = vmatpush3.bf16.msra.mxu0 %v1786_v28  ;;  %1545 = vmatpush3.bf16.msra.mxu1 %v1787_v29 }
  0x98   :  { %1524 = vmatprep.subr.bf16.mxu0 %v1788_v30  ;;  %1546 = vmatprep.subr.bf16.mxu1 %v1789_v31 }
  0x9b   :  { %1525 = vmatpush3.bf16.msra.mxu0 %v1790_v32  ;;  %1547 = vmatpush3.bf16.msra.mxu1 %v1791_v33 }
  0x9c   :  { %1526 = vmatprep.subr.bf16.mxu0 %v1792_v34  ;;  %1548 = vmatprep.subr.bf16.mxu1 %v1793_v35 }
  0x9f   :  { %1527 = vmatpush3.bf16.msra.mxu0 %v1794_v36  ;;  %1549 = vmatpush3.bf16.msra.mxu1 %v1795_v37 }
 0x155   :  { %v902_v49 = vpop.f32.mrb[0].mxu0  ;;  %v984_v50 = vpop.f32.mrb[0].mxu1 }
 0x156   :  { %v1556_v51 = vadd.f32 %v902_v49, %v156_v45  ;;  %v1558_v52 = vadd.f32 %v984_v50, %v164_v46  ;;  %v904_v53 = vpop.f32.mrb[1].mxu0  ;;  %v986_v54 = vpop.f32.mrb[1].mxu1 }
 0x157   :  { %v1557_v55 = vadd.f32 %v904_v53, %v160_v47  ;;  %v1559_v56 = vadd.f32 %v986_v54, %v168_v48  ;;  %v906_v57 = vpop.f32.mrb[2].mxu0  ;;  %v988_v58 = vpop.f32.mrb[2].mxu1 }
 0x158   :  { %v991_v59 = vmax.f32 %v1556_v51, 0.0  ;;  %v993_v60 = vmax.f32 %v1558_v52, 0.0  ;;  %v907_v61 = vpop.f32.mrb[3].mxu0  ;;  %v989_v62 = vpop.f32.mrb[3].mxu1 }
 0x159   :  { %v992_v63 = vmax.f32 %v1557_v55, 0.0  ;;  %v994_v0 = vmax.f32 %v1559_v56, 0.0 }
 0x15a   :  { %v995_v3 = vpack.c.bf16 %v991_v59, %v991_v59  ;;  %v997_v5 = vpack.c.bf16 %v993_v60, %v993_v60 }
 0x15b   :  { %v996_v1 = vpack.c.bf16 %v992_v63, %v992_v63  ;;  %v998_v2 = vpack.c.bf16 %v994_v0, %v994_v0 }
 0x15d   :  { %1294 = vmatprep.mubr.bf16.mxu0 %v996_v1  ;;  %1334 = vmatprep.mubr.bf16.mxu1 %v998_v2 }
 0x15e   :  { %1295 = vmatmul.mubr.bf16.vlgmr.msra.gmra.mrb[4].mxu0 %v995_v3  ;;  %1335 = vmatmul.mubr.bf16.vlgmr.msra.gmra.mrb[4].mxu1 %v997_v5 }
 0x231   :  { %v1528_v6 = vpop.f32.mrb[4].mxu0  ;;  %v1550_v7 = vpop.f32.mrb[4].mxu1 }
 0x232   :  { %v1529_v9 = vpop.f32.mrb[5].mxu0  ;;  %v1551_v10 = vpop.f32.mrb[5].mxu1 }
 0x233   :  { %v1530_v11 = vadd.f32 %v1529_v9, %v1528_v6  ;;  %v1552_v4 = vadd.f32 %v1551_v10, %v1550_v7  ;;  %v1531_v12 = vpop.f32.mrb[6].mxu0  ;;  %v1553_v13 = vpop.f32.mrb[6].mxu1 }
 0x234   :  { %v1532_v14 = vpop.f32.mrb[7].mxu0  ;;  %v1554_v15 = vpop.f32.mrb[7].mxu1 }
 0x235   :  { %v1297_v16 = vadd.f32 %v1530_v11, %v1479_v8 }
 0x237   :  { %v1337_v17 = vadd.f32 %v1552_v4, %v1297_v16 }
 0x239   :  { %1342 = vst [vmem:[%s2332_s5] sm:$0xff] %v1337_v17 }

// kernel: neural_net_forward.6
= control target key start
LH: loop header
LB: loop body
LE: loop exit
PB: predicated region body
PF: predicated region fallthrough
CT: control target
= control target key end

     0   :  { %s4901_s1 = inlined_call_operand.vmem [shape: bf16[4,1024,128], index: 1, kind: input, shape index: {}]   ;;  %s4902_s0 = inlined_call_operand.vmem [shape: bf16[8,1024], index: 0, kind: input, shape index: {}]   ;;  %s4903_s2 = inlined_call_operand.vmem [shape: f32[1,128], index: 2, kind: input, shape index: {}]   ;;  %s4904_s3 = inlined_call_operand.vmem [shape: f32[1,128], index: 3, kind: input, shape index: {}]   ;;  %s4905_s4 = inlined_call_operand.vmem [shape: bf16[8,128], index: 4, kind: output, shape index: {}]  }
   0x1   :  { %v3775_v0 = vld [vmem:[%s4901_s1 + $0x40] sm:$0xff]   ;;  %v3779_v4 = vld [vmem:[%s4901_s1 + $0x48] sm:$0xff]   ;;  %v3783_v8 = vld [vmem:[%s4901_s1 + $0x50] sm:$0xff]  }
   0x2   :  { %v3776_v1 = vld [vmem:[%s4901_s1 + $0xc0] sm:$0xff]   ;;  %3423 = vmatprep.subr.bf16.mxu0 %v3775_v0  ;;  %v3780_v5 = vld [vmem:[%s4901_s1 + $0xc8] sm:$0xff]   ;;  %v3784_v9 = vld [vmem:[%s4901_s1 + $0xd0] sm:$0xff]  }
   0x3   :  { %v3777_v2 = vld [vmem:[%s4901_s1] sm:$0xff]   ;;  %3445 = vmatprep.subr.bf16.mxu1 %v3776_v1  ;;  %v3781_v6 = vld [vmem:[%s4901_s1 + $0x8] sm:$0xff]   ;;  %v3785_v10 = vld [vmem:[%s4901_s1 + $0x10] sm:$0xff]  }
   0x4   :  { %v3778_v3 = vld [vmem:[%s4901_s1 + $0x80] sm:$0xff]   ;;  %3424 = vmatpush3.bf16.msra.mxu0 %v3777_v2  ;;  %v3782_v7 = vld [vmem:[%s4901_s1 + $0x88] sm:$0xff]   ;;  %v3786_v11 = vld [vmem:[%s4901_s1 + $0x90] sm:$0xff]  }
   0x5   :  { %3446 = vmatpush3.bf16.msra.mxu1 %v3778_v3  ;;  %3425 = vmatprep.subr.bf16.mxu0 %v3779_v4  ;;  %v3787_v12 = vld [vmem:[%s4901_s1 + $0x58] sm:$0xff]   ;;  %v3791_v16 = vld [vmem:[%s4901_s1 + $0x60] sm:$0xff]   ;;  %v3795_v20 = vld [vmem:[%s4901_s1 + $0x68] sm:$0xff]  }
   0x6   :  { %3447 = vmatprep.subr.bf16.mxu1 %v3780_v5  ;;  %v3788_v13 = vld [vmem:[%s4901_s1 + $0xd8] sm:$0xff]   ;;  %v3792_v17 = vld [vmem:[%s4901_s1 + $0xe0] sm:$0xff]   ;;  %v3796_v21 = vld [vmem:[%s4901_s1 + $0xe8] sm:$0xff]  }
   0x7   :  { %v3789_v14 = vld [vmem:[%s4901_s1 + $0x18] sm:$0xff]   ;;  %v3793_v18 = vld [vmem:[%s4901_s1 + $0x20] sm:$0xff]   ;;  %v3797_v22 = vld [vmem:[%s4901_s1 + $0x28] sm:$0xff]  }
   0x8   :  { %3426 = vmatpush3.bf16.msra.mxu0 %v3781_v6  ;;  %v3790_v15 = vld [vmem:[%s4901_s1 + $0x98] sm:$0xff]   ;;  %v3794_v19 = vld [vmem:[%s4901_s1 + $0xa0] sm:$0xff]   ;;  %v3798_v23 = vld [vmem:[%s4901_s1 + $0xa8] sm:$0xff]  }
   0x9   :  { %3448 = vmatpush3.bf16.msra.mxu1 %v3782_v7  ;;  %3427 = vmatprep.subr.bf16.mxu0 %v3783_v8  ;;  %v3799_v24 = vld [vmem:[%s4901_s1 + $0x70] sm:$0xff]   ;;  %v3803_v28 = vld [vmem:[%s4901_s1 + $0x78] sm:$0xff]   ;;  %v18_v32 = vld [vmem:[%s4902_s0] sm:$0xff] }
   0xa   :  { %3449 = vmatprep.subr.bf16.mxu1 %v3784_v9  ;;  %v3800_v25 = vld [vmem:[%s4901_s1 + $0xf0] sm:$0xff]   ;;  %v3804_v29 = vld [vmem:[%s4901_s1 + $0xf8] sm:$0xff]   ;;  %v19_v33 = vld [vmem:[%s4902_s0 + $0x8] sm:$0xff]  ;;  %v4166_v34 = vcombine.high %v18_v32, %v18_v32  ;;  %v4170_v36 = vcombine.low %v18_v32, %v18_v32 }
   0xb   :  { %v3801_v26 = vld [vmem:[%s4901_s1 + $0x30] sm:$0xff]   ;;  %v3805_v30 = vld [vmem:[%s4901_s1 + $0x38] sm:$0xff]   ;;  %v4168_v35 = vcombine.high %v19_v33, %v19_v33  ;;  %v4172_v37 = vcombine.low %v19_v33, %v19_v33  ;;  %v3811_v38 = vld [vmem:[%s4901_s1 + $0x140] sm:$0xff]  }
   0xc   :  { %3428 = vmatpush3.bf16.msra.mxu0 %v3785_v10  ;;  %v3802_v27 = vld [vmem:[%s4901_s1 + $0xb0] sm:$0xff]   ;;  %v3806_v31 = vld [vmem:[%s4901_s1 + $0xb8] sm:$0xff]   ;;  %v3812_v39 = vld [vmem:[%s4901_s1 + $0x1c0] sm:$0xff]   ;;  %596 = vmatprep.mubr.bf16.mxu0 %v4166_v34 }
   0xd   :  { %3450 = vmatpush3.bf16.msra.mxu1 %v3786_v11  ;;  %3429 = vmatprep.subr.bf16.mxu0 %v3787_v12  ;;  %v3813_v40 = vld [vmem:[%s4901_s1 + $0x100] sm:$0xff]   ;;  %v3815_v42 = vld [vmem:[%s4901_s1 + $0x148] sm:$0xff]   ;;  %v3819_v46 = vld [vmem:[%s4901_s1 + $0x150] sm:$0xff]  }
   0xe   :  { %3451 = vmatprep.subr.bf16.mxu1 %v3788_v13  ;;  %636 = vmatprep.mubr.bf16.mxu1 %v4168_v35  ;;  %v3814_v41 = vld [vmem:[%s4901_s1 + $0x180] sm:$0xff]   ;;  %v3816_v43 = vld [vmem:[%s4901_s1 + $0x1c8] sm:$0xff]   ;;  %v3820_v47 = vld [vmem:[%s4901_s1 + $0x1d0] sm:$0xff]  }
   0xf   :  { %v3817_v44 = vld [vmem:[%s4901_s1 + $0x108] sm:$0xff]   ;;  %v3821_v48 = vld [vmem:[%s4901_s1 + $0x110] sm:$0xff]   ;;  %v3823_v50 = vld [vmem:[%s4901_s1 + $0x158] sm:$0xff]  }
  0x10   :  { %3430 = vmatpush3.bf16.msra.mxu0 %v3789_v14  ;;  %v3818_v45 = vld [vmem:[%s4901_s1 + $0x188] sm:$0xff]   ;;  %v3822_v49 = vld [vmem:[%s4901_s1 + $0x190] sm:$0xff]   ;;  %v3824_v51 = vld [vmem:[%s4901_s1 + $0x1d8] sm:$0xff]  }
  0x11   :  { %3452 = vmatpush3.bf16.msra.mxu1 %v3790_v15  ;;  %3431 = vmatprep.subr.bf16.mxu0 %v3791_v16  ;;  %v3825_v52 = vld [vmem:[%s4901_s1 + $0x118] sm:$0xff]   ;;  %v3827_v54 = vld [vmem:[%s4901_s1 + $0x160] sm:$0xff]   ;;  %v3831_v58 = vld [vmem:[%s4901_s1 + $0x168] sm:$0xff]  }
  0x12   :  { %3453 = vmatprep.subr.bf16.mxu1 %v3792_v17  ;;  %v3826_v53 = vld [vmem:[%s4901_s1 + $0x198] sm:$0xff]   ;;  %v3828_v55 = vld [vmem:[%s4901_s1 + $0x1e0] sm:$0xff]   ;;  %v3832_v59 = vld [vmem:[%s4901_s1 + $0x1e8] sm:$0xff]  }
  0x13   :  { %v3829_v56 = vld [vmem:[%s4901_s1 + $0x120] sm:$0xff]   ;;  %v3833_v60 = vld [vmem:[%s4901_s1 + $0x128] sm:$0xff]   ;;  %v3835_v62 = vld [vmem:[%s4901_s1 + $0x170] sm:$0xff]  }
  0x14   :  { %3432 = vmatpush3.bf16.msra.mxu0 %v3793_v18  ;;  %v3830_v57 = vld [vmem:[%s4901_s1 + $0x1a0] sm:$0xff]   ;;  %v3834_v61 = vld [vmem:[%s4901_s1 + $0x1a8] sm:$0xff]   ;;  %v3836_v63 = vld [vmem:[%s4901_s1 + $0x1f0] sm:$0xff]  }
  0x15   :  { %3454 = vmatpush3.bf16.msra.mxu1 %v3794_v19  ;;  %3433 = vmatprep.subr.bf16.mxu0 %v3795_v20  ;;  %v3837_v0 = vld [vmem:[%s4901_s1 + $0x130] sm:$0xff]   ;;  %v3839_v2 = vld [vmem:[%s4901_s1 + $0x178] sm:$0xff]   ;;  %v3847_v12 = vld [vmem:[%s4901_s1 + $0x240] sm:$0xff]  }
  0x16   :  { %3455 = vmatprep.subr.bf16.mxu1 %v3796_v21  ;;  %v3838_v1 = vld [vmem:[%s4901_s1 + $0x1b0] sm:$0xff]   ;;  %v3840_v3 = vld [vmem:[%s4901_s1 + $0x1f8] sm:$0xff]   ;;  %v3848_v13 = vld [vmem:[%s4901_s1 + $0x2c0] sm:$0xff]  }
  0x17   :  { %v3841_v4 = vld [vmem:[%s4901_s1 + $0x138] sm:$0xff]   ;;  %v20_v6 = vld [vmem:[%s4902_s0 + $0x10] sm:$0xff]  ;;  %v3849_v14 = vld [vmem:[%s4901_s1 + $0x200] sm:$0xff]  }
  0x18   :  { %3434 = vmatpush3.bf16.msra.mxu0 %v3797_v22  ;;  %v3842_v5 = vld [vmem:[%s4901_s1 + $0x1b8] sm:$0xff]   ;;  %v4277_v7 = vcombine.high %v20_v6, %v20_v6  ;;  %v4282_v9 = vcombine.low %v20_v6, %v20_v6  ;;  %v3850_v15 = vld [vmem:[%s4901_s1 + $0x280] sm:$0xff]   ;;  %v3851_v16 = vld [vmem:[%s4901_s1 + $0x248] sm:$0xff]  }
  0x19   :  { %3456 = vmatpush3.bf16.msra.mxu1 %v3798_v23  ;;  %3435 = vmatprep.subr.bf16.mxu0 %v3799_v24  ;;  %v21_v8 = vld [vmem:[%s4902_s0 + $0x18] sm:$0xff]  ;;  %v3852_v17 = vld [vmem:[%s4901_s1 + $0x2c8] sm:$0xff]   ;;  %v3855_v20 = vld [vmem:[%s4901_s1 + $0x250] sm:$0xff]  }
  0x1a   :  { %3457 = vmatprep.subr.bf16.mxu1 %v3800_v25  ;;  %v4284_v10 = vcombine.high %v21_v8, %v21_v8  ;;  %v4286_v11 = vcombine.low %v21_v8, %v21_v8  ;;  %v3853_v18 = vld [vmem:[%s4901_s1 + $0x208] sm:$0xff]   ;;  %v3856_v21 = vld [vmem:[%s4901_s1 + $0x2d0] sm:$0xff]   ;;  %v3859_v24 = vld [vmem:[%s4901_s1 + $0x258] sm:$0xff]  }
  0x1b   :  { %v3854_v19 = vld [vmem:[%s4901_s1 + $0x288] sm:$0xff]   ;;  %v3857_v22 = vld [vmem:[%s4901_s1 + $0x210] sm:$0xff]   ;;  %v3860_v25 = vld [vmem:[%s4901_s1 + $0x2d8] sm:$0xff]  }
  0x1c   :  { %3436 = vmatpush3.bf16.msra.mxu0 %v3801_v26  ;;  %v3858_v23 = vld [vmem:[%s4901_s1 + $0x290] sm:$0xff]   ;;  %v3861_v26 = vld [vmem:[%s4901_s1 + $0x218] sm:$0xff]   ;;  %v3867_v32 = vld [vmem:[%s4901_s1 + $0x268] sm:$0xff]  }
  0x1d   :  { %3458 = vmatpush3.bf16.msra.mxu1 %v3802_v27  ;;  %3437 = vmatprep.subr.bf16.mxu0 %v3803_v28  ;;  %v3862_v27 = vld [vmem:[%s4901_s1 + $0x298] sm:$0xff]   ;;  %v3863_v28 = vld [vmem:[%s4901_s1 + $0x260] sm:$0xff]   ;;  %v3868_v33 = vld [vmem:[%s4901_s1 + $0x2e8] sm:$0xff]  }
  0x1e   :  { %3459 = vmatprep.subr.bf16.mxu1 %v3804_v29  ;;  %v3864_v29 = vld [vmem:[%s4901_s1 + $0x2e0] sm:$0xff]   ;;  %v3901_v6 = vld [vmem:[%s4901_s1 + $0x328] sm:$0xff]  }
  0x1f   :  { %v3902_v8 = vld [vmem:[%s4901_s1 + $0x3a8] sm:$0xff]  }
  0x20   :  { %3438 = vmatpush3.bf16.msra.mxu0 %v3805_v30  ;;  %v3865_v30 = vld [vmem:[%s4901_s1 + $0x220] sm:$0xff]  }
  0x21   :  { %3460 = vmatpush3.bf16.msra.mxu1 %v3806_v31  ;;  %3467 = vmatprep.subr.bf16.mxu0 %v3811_v38  ;;  %v3866_v31 = vld [vmem:[%s4901_s1 + $0x2a0] sm:$0xff]   ;;  %v3869_v38 = vld [vmem:[%s4901_s1 + $0x228] sm:$0xff]  }
  0x22   :  { %3489 = vmatprep.subr.bf16.mxu1 %v3812_v39  ;;  %v3870_v39 = vld [vmem:[%s4901_s1 + $0x2a8] sm:$0xff]  }
  0x23   :  { %597 = vmatmul.mubr.bf16.vlgmr.msra.gmra.mrb[0].mxu0 %v4170_v36 }
  0x24   :  { %637 = vmatmul.mubr.bf16.vlgmr.msra.gmra.mrb[0].mxu1 %v4172_v37  ;;  %3468 = vmatpush3.bf16.msra.mxu0 %v3813_v40  ;;  %v3871_v40 = vld [vmem:[%s4901_s1 + $0x270] sm:$0xff]  }
  0x25   :  { %3490 = vmatpush3.bf16.msra.mxu1 %v3814_v41  ;;  %3469 = vmatprep.subr.bf16.mxu0 %v3815_v42  ;;  %v3872_v41 = vld [vmem:[%s4901_s1 + $0x2f0] sm:$0xff]  }
  0x26   :  { %3491 = vmatprep.subr.bf16.mxu1 %v3816_v43  ;;  %676 = vmatprep.mubr.bf16.mxu0 %v4277_v7  ;;  %v3873_v42 = vld [vmem:[%s4901_s1 + $0x230] sm:$0xff]  }
  0x27   :  { %716 = vmatprep.mubr.bf16.mxu1 %v4284_v10  ;;  %v3874_v43 = vld [vmem:[%s4901_s1 + $0x2b0] sm:$0xff]  }
  0x28   :  { %3470 = vmatpush3.bf16.msra.mxu0 %v3817_v44  ;;  %v3875_v44 = vld [vmem:[%s4901_s1 + $0x278] sm:$0xff]  }
  0x29   :  { %3492 = vmatpush3.bf16.msra.mxu1 %v3818_v45  ;;  %3471 = vmatprep.subr.bf16.mxu0 %v3819_v46  ;;  %v3876_v45 = vld [vmem:[%s4901_s1 + $0x2f8] sm:$0xff]  }
  0x2a   :  { %3493 = vmatprep.subr.bf16.mxu1 %v3820_v47  ;;  %v3877_v46 = vld [vmem:[%s4901_s1 + $0x238] sm:$0xff]  }
  0x2b   :  { %v3878_v47 = vld [vmem:[%s4901_s1 + $0x2b8] sm:$0xff]  }
  0x2c   :  { %3472 = vmatpush3.bf16.msra.mxu0 %v3821_v48  ;;  %v3879_v48 = vld [vmem:[%s4901_s1 + $0x340] sm:$0xff]  }
  0x2d   :  { %3494 = vmatpush3.bf16.msra.mxu1 %v3822_v49  ;;  %3473 = vmatprep.subr.bf16.mxu0 %v3823_v50  ;;  %v3880_v49 = vld [vmem:[%s4901_s1 + $0x3c0] sm:$0xff]  }
  0x2e   :  { %3495 = vmatprep.subr.bf16.mxu1 %v3824_v51  ;;  %v3881_v50 = vld [vmem:[%s4901_s1 + $0x300] sm:$0xff]  }
  0x2f   :  { %v3882_v51 = vld [vmem:[%s4901_s1 + $0x380] sm:$0xff]  }
  0x30   :  { %3474 = vmatpush3.bf16.msra.mxu0 %v3825_v52  ;;  %v3883_v52 = vld [vmem:[%s4901_s1 + $0x348] sm:$0xff]  }
  0x31   :  { %3496 = vmatpush3.bf16.msra.mxu1 %v3826_v53  ;;  %3475 = vmatprep.subr.bf16.mxu0 %v3827_v54  ;;  %v3884_v53 = vld [vmem:[%s4901_s1 + $0x3c8] sm:$0xff]  }
  0x32   :  { %3497 = vmatprep.subr.bf16.mxu1 %v3828_v55  ;;  %v3885_v54 = vld [vmem:[%s4901_s1 + $0x308] sm:$0xff]  }
  0x33   :  { %v3886_v55 = vld [vmem:[%s4901_s1 + $0x388] sm:$0xff]  }
  0x34   :  { %3476 = vmatpush3.bf16.msra.mxu0 %v3829_v56  ;;  %v3887_v56 = vld [vmem:[%s4901_s1 + $0x350] sm:$0xff]  }
  0x35   :  { %3498 = vmatpush3.bf16.msra.mxu1 %v3830_v57  ;;  %3477 = vmatprep.subr.bf16.mxu0 %v3831_v58  ;;  %v3888_v57 = vld [vmem:[%s4901_s1 + $0x3d0] sm:$0xff]  }
  0x36   :  { %3499 = vmatprep.subr.bf16.mxu1 %v3832_v59  ;;  %v3889_v58 = vld [vmem:[%s4901_s1 + $0x310] sm:$0xff]  }
  0x37   :  { %v3890_v59 = vld [vmem:[%s4901_s1 + $0x390] sm:$0xff]  }
  0x38   :  { %3478 = vmatpush3.bf16.msra.mxu0 %v3833_v60  ;;  %v3891_v60 = vld [vmem:[%s4901_s1 + $0x358] sm:$0xff]  }
  0x39   :  { %3500 = vmatpush3.bf16.msra.mxu1 %v3834_v61  ;;  %3479 = vmatprep.subr.bf16.mxu0 %v3835_v62  ;;  %v3892_v61 = vld [vmem:[%s4901_s1 + $0x3d8] sm:$0xff]  }
  0x3a   :  { %3501 = vmatprep.subr.bf16.mxu1 %v3836_v63  ;;  %v3893_v62 = vld [vmem:[%s4901_s1 + $0x318] sm:$0xff]  }
  0x3b   :  { %v3894_v63 = vld [vmem:[%s4901_s1 + $0x398] sm:$0xff]  }
  0x3c   :  { %3480 = vmatpush3.bf16.msra.mxu0 %v3837_v0  ;;  %v3895_v0 = vld [vmem:[%s4901_s1 + $0x360] sm:$0xff]  }
  0x3d   :  { %3502 = vmatpush3.bf16.msra.mxu1 %v3838_v1  ;;  %3481 = vmatprep.subr.bf16.mxu0 %v3839_v2  ;;  %v3896_v1 = vld [vmem:[%s4901_s1 + $0x3e0] sm:$0xff]  }
  0x3e   :  { %3503 = vmatprep.subr.bf16.mxu1 %v3840_v3  ;;  %v3897_v2 = vld [vmem:[%s4901_s1 + $0x320] sm:$0xff]  }
  0x3f   :  { %v3898_v3 = vld [vmem:[%s4901_s1 + $0x3a0] sm:$0xff]  }
  0x40   :  { %3482 = vmatpush3.bf16.msra.mxu0 %v3841_v4  ;;  %v3899_v4 = vld [vmem:[%s4901_s1 + $0x368] sm:$0xff]  }
  0x41   :  { %3504 = vmatpush3.bf16.msra.mxu1 %v3842_v5  ;;  %3511 = vmatprep.subr.bf16.mxu0 %v3847_v12  ;;  %v3900_v5 = vld [vmem:[%s4901_s1 + $0x3e8] sm:$0xff]   ;;  %v3903_v12 = vld [vmem:[%s4901_s1 + $0x370] sm:$0xff]  }
  0x42   :  { %3533 = vmatprep.subr.bf16.mxu1 %v3848_v13  ;;  %v3904_v13 = vld [vmem:[%s4901_s1 + $0x3f0] sm:$0xff]  }
  0x43   :  { %677 = vmatmul.mubr.bf16.vlgmr.msra.gmra.mrb[4].mxu0 %v4282_v9 }
  0x44   :  { %717 = vmatmul.mubr.bf16.vlgmr.msra.gmra.mrb[4].mxu1 %v4286_v11  ;;  %3512 = vmatpush3.bf16.msra.mxu0 %v3849_v14  ;;  %v3905_v14 = vld [vmem:[%s4901_s1 + $0x330] sm:$0xff]  }
  0x45   :  { %3534 = vmatpush3.bf16.msra.mxu1 %v3850_v15  ;;  %1283 = vmatprep.mubr.bf16.mxu0 %v4166_v34  ;;  %v3906_v15 = vld [vmem:[%s4901_s1 + $0x3b0] sm:$0xff]  }
  0x46   :  { %3513 = vmatprep.subr.bf16.mxu0 %v3851_v16  ;;  %1323 = vmatprep.mubr.bf16.mxu1 %v4168_v35  ;;  %v3907_v16 = vld [vmem:[%s4901_s1 + $0x378] sm:$0xff]  }
  0x47   :  { %3535 = vmatprep.subr.bf16.mxu1 %v3852_v17  ;;  %v3908_v17 = vld [vmem:[%s4901_s1 + $0x3f8] sm:$0xff]  }
  0x48   :  { %3514 = vmatpush3.bf16.msra.mxu0 %v3853_v18  ;;  %v3909_v18 = vld [vmem:[%s4901_s1 + $0x338] sm:$0xff]  }
  0x49   :  { %3536 = vmatpush3.bf16.msra.mxu1 %v3854_v19  ;;  %3515 = vmatprep.subr.bf16.mxu0 %v3855_v20  ;;  %v3910_v19 = vld [vmem:[%s4901_s1 + $0x3b8] sm:$0xff]   ;;  %v3911_v20 = vld [vmem:[%s4901_s1 + $0x440] sm:$0xff]  }
  0x4a   :  { %3537 = vmatprep.subr.bf16.mxu1 %v3856_v21  ;;  %v3912_v21 = vld [vmem:[%s4901_s1 + $0x4c0] sm:$0xff]  }
  0x4c   :  { %3516 = vmatpush3.bf16.msra.mxu0 %v3857_v22  ;;  %v3913_v22 = vld [vmem:[%s4901_s1 + $0x400] sm:$0xff]  }
  0x4d   :  { %3538 = vmatpush3.bf16.msra.mxu1 %v3858_v23  ;;  %3517 = vmatprep.subr.bf16.mxu0 %v3859_v24  ;;  %v3914_v23 = vld [vmem:[%s4901_s1 + $0x480] sm:$0xff]   ;;  %v3915_v24 = vld [vmem:[%s4901_s1 + $0x448] sm:$0xff]  }
  0x4e   :  { %3539 = vmatprep.subr.bf16.mxu1 %v3860_v25  ;;  %v3916_v25 = vld [vmem:[%s4901_s1 + $0x4c8] sm:$0xff]  }
  0x50   :  { %3518 = vmatpush3.bf16.msra.mxu0 %v3861_v26  ;;  %v3917_v26 = vld [vmem:[%s4901_s1 + $0x408] sm:$0xff]  }
  0x51   :  { %3540 = vmatpush3.bf16.msra.mxu1 %v3862_v27  ;;  %3519 = vmatprep.subr.bf16.mxu0 %v3863_v28  ;;  %v3918_v27 = vld [vmem:[%s4901_s1 + $0x488] sm:$0xff]   ;;  %v3919_v28 = vld [vmem:[%s4901_s1 + $0x450] sm:$0xff]  }
  0x52   :  { %3541 = vmatprep.subr.bf16.mxu1 %v3864_v29  ;;  %v3920_v29 = vld [vmem:[%s4901_s1 + $0x4d0] sm:$0xff]  }
  0x54   :  { %3520 = vmatpush3.bf16.msra.mxu0 %v3865_v30  ;;  %v3921_v30 = vld [vmem:[%s4901_s1 + $0x410] sm:$0xff]  }
  0x55   :  { %3542 = vmatpush3.bf16.msra.mxu1 %v3866_v31  ;;  %3521 = vmatprep.subr.bf16.mxu0 %v3867_v32  ;;  %v3922_v31 = vld [vmem:[%s4901_s1 + $0x490] sm:$0xff]   ;;  %v3923_v32 = vld [vmem:[%s4901_s1 + $0x458] sm:$0xff]  }
  0x56   :  { %3543 = vmatprep.subr.bf16.mxu1 %v3868_v33  ;;  %v3924_v33 = vld [vmem:[%s4901_s1 + $0x4d8] sm:$0xff]  }
  0x58   :  { %3522 = vmatpush3.bf16.msra.mxu0 %v3869_v38  ;;  %v3925_v38 = vld [vmem:[%s4901_s1 + $0x418] sm:$0xff]  }
  0x59   :  { %3544 = vmatpush3.bf16.msra.mxu1 %v3870_v39  ;;  %3523 = vmatprep.subr.bf16.mxu0 %v3871_v40  ;;  %v3926_v39 = vld [vmem:[%s4901_s1 + $0x498] sm:$0xff]   ;;  %v3927_v40 = vld [vmem:[%s4901_s1 + $0x460] sm:$0xff]  }
  0x5a   :  { %3545 = vmatprep.subr.bf16.mxu1 %v3872_v41  ;;  %v3928_v41 = vld [vmem:[%s4901_s1 + $0x4e0] sm:$0xff]  }
  0x5c   :  { %3524 = vmatpush3.bf16.msra.mxu0 %v3873_v42  ;;  %v3929_v42 = vld [vmem:[%s4901_s1 + $0x420] sm:$0xff]  }
  0x5d   :  { %3546 = vmatpush3.bf16.msra.mxu1 %v3874_v43  ;;  %3525 = vmatprep.subr.bf16.mxu0 %v3875_v44  ;;  %v3930_v43 = vld [vmem:[%s4901_s1 + $0x4a0] sm:$0xff]   ;;  %v3931_v44 = vld [vmem:[%s4901_s1 + $0x468] sm:$0xff]  }
  0x5e   :  { %3547 = vmatprep.subr.bf16.mxu1 %v3876_v45  ;;  %v3932_v45 = vld [vmem:[%s4901_s1 + $0x4e8] sm:$0xff]  }
  0x60   :  { %3526 = vmatpush3.bf16.msra.mxu0 %v3877_v46  ;;  %v3933_v46 = vld [vmem:[%s4901_s1 + $0x428] sm:$0xff]  }
  0x61   :  { %3548 = vmatpush3.bf16.msra.mxu1 %v3878_v47  ;;  %3555 = vmatprep.subr.bf16.mxu0 %v3879_v48  ;;  %v3934_v47 = vld [vmem:[%s4901_s1 + $0x4a8] sm:$0xff]   ;;  %v3935_v48 = vld [vmem:[%s4901_s1 + $0x470] sm:$0xff]  }
  0x62   :  { %3577 = vmatprep.subr.bf16.mxu1 %v3880_v49  ;;  %v3936_v49 = vld [vmem:[%s4901_s1 + $0x4f0] sm:$0xff]  }
  0x63   :  { %1284 = vmatmul.mubr.bf16.vlgmr.msra.gmra.mrb[8].mxu0 %v4170_v36 }
  0x64   :  { %1324 = vmatmul.mubr.bf16.vlgmr.msra.gmra.mrb[8].mxu1 %v4172_v37  ;;  %3556 = vmatpush3.bf16.msra.mxu0 %v3881_v50  ;;  %v3937_v50 = vld [vmem:[%s4901_s1 + $0x430] sm:$0xff]  }
  0x65   :  { %3578 = vmatpush3.bf16.msra.mxu1 %v3882_v51  ;;  %1363 = vmatprep.mubr.bf16.mxu0 %v4277_v7  ;;  %v3938_v51 = vld [vmem:[%s4901_s1 + $0x4b0] sm:$0xff]  }
  0x66   :  { %3557 = vmatprep.subr.bf16.mxu0 %v3883_v52  ;;  %1403 = vmatprep.mubr.bf16.mxu1 %v4284_v10  ;;  %v3939_v52 = vld [vmem:[%s4901_s1 + $0x478] sm:$0xff]  }
  0x67   :  { %3579 = vmatprep.subr.bf16.mxu1 %v3884_v53  ;;  %v3940_v53 = vld [vmem:[%s4901_s1 + $0x4f8] sm:$0xff]  }
  0x68   :  { %3558 = vmatpush3.bf16.msra.mxu0 %v3885_v54  ;;  %v3941_v54 = vld [vmem:[%s4901_s1 + $0x438] sm:$0xff]  }
  0x69   :  { %3580 = vmatpush3.bf16.msra.mxu1 %v3886_v55  ;;  %3559 = vmatprep.subr.bf16.mxu0 %v3887_v56  ;;  %v3942_v55 = vld [vmem:[%s4901_s1 + $0x4b8] sm:$0xff]   ;;  %v3943_v56 = vld [vmem:[%s4901_s1 + $0x540] sm:$0xff]  }
  0x6a   :  { %3581 = vmatprep.subr.bf16.mxu1 %v3888_v57  ;;  %v3944_v57 = vld [vmem:[%s4901_s1 + $0x5c0] sm:$0xff]  }
  0x6c   :  { %3560 = vmatpush3.bf16.msra.mxu0 %v3889_v58  ;;  %v3945_v58 = vld [vmem:[%s4901_s1 + $0x500] sm:$0xff]  }
  0x6d   :  { %3582 = vmatpush3.bf16.msra.mxu1 %v3890_v59  ;;  %3561 = vmatprep.subr.bf16.mxu0 %v3891_v60  ;;  %v3946_v59 = vld [vmem:[%s4901_s1 + $0x580] sm:$0xff]   ;;  %v3947_v60 = vld [vmem:[%s4901_s1 + $0x548] sm:$0xff]  }
  0x6e   :  { %3583 = vmatprep.subr.bf16.mxu1 %v3892_v61  ;;  %v3948_v61 = vld [vmem:[%s4901_s1 + $0x5c8] sm:$0xff]  }
  0x70   :  { %3562 = vmatpush3.bf16.msra.mxu0 %v3893_v62  ;;  %v3949_v62 = vld [vmem:[%s4901_s1 + $0x508] sm:$0xff]  }
  0x71   :  { %3584 = vmatpush3.bf16.msra.mxu1 %v3894_v63  ;;  %3563 = vmatprep.subr.bf16.mxu0 %v3895_v0  ;;  %v3950_v63 = vld [vmem:[%s4901_s1 + $0x588] sm:$0xff]   ;;  %v3951_v0 = vld [vmem:[%s4901_s1 + $0x550] sm:$0xff]  }
  0x72   :  { %3585 = vmatprep.subr.bf16.mxu1 %v3896_v1  ;;  %v3952_v1 = vld [vmem:[%s4901_s1 + $0x5d0] sm:$0xff]  }
  0x74   :  { %3564 = vmatpush3.bf16.msra.mxu0 %v3897_v2  ;;  %v3953_v2 = vld [vmem:[%s4901_s1 + $0x510] sm:$0xff]  }
  0x75   :  { %3586 = vmatpush3.bf16.msra.mxu1 %v3898_v3  ;;  %3565 = vmatprep.subr.bf16.mxu0 %v3899_v4  ;;  %v3954_v3 = vld [vmem:[%s4901_s1 + $0x590] sm:$0xff]   ;;  %v3955_v4 = vld [vmem:[%s4901_s1 + $0x558] sm:$0xff]  }
  0x76   :  { %3587 = vmatprep.subr.bf16.mxu1 %v3900_v5  ;;  %v3956_v5 = vld [vmem:[%s4901_s1 + $0x5d8] sm:$0xff]  }
  0x78   :  { %3566 = vmatpush3.bf16.msra.mxu0 %v3901_v6  ;;  %v3957_v6 = vld [vmem:[%s4901_s1 + $0x518] sm:$0xff]  }
  0x79   :  { %3588 = vmatpush3.bf16.msra.mxu1 %v3902_v8  ;;  %3567 = vmatprep.subr.bf16.mxu0 %v3903_v12  ;;  %v3958_v8 = vld [vmem:[%s4901_s1 + $0x598] sm:$0xff]   ;;  %v3959_v12 = vld [vmem:[%s4901_s1 + $0x560] sm:$0xff]  }
  0x7a   :  { %3589 = vmatprep.subr.bf16.mxu1 %v3904_v13  ;;  %v3960_v13 = vld [vmem:[%s4901_s1 + $0x5e0] sm:$0xff]  }
  0x7c   :  { %3568 = vmatpush3.bf16.msra.mxu0 %v3905_v14  ;;  %v3961_v14 = vld [vmem:[%s4901_s1 + $0x520] sm:$0xff]  }
  0x7d   :  { %3590 = vmatpush3.bf16.msra.mxu1 %v3906_v15  ;;  %3569 = vmatprep.subr.bf16.mxu0 %v3907_v16  ;;  %v3962_v15 = vld [vmem:[%s4901_s1 + $0x5a0] sm:$0xff]   ;;  %v3963_v16 = vld [vmem:[%s4901_s1 + $0x568] sm:$0xff]  }
  0x7e   :  { %3591 = vmatprep.subr.bf16.mxu1 %v3908_v17  ;;  %v3964_v17 = vld [vmem:[%s4901_s1 + $0x5e8] sm:$0xff]  }
  0x80   :  { %3570 = vmatpush3.bf16.msra.mxu0 %v3909_v18  ;;  %v3965_v18 = vld [vmem:[%s4901_s1 + $0x528] sm:$0xff]  }
  0x81   :  { %3592 = vmatpush3.bf16.msra.mxu1 %v3910_v19  ;;  %3599 = vmatprep.subr.bf16.mxu0 %v3911_v20  ;;  %v3966_v19 = vld [vmem:[%s4901_s1 + $0x5a8] sm:$0xff]   ;;  %v3967_v20 = vld [vmem:[%s4901_s1 + $0x570] sm:$0xff]  }
  0x82   :  { %3621 = vmatprep.subr.bf16.mxu1 %v3912_v21  ;;  %v3968_v21 = vld [vmem:[%s4901_s1 + $0x5f0] sm:$0xff]  }
  0x83   :  { %1364 = vmatmul.mubr.bf16.vlgmr.msra.gmra.mrb[12].mxu0 %v4282_v9 }
  0x84   :  { %1404 = vmatmul.mubr.bf16.vlgmr.msra.gmra.mrb[12].mxu1 %v4286_v11  ;;  %3600 = vmatpush3.bf16.msra.mxu0 %v3913_v22  ;;  %v3969_v22 = vld [vmem:[%s4901_s1 + $0x530] sm:$0xff]  }
  0x85   :  { %3622 = vmatpush3.bf16.msra.mxu1 %v3914_v23  ;;  %1959 = vmatprep.mubr.bf16.mxu0 %v4166_v34  ;;  %v3970_v23 = vld [vmem:[%s4901_s1 + $0x5b0] sm:$0xff]  }
  0x86   :  { %3601 = vmatprep.subr.bf16.mxu0 %v3915_v24  ;;  %1999 = vmatprep.mubr.bf16.mxu1 %v4168_v35  ;;  %v3971_v24 = vld [vmem:[%s4901_s1 + $0x578] sm:$0xff]  }
  0x87   :  { %3623 = vmatprep.subr.bf16.mxu1 %v3916_v25  ;;  %v3972_v25 = vld [vmem:[%s4901_s1 + $0x5f8] sm:$0xff]  }
  0x88   :  { %3602 = vmatpush3.bf16.msra.mxu0 %v3917_v26  ;;  %v3973_v26 = vld [vmem:[%s4901_s1 + $0x538] sm:$0xff]  }
  0x89   :  { %3624 = vmatpush3.bf16.msra.mxu1 %v3918_v27  ;;  %3603 = vmatprep.subr.bf16.mxu0 %v3919_v28  ;;  %v3974_v27 = vld [vmem:[%s4901_s1 + $0x5b8] sm:$0xff]   ;;  %v3975_v28 = vld [vmem:[%s4901_s1 + $0x640] sm:$0xff]  }
  0x8a   :  { %3625 = vmatprep.subr.bf16.mxu1 %v3920_v29  ;;  %v3976_v29 = vld [vmem:[%s4901_s1 + $0x6c0] sm:$0xff]  }
  0x8c   :  { %3604 = vmatpush3.bf16.msra.mxu0 %v3921_v30  ;;  %v3977_v30 = vld [vmem:[%s4901_s1 + $0x600] sm:$0xff]  }
  0x8d   :  { %3626 = vmatpush3.bf16.msra.mxu1 %v3922_v31  ;;  %3605 = vmatprep.subr.bf16.mxu0 %v3923_v32  ;;  %v3978_v31 = vld [vmem:[%s4901_s1 + $0x680] sm:$0xff]   ;;  %v3979_v32 = vld [vmem:[%s4901_s1 + $0x648] sm:$0xff]  }
  0x8e   :  { %3627 = vmatprep.subr.bf16.mxu1 %v3924_v33  ;;  %v3980_v33 = vld [vmem:[%s4901_s1 + $0x6c8] sm:$0xff]  }
  0x90   :  { %3606 = vmatpush3.bf16.msra.mxu0 %v3925_v38  ;;  %v3981_v38 = vld [vmem:[%s4901_s1 + $0x608] sm:$0xff]  }
  0x91   :  { %3628 = vmatpush3.bf16.msra.mxu1 %v3926_v39  ;;  %3607 = vmatprep.subr.bf16.mxu0 %v3927_v40  ;;  %v3982_v39 = vld [vmem:[%s4901_s1 + $0x688] sm:$0xff]   ;;  %v3983_v40 = vld [vmem:[%s4901_s1 + $0x650] sm:$0xff]  }
  0x92   :  { %3629 = vmatprep.subr.bf16.mxu1 %v3928_v41  ;;  %v3986_v41 = vld [vmem:[%s4901_s1 + $0x690] sm:$0xff]  }
  0x94   :  { %3608 = vmatpush3.bf16.msra.mxu0 %v3929_v42  ;;  %v3987_v42 = vld [vmem:[%s4901_s1 + $0x658] sm:$0xff]  }
  0x95   :  { %3630 = vmatpush3.bf16.msra.mxu1 %v3930_v43  ;;  %3609 = vmatprep.subr.bf16.mxu0 %v3931_v44  ;;  %v3988_v43 = vld [vmem:[%s4901_s1 + $0x6d8] sm:$0xff]  }
  0x96   :  { %3631 = vmatprep.subr.bf16.mxu1 %v3932_v45  ;;  %v3989_v44 = vld [vmem:[%s4901_s1 + $0x618] sm:$0xff]  }
  0x97   :  { %v3990_v45 = vld [vmem:[%s4901_s1 + $0x698] sm:$0xff]  }
  0x98   :  { %3610 = vmatpush3.bf16.msra.mxu0 %v3933_v46  ;;  %v3991_v46 = vld [vmem:[%s4901_s1 + $0x660] sm:$0xff]  }
  0x99   :  { %3632 = vmatpush3.bf16.msra.mxu1 %v3934_v47  ;;  %3611 = vmatprep.subr.bf16.mxu0 %v3935_v48  ;;  %v3992_v47 = vld [vmem:[%s4901_s1 + $0x6e0] sm:$0xff]  }
  0x9a   :  { %3633 = vmatprep.subr.bf16.mxu1 %v3936_v49  ;;  %v3993_v48 = vld [vmem:[%s4901_s1 + $0x620] sm:$0xff]  }
  0x9b   :  { %v3994_v49 = vld [vmem:[%s4901_s1 + $0x6a0] sm:$0xff]  }
  0x9c   :  { %3612 = vmatpush3.bf16.msra.mxu0 %v3937_v50  ;;  %v3995_v50 = vld [vmem:[%s4901_s1 + $0x668] sm:$0xff]  }
  0x9d   :  { %3634 = vmatpush3.bf16.msra.mxu1 %v3938_v51  ;;  %3613 = vmatprep.subr.bf16.mxu0 %v3939_v52  ;;  %v3996_v51 = vld [vmem:[%s4901_s1 + $0x6e8] sm:$0xff]  }
  0x9e   :  { %3635 = vmatprep.subr.bf16.mxu1 %v3940_v53  ;;  %v3997_v52 = vld [vmem:[%s4901_s1 + $0x628] sm:$0xff]  }
  0x9f   :  { %v3998_v53 = vld [vmem:[%s4901_s1 + $0x6a8] sm:$0xff]  }
  0xa0   :  { %3614 = vmatpush3.bf16.msra.mxu0 %v3941_v54  ;;  %v3999_v54 = vld [vmem:[%s4901_s1 + $0x670] sm:$0xff]  }
  0xa1   :  { %3636 = vmatpush3.bf16.msra.mxu1 %v3942_v55  ;;  %3643 = vmatprep.subr.bf16.mxu0 %v3943_v56  ;;  %v4000_v55 = vld [vmem:[%s4901_s1 + $0x6f0] sm:$0xff]  }
  0xa2   :  { %3665 = vmatprep.subr.bf16.mxu1 %v3944_v57  ;;  %v4001_v56 = vld [vmem:[%s4901_s1 + $0x630] sm:$0xff]  }
  0xa3   :  { %1960 = vmatmul.mubr.bf16.vlgmr.msra.gmra.mrb[16].mxu0 %v4170_v36  ;;  %v4002_v57 = vld [vmem:[%s4901_s1 + $0x6b0] sm:$0xff]  }
  0xa4   :  { %2000 = vmatmul.mubr.bf16.vlgmr.msra.gmra.mrb[16].mxu1 %v4172_v37  ;;  %3644 = vmatpush3.bf16.msra.mxu0 %v3945_v58  ;;  %v4003_v58 = vld [vmem:[%s4901_s1 + $0x678] sm:$0xff]  }
  0xa5   :  { %3666 = vmatpush3.bf16.msra.mxu1 %v3946_v59  ;;  %2039 = vmatprep.mubr.bf16.mxu0 %v4277_v7  ;;  %v4004_v59 = vld [vmem:[%s4901_s1 + $0x6f8] sm:$0xff]  }
  0xa6   :  { %3645 = vmatprep.subr.bf16.mxu0 %v3947_v60  ;;  %2079 = vmatprep.mubr.bf16.mxu1 %v4284_v10  ;;  %v4005_v60 = vld [vmem:[%s4901_s1 + $0x638] sm:$0xff]  }
  0xa7   :  { %3667 = vmatprep.subr.bf16.mxu1 %v3948_v61  ;;  %v4006_v61 = vld [vmem:[%s4901_s1 + $0x6b8] sm:$0xff]  }
  0xa8   :  { %3646 = vmatpush3.bf16.msra.mxu0 %v3949_v62  ;;  %v4007_v62 = vld [vmem:[%s4901_s1 + $0x740] sm:$0xff]  }
  0xa9   :  { %3668 = vmatpush3.bf16.msra.mxu1 %v3950_v63  ;;  %3647 = vmatprep.subr.bf16.mxu0 %v3951_v0  ;;  %v4008_v63 = vld [vmem:[%s4901_s1 + $0x7c0] sm:$0xff]  }
  0xaa   :  { %3669 = vmatprep.subr.bf16.mxu1 %v3952_v1  ;;  %v4009_v0 = vld [vmem:[%s4901_s1 + $0x700] sm:$0xff]  }
  0xab   :  { %v4010_v1 = vld [vmem:[%s4901_s1 + $0x780] sm:$0xff]  }
  0xac   :  { %3648 = vmatpush3.bf16.msra.mxu0 %v3953_v2  ;;  %v4011_v2 = vld [vmem:[%s4901_s1 + $0x748] sm:$0xff]  }
  0xad   :  { %3670 = vmatpush3.bf16.msra.mxu1 %v3954_v3  ;;  %3649 = vmatprep.subr.bf16.mxu0 %v3955_v4  ;;  %v4012_v3 = vld [vmem:[%s4901_s1 + $0x7c8] sm:$0xff]   ;;  %v4015_v4 = vld [vmem:[%s4901_s1 + $0x750] sm:$0xff]  }
  0xae   :  { %3671 = vmatprep.subr.bf16.mxu1 %v3956_v5  ;;  %v4018_v5 = vld [vmem:[%s4901_s1 + $0x790] sm:$0xff]  }
  0xb0   :  { %3650 = vmatpush3.bf16.msra.mxu0 %v3957_v6  ;;  %v4019_v6 = vld [vmem:[%s4901_s1 + $0x758] sm:$0xff]  }
  0xb1   :  { %3672 = vmatpush3.bf16.msra.mxu1 %v3958_v8  ;;  %3651 = vmatprep.subr.bf16.mxu0 %v3959_v12  ;;  %v4020_v8 = vld [vmem:[%s4901_s1 + $0x7d8] sm:$0xff]  }
  0xb2   :  { %3673 = vmatprep.subr.bf16.mxu1 %v3960_v13  ;;  %v4021_v12 = vld [vmem:[%s4901_s1 + $0x718] sm:$0xff]  }
  0xb3   :  { %v4022_v13 = vld [vmem:[%s4901_s1 + $0x798] sm:$0xff]  }
  0xb4   :  { %3652 = vmatpush3.bf16.msra.mxu0 %v3961_v14  ;;  %v4023_v14 = vld [vmem:[%s4901_s1 + $0x760] sm:$0xff]  }
  0xb5   :  { %3674 = vmatpush3.bf16.msra.mxu1 %v3962_v15  ;;  %3653 = vmatprep.subr.bf16.mxu0 %v3963_v16  ;;  %v4024_v15 = vld [vmem:[%s4901_s1 + $0x7e0] sm:$0xff]  }
  0xb6   :  { %3675 = vmatprep.subr.bf16.mxu1 %v3964_v17  ;;  %v4025_v16 = vld [vmem:[%s4901_s1 + $0x720] sm:$0xff]  }
  0xb7   :  { %v4026_v17 = vld [vmem:[%s4901_s1 + $0x7a0] sm:$0xff]  }
  0xb8   :  { %3654 = vmatpush3.bf16.msra.mxu0 %v3965_v18  ;;  %v4027_v18 = vld [vmem:[%s4901_s1 + $0x768] sm:$0xff]  }
  0xb9   :  { %3676 = vmatpush3.bf16.msra.mxu1 %v3966_v19  ;;  %3655 = vmatprep.subr.bf16.mxu0 %v3967_v20 }
  0xba   :  { %3677 = vmatprep.subr.bf16.mxu1 %v3968_v21  ;;  %v4028_v21 = vld [vmem:[%s4901_s1 + $0x7e8] sm:$0xff]  }
  0xbc   :  { %3656 = vmatpush3.bf16.msra.mxu0 %v3969_v22  ;;  %v4029_v22 = vld [vmem:[%s4901_s1 + $0x728] sm:$0xff]  }
  0xbd   :  { %3678 = vmatpush3.bf16.msra.mxu1 %v3970_v23  ;;  %3657 = vmatprep.subr.bf16.mxu0 %v3971_v24 }
  0xbe   :  { %3679 = vmatprep.subr.bf16.mxu1 %v3972_v25 }
  0xc0   :  { %3658 = vmatpush3.bf16.msra.mxu0 %v3973_v26 }
  0xc1   :  { %3680 = vmatpush3.bf16.msra.mxu1 %v3974_v27  ;;  %3687 = vmatprep.subr.bf16.mxu0 %v3975_v28 }
  0xc2   :  { %3709 = vmatprep.subr.bf16.mxu1 %v3976_v29  ;;  %v4030_v29 = vld [vmem:[%s4901_s1 + $0x7a8] sm:$0xff]  }
  0xc3   :  { %2040 = vmatmul.mubr.bf16.vlgmr.msra.gmra.mrb[20].mxu0 %v4282_v9 }
  0xc4   :  { %2080 = vmatmul.mubr.bf16.vlgmr.msra.gmra.mrb[20].mxu1 %v4286_v11  ;;  %3688 = vmatpush3.bf16.msra.mxu0 %v3977_v30  ;;  %v4031_v30 = vld [vmem:[%s4901_s1 + $0x770] sm:$0xff]  }
  0xc5   :  { %3710 = vmatpush3.bf16.msra.mxu1 %v3978_v31  ;;  %2634 = vmatprep.mubr.bf16.mxu0 %v4166_v34  ;;  %v3984_v34 = vld [vmem:[%s4901_s1 + $0x6d0] sm:$0xff]  }
  0xc6   :  { %3689 = vmatprep.subr.bf16.mxu0 %v3979_v32  ;;  %2674 = vmatprep.mubr.bf16.mxu1 %v4168_v35  ;;  %v3985_v35 = vld [vmem:[%s4901_s1 + $0x610] sm:$0xff]  }
  0xc7   :  { %3711 = vmatprep.subr.bf16.mxu1 %v3980_v33 }
  0xc8   :  { %3690 = vmatpush3.bf16.msra.mxu0 %v3981_v38  ;;  %v4032_v38 = vld [vmem:[%s4901_s1 + $0x7f0] sm:$0xff]  }
  0xc9   :  { %3712 = vmatpush3.bf16.msra.mxu1 %v3982_v39  ;;  %3691 = vmatprep.subr.bf16.mxu0 %v3983_v40  ;;  %v4033_v39 = vld [vmem:[%s4901_s1 + $0x730] sm:$0xff]  }
  0xca   :  { %3713 = vmatprep.subr.bf16.mxu1 %v3984_v34  ;;  %v4034_v40 = vld [vmem:[%s4901_s1 + $0x7b0] sm:$0xff]   ;;  %v4035_v34 = vld [vmem:[%s4901_s1 + $0x778] sm:$0xff]  }
  0xcc   :  { %3692 = vmatpush3.bf16.msra.mxu0 %v3985_v35  ;;  %v4036_v35 = vld [vmem:[%s4901_s1 + $0x7f8] sm:$0xff]  }
  0xcd   :  { %3714 = vmatpush3.bf16.msra.mxu1 %v3986_v41  ;;  %3693 = vmatprep.subr.bf16.mxu0 %v3987_v42  ;;  %v4037_v41 = vld [vmem:[%s4901_s1 + $0x738] sm:$0xff]  }
  0xce   :  { %3715 = vmatprep.subr.bf16.mxu1 %v3988_v43  ;;  %v4038_v42 = vld [vmem:[%s4901_s1 + $0x7b8] sm:$0xff]  }
  0xd0   :  { %3694 = vmatpush3.bf16.msra.mxu0 %v3989_v44 }
  0xd1   :  { %3716 = vmatpush3.bf16.msra.mxu1 %v3990_v45  ;;  %3695 = vmatprep.subr.bf16.mxu0 %v3991_v46 }
  0xd2   :  { %3717 = vmatprep.subr.bf16.mxu1 %v3992_v47 }
  0xd4   :  { %3696 = vmatpush3.bf16.msra.mxu0 %v3993_v48 }
  0xd5   :  { %3718 = vmatpush3.bf16.msra.mxu1 %v3994_v49  ;;  %3697 = vmatprep.subr.bf16.mxu0 %v3995_v50 }
  0xd6   :  { %3719 = vmatprep.subr.bf16.mxu1 %v3996_v51 }
  0xd8   :  { %3698 = vmatpush3.bf16.msra.mxu0 %v3997_v52 }
  0xd9   :  { %3720 = vmatpush3.bf16.msra.mxu1 %v3998_v53  ;;  %3699 = vmatprep.subr.bf16.mxu0 %v3999_v54 }
  0xda   :  { %3721 = vmatprep.subr.bf16.mxu1 %v4000_v55 }
  0xdc   :  { %3700 = vmatpush3.bf16.msra.mxu0 %v4001_v56 }
  0xdd   :  { %3722 = vmatpush3.bf16.msra.mxu1 %v4002_v57  ;;  %3701 = vmatprep.subr.bf16.mxu0 %v4003_v58 }
  0xde   :  { %3723 = vmatprep.subr.bf16.mxu1 %v4004_v59 }
  0xe0   :  { %3702 = vmatpush3.bf16.msra.mxu0 %v4005_v60 }
  0xe1   :  { %3724 = vmatpush3.bf16.msra.mxu1 %v4006_v61  ;;  %3731 = vmatprep.subr.bf16.mxu0 %v4007_v62 }
  0xe2   :  { %3753 = vmatprep.subr.bf16.mxu1 %v4008_v63 }
  0xe3   :  { %2635 = vmatmul.mubr.bf16.vlgmr.msra.gmra.mrb[24].mxu0 %v4170_v36  ;;  %v4013_v36 = vld [vmem:[%s4901_s1 + $0x708] sm:$0xff]  }
  0xe4   :  { %2675 = vmatmul.mubr.bf16.vlgmr.msra.gmra.mrb[24].mxu1 %v4172_v37  ;;  %3732 = vmatpush3.bf16.msra.mxu0 %v4009_v0  ;;  %v4014_v37 = vld [vmem:[%s4901_s1 + $0x788] sm:$0xff]  }
  0xe5   :  { %3754 = vmatpush3.bf16.msra.mxu1 %v4010_v1  ;;  %2714 = vmatprep.mubr.bf16.mxu0 %v4277_v7  ;;  %v4016_v7 = vld [vmem:[%s4901_s1 + $0x7d0] sm:$0xff]  }
  0xe6   :  { %3733 = vmatprep.subr.bf16.mxu0 %v4011_v2  ;;  %2754 = vmatprep.mubr.bf16.mxu1 %v4284_v10  ;;  %v4017_v10 = vld [vmem:[%s4901_s1 + $0x710] sm:$0xff]  }
  0xe7   :  { %3755 = vmatprep.subr.bf16.mxu1 %v4012_v3 }
  0xe8   :  { %3734 = vmatpush3.bf16.msra.mxu0 %v4013_v36 }
  0xe9   :  { %3756 = vmatpush3.bf16.msra.mxu1 %v4014_v37  ;;  %3735 = vmatprep.subr.bf16.mxu0 %v4015_v4  ;;  %v2845_v4 = vld [vmem:[%s4903_s2] ss:$0 sm:$0xff] }
  0xea   :  { %3757 = vmatprep.subr.bf16.mxu1 %v4016_v7 }
  0xec   :  { %3736 = vmatpush3.bf16.msra.mxu0 %v4017_v10 }
  0xed   :  { %3758 = vmatpush3.bf16.msra.mxu1 %v4018_v5  ;;  %3737 = vmatprep.subr.bf16.mxu0 %v4019_v6 }
  0xee   :  { %3759 = vmatprep.subr.bf16.mxu1 %v4020_v8 }
  0xf0   :  { %3738 = vmatpush3.bf16.msra.mxu0 %v4021_v12 }
  0xf1   :  { %3760 = vmatpush3.bf16.msra.mxu1 %v4022_v13  ;;  %3739 = vmatprep.subr.bf16.mxu0 %v4023_v14  ;;  %v2846_v14 = vld [vmem:[%s4904_s3] ss:$0 sm:$0xff] }
  0xf2   :  { %3761 = vmatprep.subr.bf16.mxu1 %v4024_v15 }
  0xf4   :  { %3740 = vmatpush3.bf16.msra.mxu0 %v4025_v16 }
  0xf5   :  { %3762 = vmatpush3.bf16.msra.mxu1 %v4026_v17  ;;  %3741 = vmatprep.subr.bf16.mxu0 %v4027_v18 }
  0xf6   :  { %v3439_v19 = vpop.f32.mrb[0].mxu0  ;;  %3763 = vmatprep.subr.bf16.mxu1 %v4028_v21 }
  0xf7   :  { %v3461_v20 = vpop.f32.mrb[0].mxu1  ;;  %v3440_v23 = vpop.f32.mrb[1].mxu0 }
  0xf8   :  { %v3462_v24 = vpop.f32.mrb[1].mxu1  ;;  %v3441_v25 = vadd.f32 %v3440_v23, %v3439_v19  ;;  %v3442_v27 = vpop.f32.mrb[2].mxu0  ;;  %3742 = vmatpush3.bf16.msra.mxu0 %v4029_v22 }
  0xf9   :  { %v3463_v26 = vadd.f32 %v3462_v24, %v3461_v20  ;;  %v3464_v28 = vpop.f32.mrb[2].mxu1  ;;  %v3443_v31 = vpop.f32.mrb[3].mxu0  ;;  %3764 = vmatpush3.bf16.msra.mxu1 %v4030_v29  ;;  %3743 = vmatprep.subr.bf16.mxu0 %v4031_v30 }
  0xfa   :  { %v3465_v32 = vpop.f32.mrb[3].mxu1  ;;  %3765 = vmatprep.subr.bf16.mxu1 %v4032_v38 }
  0xfb   :  { %v639_v33 = vadd.f32 %v3463_v26, %v3441_v25 }
  0xfc   :  { %3744 = vmatpush3.bf16.msra.mxu0 %v4033_v39 }
  0xfd   :  { %3766 = vmatpush3.bf16.msra.mxu1 %v4034_v40  ;;  %3745 = vmatprep.subr.bf16.mxu0 %v4035_v34 }
  0xfe   :  { %3767 = vmatprep.subr.bf16.mxu1 %v4036_v35 }
 0x100   :  { %3746 = vmatpush3.bf16.msra.mxu0 %v4037_v41 }
 0x101   :  { %3768 = vmatpush3.bf16.msra.mxu1 %v4038_v42 }
 0x103   :  { %2715 = vmatmul.mubr.bf16.vlgmr.msra.gmra.mrb[28].mxu0 %v4282_v9 }
 0x104   :  { %2755 = vmatmul.mubr.bf16.vlgmr.msra.gmra.mrb[28].mxu1 %v4286_v11 }
 0x116   :  { %v3483_v43 = vpop.f32.mrb[4].mxu0 }
 0x117   :  { %v3505_v44 = vpop.f32.mrb[4].mxu1  ;;  %v3484_v45 = vpop.f32.mrb[5].mxu0 }
 0x118   :  { %v3506_v46 = vpop.f32.mrb[5].mxu1  ;;  %v3485_v47 = vadd.f32 %v3484_v45, %v3483_v43  ;;  %v3486_v49 = vpop.f32.mrb[6].mxu0 }
 0x119   :  { %v3507_v48 = vadd.f32 %v3506_v46, %v3505_v44  ;;  %v3508_v50 = vpop.f32.mrb[6].mxu1  ;;  %v3487_v51 = vpop.f32.mrb[7].mxu0 }
 0x11a   :  { %v3509_v52 = vpop.f32.mrb[7].mxu1  ;;  %v679_v53 = vadd.f32 %v3485_v47, %v639_v33 }
 0x11c   :  { %v719_v54 = vadd.f32 %v3507_v48, %v679_v53 }
 0x11e   :  { %v730_v12 = vmul.f32 %v2845_v4, %v719_v54 }
 0x120   :  { %v737_v16 = vadd.f32 %v2846_v14, %v730_v12 }
 0x136   :  { %v3527_v55 = vpop.f32.mrb[8].mxu0 }
 0x137   :  { %v3549_v56 = vpop.f32.mrb[8].mxu1  ;;  %v3528_v57 = vpop.f32.mrb[9].mxu0 }
 0x138   :  { %v3529_v58 = vadd.f32 %v3528_v57, %v3527_v55  ;;  %v3550_v59 = vpop.f32.mrb[9].mxu1  ;;  %v3530_v9 = vpop.f32.mrb[10].mxu0 }
 0x139   :  { %v3551_v60 = vadd.f32 %v3550_v59, %v3549_v56  ;;  %v3552_v11 = vpop.f32.mrb[10].mxu1  ;;  %v3531_v61 = vpop.f32.mrb[11].mxu0 }
 0x13a   :  { %v3553_v62 = vpop.f32.mrb[11].mxu1 }
 0x13b   :  { %v1326_v63 = vadd.f32 %v3551_v60, %v3529_v58 }
 0x156   :  { %v3571_v0 = vpop.f32.mrb[12].mxu0 }
 0x157   :  { %v3593_v1 = vpop.f32.mrb[12].mxu1  ;;  %v3572_v2 = vpop.f32.mrb[13].mxu0 }
 0x158   :  { %v3573_v3 = vadd.f32 %v3572_v2, %v3571_v0  ;;  %v3594_v36 = vpop.f32.mrb[13].mxu1  ;;  %v3574_v37 = vpop.f32.mrb[14].mxu0 }
 0x159   :  { %v3595_v7 = vadd.f32 %v3594_v36, %v3593_v1  ;;  %v3596_v10 = vpop.f32.mrb[14].mxu1  ;;  %v3575_v5 = vpop.f32.mrb[15].mxu0 }
 0x15a   :  { %v1366_v6 = vadd.f32 %v3573_v3, %v1326_v63  ;;  %v3597_v8 = vpop.f32.mrb[15].mxu1 }
 0x15c   :  { %v1406_v13 = vadd.f32 %v3595_v7, %v1366_v6 }
 0x15e   :  { %v1411_v15 = vmul.f32 %v2845_v4, %v1406_v13 }
 0x160   :  { %v1412_v17 = vadd.f32 %v2846_v14, %v1411_v15 }
 0x162   :  { %v1413_v18 = vmax.f32 %v737_v16, %v1412_v17 }
 0x176   :  { %v3615_v19 = vpop.f32.mrb[16].mxu0 }
 0x177   :  { %v3637_v20 = vpop.f32.mrb[16].mxu1  ;;  %v3616_v21 = vpop.f32.mrb[17].mxu0 }
 0x178   :  { %v3617_v22 = vadd.f32 %v3616_v21, %v3615_v19  ;;  %v3638_v23 = vpop.f32.mrb[17].mxu1  ;;  %v3618_v24 = vpop.f32.mrb[18].mxu0 }
 0x179   :  { %v3639_v25 = vadd.f32 %v3638_v23, %v3637_v20  ;;  %v3640_v26 = vpop.f32.mrb[18].mxu1  ;;  %v3619_v27 = vpop.f32.mrb[19].mxu0 }
 0x17a   :  { %v3641_v28 = vpop.f32.mrb[19].mxu1 }
 0x17b   :  { %v2002_v29 = vadd.f32 %v3639_v25, %v3617_v22 }
 0x196   :  { %v3659_v30 = vpop.f32.mrb[20].mxu0 }
 0x197   :  { %v3681_v31 = vpop.f32.mrb[20].mxu1  ;;  %v3660_v32 = vpop.f32.mrb[21].mxu0 }
 0x198   :  { %v3661_v33 = vadd.f32 %v3660_v32, %v3659_v30  ;;  %v3682_v38 = vpop.f32.mrb[21].mxu1  ;;  %v3662_v39 = vpop.f32.mrb[22].mxu0 }
 0x199   :  { %v3683_v40 = vadd.f32 %v3682_v38, %v3681_v31  ;;  %v3684_v34 = vpop.f32.mrb[22].mxu1  ;;  %v3663_v35 = vpop.f32.mrb[23].mxu0 }
 0x19a   :  { %v2042_v41 = vadd.f32 %v3661_v33, %v2002_v29  ;;  %v3685_v42 = vpop.f32.mrb[23].mxu1 }
 0x19c   :  { %v2082_v43 = vadd.f32 %v3683_v40, %v2042_v41 }
 0x19e   :  { %v2087_v0 = vmul.f32 %v2845_v4, %v2082_v43 }
 0x1a0   :  { %v2088_v3 = vadd.f32 %v2846_v14, %v2087_v0 }
 0x1b6   :  { %v3703_v44 = vpop.f32.mrb[24].mxu0 }
 0x1b7   :  { %v3725_v45 = vpop.f32.mrb[24].mxu1  ;;  %v3704_v46 = vpop.f32.mrb[25].mxu0 }
 0x1b8   :  { %v3705_v47 = vadd.f32 %v3704_v46, %v3703_v44  ;;  %v3726_v48 = vpop.f32.mrb[25].mxu1  ;;  %v3706_v49 = vpop.f32.mrb[26].mxu0 }
 0x1b9   :  { %v3727_v50 = vadd.f32 %v3726_v48, %v3725_v45  ;;  %v3728_v51 = vpop.f32.mrb[26].mxu1  ;;  %v3707_v52 = vpop.f32.mrb[27].mxu0 }
 0x1ba   :  { %v3729_v53 = vpop.f32.mrb[27].mxu1 }
 0x1bb   :  { %v2677_v54 = vadd.f32 %v3727_v50, %v3705_v47 }
 0x1d6   :  { %v3747_v55 = vpop.f32.mrb[28].mxu0 }
 0x1d7   :  { %v3769_v56 = vpop.f32.mrb[28].mxu1  ;;  %v3748_v57 = vpop.f32.mrb[29].mxu0 }
 0x1d8   :  { %v3749_v58 = vadd.f32 %v3748_v57, %v3747_v55  ;;  %v3770_v59 = vpop.f32.mrb[29].mxu1  ;;  %v3750_v9 = vpop.f32.mrb[30].mxu0 }
 0x1d9   :  { %v3771_v60 = vadd.f32 %v3770_v59, %v3769_v56  ;;  %v3772_v11 = vpop.f32.mrb[30].mxu1  ;;  %v3751_v61 = vpop.f32.mrb[31].mxu0 }
 0x1da   :  { %v2717_v62 = vadd.f32 %v3749_v58, %v2677_v54  ;;  %v3773_v63 = vpop.f32.mrb[31].mxu1 }
 0x1dc   :  { %v2757_v1 = vadd.f32 %v3771_v60, %v2717_v62 }
 0x1de   :  { %v2762_v2 = vmul.f32 %v2845_v4, %v2757_v1 }
 0x1e0   :  { %v2763_v36 = vadd.f32 %v2846_v14, %v2762_v2 }
 0x1e2   :  { %v2764_v37 = vmax.f32 %v2088_v3, %v2763_v36 }
 0x1e4   :  { %v2765_v7 = vmax.f32 %v1413_v18, %v2764_v37 }
 0x1e6   :  { %v2766_v10 = vmax.f32 %v2765_v7, 0.0 }
 0x1e8   :  { %v2767_v5 = vpack.c.bf16 %v2766_v10, %v2766_v10 }
 0x1ea   :  { %2768 = vst [vmem:[%s4905_s4] sm:$0xf] %v2767_v5 }

</bundles_post_ra>
